<compile_context>
chip_gen: v5e
topology: v5e:2x2
jax: 0.10.0
libtpu: 0.0.40
codegen_flags: <defaults>
</compile_context>

<pallas_src>
import functools

import jax
import jax.numpy as jnp
import numpy as np
from jax import lax
from jax.experimental import pallas as pl
from jax.experimental.pallas import tpu as pltpu

NUM_CLASSES = 10

# Layer dims fixed by the PyTorch module.
CIN = 6          # Conv3d input channels
C1 = 32          # Conv3d #1 output channels
C2 = 64          # Conv3d #2 output channels
FC = 128         # classifier hidden width
KD1, KW1 = 3, 5  # Conv3d #1 kernel (kd, kw); kh == 1
KD2, KW2 = 3, 3  # Conv3d #2 kernel (kd, kw); kh == 1

K1 = KW1 * CIN   # 30  -> conv1 contraction per-dd tap
K2 = KD2 * C1    # 96  -> conv2 contraction per-dw tap


def _round_up(v, m):
    return ((v + m - 1) // m) * m


# ----------------------------- Pallas kernel -------------------------------

def _fused_kernel(x_ref, mask_ref, w1_ref, b1_ref, w2_ref, b2_ref,
                  fw1_ref, fb1_ref, fw2_ref, fb2_ref,
                  o_ref, hs_ref, acc_ref, *, P, Mc, inv_dhw):
    """One grid step = one batch element x one chunk of H planes.

    Row space (shared by x windows / conv1 output / staged h1 / conv2 output):
      r = h_local * (D+2) * P + dp * P + w,   dp in [0, D+2), w in [0, P)
    with P = row pitch (>= W+1, multiple of 8).  Rows with dp >= D or w >= W
    are "junk": they are zeroed (mask) before staging -- which is exactly
    conv2's implicit zero padding -- and before pooling.

      x_ref   : [Mc + 2P, 30]   per-output-row conv1 W-window (kw,cin) fold
      mask_ref: [Mc, 1]         1.0 on valid (dp < D, w < W) rows, else 0.0
      w1_ref  : [3, 30, 32]     conv1 weights, per kd tap, K = (kw, cin)
      w2_ref  : [3, 96, 64]     conv2 weights, per kw tap, K = (kd, c1)
      fw1/fb1 : [64, 128]/[1, 128]   classifier layer 1
      fw2/fb2 : [128, nc]/[1, nc]    classifier layer 2
      o_ref   : [1, nc]         logits (written on the last H chunk)
      hs_ref  : [Mc + 2P, 96]   staged conv1 output: three D-shifted copies
      acc_ref : [1, 64]         running global-average-pool sum
    """
    c_idx = pl.program_id(1)
    mask = mask_ref[...]                                   # [Mc, 1]

    # ---- Conv3d(6,32,(3,1,5)) + bias + ReLU : 3 MXU dots, K = 30 ----------
    a1 = jnp.dot(x_ref[0:Mc, :], w1_ref[0],
                 preferred_element_type=jnp.float32)
    a1 = a1 + jnp.dot(x_ref[P:P + Mc, :], w1_ref[1],
                      preferred_element_type=jnp.float32)
    a1 = a1 + jnp.dot(x_ref[2 * P:2 * P + Mc, :], w1_ref[2],
                      preferred_element_type=jnp.float32)
    h1 = jnp.maximum(a1 + b1_ref[...], 0.0) * mask         # [Mc, 32]

    # ---- Stage h1 for conv2 (never touches HBM) ----------------------------
    # Zero only the two small halo bands (conv2's D padding at the chunk
    # edges); done every step so it is safe under megacore N-sharding.
    hs_ref[0:2 * P, :] = jnp.zeros((2 * P, K2), jnp.float32)
    hs_ref[Mc:Mc + 2 * P, :] = jnp.zeros((2 * P, K2), jnp.float32)
    # Three D-shifted copies side by side -> conv2 contraction K = 96.
    # Column group dd holds h1 shifted by (1 - dd) * P rows (aligned stores).
    hs_ref[2 * P:2 * P + Mc, 0:C1] = h1          # dd = 0 tap (d - 1)
    hs_ref[P:P + Mc, C1:2 * C1] = h1             # dd = 1 tap (d)
    hs_ref[0:Mc, 2 * C1:3 * C1] = h1             # dd = 2 tap (d + 1)

    # ---- Conv3d(32,64,(3,1,3)) + bias + ReLU : 3 MXU dots, K = 96 ---------
    a2 = jnp.dot(hs_ref[P - 1:P - 1 + Mc, :], w2_ref[0],
                 preferred_element_type=jnp.float32)
    a2 = a2 + jnp.dot(hs_ref[P:P + Mc, :], w2_ref[1],
                      preferred_element_type=jnp.float32)
    a2 = a2 + jnp.dot(hs_ref[P + 1:P + 1 + Mc, :], w2_ref[2],
                      preferred_element_type=jnp.float32)
    h2 = jnp.maximum(a2 + b2_ref[...], 0.0) * mask         # [Mc, 64]

    # ---- AdaptiveAvgPool3d((1,1,1)): accumulate over H chunks --------------
    @pl.when(c_idx == 0)
    def _():
        acc_ref[...] = jnp.zeros_like(acc_ref)

    acc_ref[...] += jnp.sum(h2, axis=0, keepdims=True)

    # ---- Finalize once per batch element: mean + Linear/ReLU/Linear --------
    @pl.when(c_idx == pl.num_programs(1) - 1)
    def _():
        pooled = acc_ref[...] * inv_dhw                                   # [1, 64]
        z = jnp.dot(pooled, fw1_ref[...], preferred_element_type=jnp.float32)
        z = jnp.maximum(z + fb1_ref[...], 0.0)                            # [1, 128]
        o_ref[...] = (jnp.dot(z, fw2_ref[...],
                              preferred_element_type=jnp.float32) + fb2_ref[...])


# ------------------------------- JAX glue ----------------------------------

def init_params(key, num_classes=NUM_CLASSES):
    """Deterministic synthetic parameters in PyTorch layouts."""
    ks = jax.random.split(key, 8)

    def u(k, shape, fan_in):
        bound = 1.0 / np.sqrt(fan_in)
        return jax.random.uniform(k, shape, jnp.float32, -bound, bound)

    return {
        "conv1_w": u(ks[0], (C1, CIN, KD1, 1, KW1), CIN * KD1 * KW1),   # (Cout,Cin,kd,kh,kw)
        "conv1_b": u(ks[1], (C1,), CIN * KD1 * KW1),
        "conv2_w": u(ks[2], (C2, C1, KD2, 1, KW2), C1 * KD2 * KW2),
        "conv2_b": u(ks[3], (C2,), C1 * KD2 * KW2),
        "fc1_w":   u(ks[4], (FC, C2), C2),                              # (out,in)
        "fc1_b":   u(ks[5], (FC,), C2),
        "fc2_w":   u(ks[6], (NUM_CLASSES, FC), FC) if num_classes == NUM_CLASSES
                   else u(ks[6], (num_classes, FC), FC),
        "fc2_b":   u(ks[7], (num_classes,), FC),
    }


def prepare_params(p):
    """One-time re-layout of the PyTorch weights into kernel layouts."""
    nc = p["fc2_w"].shape[0]
    # conv1: (Cout,Cin,kd,1,kw) -> [kd, kw*cin, Cout]   (K index = kw*6 + cin)
    w1 = jnp.transpose(p["conv1_w"][:, :, :, 0, :], (2, 3, 1, 0))       # [3,5,6,32]
    w1f = w1.reshape(KD1, K1, C1)
    # conv2: (Cout,Cin,kd,1,kw) -> [kw, kd*c1, Cout]    (K index = kd*32 + c1)
    w2 = jnp.transpose(p["conv2_w"][:, :, :, 0, :], (3, 2, 1, 0))       # [3,3,32,64]
    w2f = w2.reshape(KW2, K2, C2)
    return {
        "w1":  w1f,
        "b1":  p["conv1_b"].reshape(1, C1),
        "w2":  w2f,
        "b2":  p["conv2_b"].reshape(1, C2),
        "fw1": p["fc1_w"].T,                                            # [64,128]
        "fb1": p["fc1_b"].reshape(1, FC),
        "fw2": p["fc2_w"].T,                                            # [128,nc]
        "fb2": p["fc2_b"].reshape(1, nc),
    }


def forward(x, kp, h_chunk=None):
    """x: [N, 6, D, H, W] float32 (NCDHW, as in PyTorch). Returns [N, nc]."""
    N, C, D, H, W = x.shape
    assert C == CIN
    nc = kp["fw2"].shape[1]

    P = _round_up(W + 1, 8)         # row pitch; >= W+1 so junk cols give conv2's W-pad
    Dp = D + 2                      # conv1 D-padded rows per plane
    plane_rows = Dp * P

    # ---- H chunking (amortize per-step overhead, bounded by VMEM) ----------
    if h_chunk is None:
        row_bytes = 5 * 128 * 4     # x(x2 buf) + mask(x2) + staging, per row (lane-padded)
        budget = 24 * 1024 * 1024   # keeps total block VMEM well under v7x's 64 MiB/TC
        max_rows = max(plane_rows, budget // row_bytes)
        hc = max(1, min(H, max_rows // plane_rows))
        while H % hc:
            hc -= 1
    else:
        hc = int(h_chunk)
        assert H % hc == 0, "h_chunk must divide H"
    n_chunks = H // hc
    Mc = hc * plane_rows            # matmul M per step (multiple of 8)
    RIN = Mc + 2 * P                # x-block rows incl. tap-overshoot slack
    RH = Mc + 2 * P                 # staging-scratch rows

    # ---- Wrapper-side W-only im2col for conv1 (cheap: ~5x the raw input) ---
    xcl = jnp.transpose(x, (0, 3, 2, 4, 1))                            # [N,H,D,W,C]
    xp = jnp.pad(xcl, ((0, 0), (0, 0), (1, 1), (2, P - W + 2), (0, 0)))  # [N,H,Dp,P+4,C]
    xwin = jnp.stack([xp[:, :, :, j:j + P, :] for j in range(KW1)], axis=4)
    xwin = xwin.reshape(N, H, plane_rows, K1)                          # rows=(dp,w), cols=(kw,cin)
    xwin = xwin.reshape(N, n_chunks, Mc, K1)
    xwin = jnp.pad(xwin, ((0, 0), (0, 0), (0, 2 * P), (0, 0)))         # [N,chunks,RIN,30]

    # Valid-row mask (dp < D and w < W); same for every chunk -> one DMA.
    mrow = ((jnp.arange(Dp) < D)[:, None] & (jnp.arange(P) < W)[None, :])
    mask = jnp.broadcast_to(mrow.astype(jnp.float32).reshape(1, Dp, P),
                            (hc, Dp, P)).reshape(Mc, 1)

    kernel = functools.partial(_fused_kernel, P=P, Mc=Mc,
                               inv_dhw=1.0 / float(D * H * W))

    flops = (2 * N * n_chunks * Mc * (KD1 * K1 * C1 + KW2 * K2 * C2)
             + 2 * N * (C2 * FC + FC * nc))
    bytes_accessed = int(xwin.size + mask.size
                         + sum(int(np.prod(v.shape)) for v in kp.values())
                         + N * nc) * 4

    # VMEM: lane dims (30 / 1 / 96) pad to one 128-lane tile per row.
    lane_bytes = 128 * 4
    vmem_est = (2 * RIN + 2 * Mc + RH) * lane_bytes + (2 << 20)
    vmem_limit = int(min(64 * 1024 * 1024,
                         max(32 * 1024 * 1024, vmem_est + 8 * 1024 * 1024)))

    out = pl.pallas_call(
        kernel,
        grid=(N, n_chunks),
        in_specs=[
            pl.BlockSpec((None, None, RIN, K1), lambda n, c: (n, c, 0, 0)),
            pl.BlockSpec((Mc, 1), lambda n, c: (0, 0)),
            pl.BlockSpec((KD1, K1, C1), lambda n, c: (0, 0, 0)),
            pl.BlockSpec((1, C1), lambda n, c: (0, 0)),
            pl.BlockSpec((KW2, K2, C2), lambda n, c: (0, 0, 0)),
            pl.BlockSpec((1, C2), lambda n, c: (0, 0)),
            pl.BlockSpec((C2, FC), lambda n, c: (0, 0)),
            pl.BlockSpec((1, FC), lambda n, c: (0, 0)),
            pl.BlockSpec((FC, nc), lambda n, c: (0, 0)),
            pl.BlockSpec((1, nc), lambda n, c: (0, 0)),
        ],
        out_specs=pl.BlockSpec((None, 1, nc), lambda n, c: (n, 0, 0)),
        out_shape=jax.ShapeDtypeStruct((N, 1, nc), jnp.float32),
        scratch_shapes=[
            pltpu.VMEM((RH, K2), jnp.float32),   # staged conv1 output (3 D-shifted copies)
            pltpu.VMEM((1, C2), jnp.float32),    # global-average-pool accumulator
        ],
        compiler_params=pltpu.CompilerParams(
            dimension_semantics=("parallel", "arbitrary"),
            vmem_limit_bytes=vmem_limit,
        ),
        cost_estimate=pl.CostEstimate(flops=int(flops), transcendentals=0,
                                      bytes_accessed=int(bytes_accessed)),
    )(xwin, mask, kp["w1"], kp["b1"], kp["w2"], kp["b2"],
      kp["fw1"], kp["fb1"], kp["fw2"], kp["fb2"])

    # TODO(synk): for v7x with N == 1, shard H chunks across both TensorCores
    # (second "parallel" axis producing partial pool sums + a tiny reduce).
    return out.reshape(N, nc)


def reference_forward(x, p):
    """Pure-JAX reference (independent path) for verification."""
    dn = ("NCDHW", "OIDHW", "NCDHW")
    h = lax.conv_general_dilated(x, p["conv1_w"], (1, 1, 1),
                                 [(1, 1), (0, 0), (2, 2)], dimension_numbers=dn,
                                 precision=lax.Precision.HIGHEST)
    h = jnp.maximum(h + p["conv1_b"][None, :, None, None, None], 0.0)
    h = lax.conv_general_dilated(h, p["conv2_w"], (1, 1, 1),
                                 [(1, 1), (0, 0), (1, 1)], dimension_numbers=dn,
                                 precision=lax.Precision.HIGHEST)
    h = jnp.maximum(h + p["conv2_b"][None, :, None, None, None], 0.0)
    h = jnp.mean(h, axis=(2, 3, 4))                       # AdaptiveAvgPool3d + Flatten
    h = jnp.maximum(h @ p["fc1_w"].T + p["fc1_b"], 0.0)
    return h @ p["fc2_w"].T + p["fc2_b"]


if __name__ == "__main__":
    key = jax.random.PRNGKey(0)
    kx, kparam = jax.random.split(key)

    # Small synthetic shapes consistent with the module: NCDHW, C must be 6.
    N, C, D, H, W = 2, 6, 8, 4, 16
    x = jax.random.normal(kx, (N, C, D, H, W), jnp.float32)
    params = init_params(kparam, NUM_CLASSES)
    kparams = prepare_params(params)          # one-time weight re-layout

    # h_chunk=2 -> 2 H-chunks per batch element (exercises the accumulate path).
    fwd = jax.jit(functools.partial(forward, h_chunk=2))
    out = fwd(x, kparams)
    out = jax.block_until_ready(out)

    ref = reference_forward(x, params)
    assert out.shape == (N, NUM_CLASSES)
    np.testing.assert_allclose(np.asarray(out), np.asarray(ref), rtol=2e-2, atol=2e-2)

    print("KERNEL_OK")
</pallas_src>

<mosaic_0001>
module attributes {stable_mosaic.version = 11 : i64} {
  func.func @_fused_kernel(%arg0: i32, %arg1: i32, %arg2: memref<1x1x528x30xf32, #tpu.memory_space<vmem>>, %arg3: memref<480x1xf32, #tpu.memory_space<vmem>>, %arg4: memref<3x30x32xf32, #tpu.memory_space<vmem>>, %arg5: memref<1x32xf32, #tpu.memory_space<vmem>>, %arg6: memref<3x96x64xf32, #tpu.memory_space<vmem>>, %arg7: memref<1x64xf32, #tpu.memory_space<vmem>>, %arg8: memref<64x128xf32, #tpu.memory_space<vmem>>, %arg9: memref<1x128xf32, #tpu.memory_space<vmem>>, %arg10: memref<128x10xf32, #tpu.memory_space<vmem>>, %arg11: memref<1x10xf32, #tpu.memory_space<vmem>>, %arg12: memref<1x1x10xf32, #tpu.memory_space<vmem>>, %arg13: memref<528x96xf32, #tpu.memory_space<vmem>>, %arg14: memref<1x64xf32, #tpu.memory_space<vmem>>) attributes {dimension_semantics = [#tpu.dimension_semantics<parallel>, #tpu.dimension_semantics<arbitrary>], iteration_bounds = array<i64: 2, 2>, scalar_prefetch = 0 : i64, scratch_operands = 2 : i64, tpu.core_type = #tpu.core_type<tc>, window_params = [{transform_indices = @transform_0, window_bounds = array<i64: 1, 1, 528, 30>}, {pipeline_mode = #tpu.pipeline_mode<synchronous>, transform_indices = @transform_1, window_bounds = array<i64: 480, 1>}, {pipeline_mode = #tpu.pipeline_mode<synchronous>, transform_indices = @transform_2, window_bounds = array<i64: 3, 30, 32>}, {pipeline_mode = #tpu.pipeline_mode<synchronous>, transform_indices = @transform_3, window_bounds = array<i64: 1, 32>}, {pipeline_mode = #tpu.pipeline_mode<synchronous>, transform_indices = @transform_4, window_bounds = array<i64: 3, 96, 64>}, {pipeline_mode = #tpu.pipeline_mode<synchronous>, transform_indices = @transform_5, window_bounds = array<i64: 1, 64>}, {pipeline_mode = #tpu.pipeline_mode<synchronous>, transform_indices = @transform_6, window_bounds = array<i64: 64, 128>}, {pipeline_mode = #tpu.pipeline_mode<synchronous>, transform_indices = @transform_7, window_bounds = array<i64: 1, 128>}, {pipeline_mode = #tpu.pipeline_mode<synchronous>, transform_indices = @transform_8, window_bounds = array<i64: 128, 10>}, {pipeline_mode = #tpu.pipeline_mode<synchronous>, transform_indices = @transform_9, window_bounds = array<i64: 1, 10>}, {transform_indices = @transform_10, window_bounds = array<i64: 1, 1, 10>}]} {
    %c0 = arith.constant 0 : index
    %c0_0 = arith.constant 0 : index
    %0 = vector.load %arg3[%c0, %c0_0] : memref<480x1xf32, #tpu.memory_space<vmem>>, vector<480x1xf32>
    %c0_1 = arith.constant 0 : index
    %c0_2 = arith.constant 0 : index
    %c0_3 = arith.constant 0 : index
    %c0_4 = arith.constant 0 : index
    %1 = vector.load %arg2[%c0_1, %c0_2, %c0_3, %c0_4] : memref<1x1x528x30xf32, #tpu.memory_space<vmem>>, vector<1x1x480x30xf32>
    %2 = vector.shape_cast %1 : vector<1x1x480x30xf32> to vector<480x30xf32>
    %c0_5 = arith.constant 0 : index
    %c0_6 = arith.constant 0 : index
    %c0_7 = arith.constant 0 : index
    %3 = vector.load %arg4[%c0_5, %c0_6, %c0_7] : memref<3x30x32xf32, #tpu.memory_space<vmem>>, vector<1x30x32xf32>
    %4 = vector.shape_cast %3 : vector<1x30x32xf32> to vector<30x32xf32>
    %cst = arith.constant dense<0.000000e+00> : vector<480x32xf32>
    %5 = tpu.matmul %2, %4, %cst {dimension_numbers = #tpu.dot_dimension_numbers<[1], [0], [0], [1], [0, 0, 1, 1], [], []>} : vector<480x30xf32>, vector<30x32xf32>, vector<480x32xf32> -> vector<480x32xf32>
    %c0_8 = arith.constant 0 : index
    %c0_9 = arith.constant 0 : index
    %c24 = arith.constant 24 : index
    %c0_10 = arith.constant 0 : index
    %6 = vector.load %arg2[%c0_8, %c0_9, %c24, %c0_10] : memref<1x1x528x30xf32, #tpu.memory_space<vmem>>, vector<1x1x480x30xf32>
    %7 = vector.shape_cast %6 : vector<1x1x480x30xf32> to vector<480x30xf32>
    %c1 = arith.constant 1 : index
    %c0_11 = arith.constant 0 : index
    %c0_12 = arith.constant 0 : index
    %8 = vector.load %arg4[%c1, %c0_11, %c0_12] : memref<3x30x32xf32, #tpu.memory_space<vmem>>, vector<1x30x32xf32>
    %9 = vector.shape_cast %8 : vector<1x30x32xf32> to vector<30x32xf32>
    %cst_13 = arith.constant dense<0.000000e+00> : vector<480x32xf32>
    %10 = tpu.matmul %7, %9, %cst_13 {dimension_numbers = #tpu.dot_dimension_numbers<[1], [0], [0], [1], [0, 0, 1, 1], [], []>} : vector<480x30xf32>, vector<30x32xf32>, vector<480x32xf32> -> vector<480x32xf32>
    %11 = arith.addf %5, %10 : vector<480x32xf32>
    %c0_14 = arith.constant 0 : index
    %c0_15 = arith.constant 0 : index
    %c48 = arith.constant 48 : index
    %c0_16 = arith.constant 0 : index
    %12 = vector.load %arg2[%c0_14, %c0_15, %c48, %c0_16] : memref<1x1x528x30xf32, #tpu.memory_space<vmem>>, vector<1x1x480x30xf32>
    %13 = vector.shape_cast %12 : vector<1x1x480x30xf32> to vector<480x30xf32>
    %c2 = arith.constant 2 : index
    %c0_17 = arith.constant 0 : index
    %c0_18 = arith.constant 0 : index
    %14 = vector.load %arg4[%c2, %c0_17, %c0_18] : memref<3x30x32xf32, #tpu.memory_space<vmem>>, vector<1x30x32xf32>
    %15 = vector.shape_cast %14 : vector<1x30x32xf32> to vector<30x32xf32>
    %cst_19 = arith.constant dense<0.000000e+00> : vector<480x32xf32>
    %16 = tpu.matmul %13, %15, %cst_19 {dimension_numbers = #tpu.dot_dimension_numbers<[1], [0], [0], [1], [0, 0, 1, 1], [], []>} : vector<480x30xf32>, vector<30x32xf32>, vector<480x32xf32> -> vector<480x32xf32>
    %17 = arith.addf %11, %16 : vector<480x32xf32>
    %c0_20 = arith.constant 0 : index
    %c0_21 = arith.constant 0 : index
    %18 = vector.load %arg5[%c0_20, %c0_21] : memref<1x32xf32, #tpu.memory_space<vmem>>, vector<1x32xf32>
    %19 = vector.broadcast %18 : vector<1x32xf32> to vector<480x32xf32>
    %20 = arith.addf %17, %19 : vector<480x32xf32>
    %cst_22 = arith.constant 0.000000e+00 : f32
    %21 = vector.broadcast %cst_22 : f32 to vector<480x32xf32>
    %22 = arith.maximumf %20, %21 : vector<480x32xf32>
    %23 = vector.broadcast %0 : vector<480x1xf32> to vector<480x32xf32>
    %24 = arith.mulf %22, %23 : vector<480x32xf32>
    %cst_23 = arith.constant 0.000000e+00 : f32
    %25 = vector.broadcast %cst_23 : f32 to vector<48x96xf32>
    %c0_24 = arith.constant 0 : index
    %c0_25 = arith.constant 0 : index
    %26 = vector.load %arg13[%c0_24, %c0_25] : memref<528x96xf32, #tpu.memory_space<vmem>>, vector<48x96xf32>
    tpu.vector_store %arg13[%c0_24, %c0_25], %25 {strides = array<i32>} : memref<528x96xf32, #tpu.memory_space<vmem>>, vector<48x96xf32>,
    %cst_26 = arith.constant 0.000000e+00 : f32
    %27 = vector.broadcast %cst_26 : f32 to vector<48x96xf32>
    %c480 = arith.constant 480 : index
    %c0_27 = arith.constant 0 : index
    %28 = vector.load %arg13[%c480, %c0_27] : memref<528x96xf32, #tpu.memory_space<vmem>>, vector<48x96xf32>
    tpu.vector_store %arg13[%c480, %c0_27], %27 {strides = array<i32>} : memref<528x96xf32, #tpu.memory_space<vmem>>, vector<48x96xf32>,
    %c48_28 = arith.constant 48 : index
    %c0_29 = arith.constant 0 : index
    %29 = vector.load %arg13[%c48_28, %c0_29] : memref<528x96xf32, #tpu.memory_space<vmem>>, vector<480x32xf32>
    tpu.vector_store %arg13[%c48_28, %c0_29], %24 {strides = array<i32>} : memref<528x96xf32, #tpu.memory_space<vmem>>, vector<480x32xf32>,
    %c24_30 = arith.constant 24 : index
    %c32 = arith.constant 32 : index
    %30 = vector.load %arg13[%c24_30, %c32] : memref<528x96xf32, #tpu.memory_space<vmem>>, vector<480x32xf32>
    tpu.vector_store %arg13[%c24_30, %c32], %24 {strides = array<i32>} : memref<528x96xf32, #tpu.memory_space<vmem>>, vector<480x32xf32>,
    %c0_31 = arith.constant 0 : index
    %c64 = arith.constant 64 : index
    %31 = vector.load %arg13[%c0_31, %c64] : memref<528x96xf32, #tpu.memory_space<vmem>>, vector<480x32xf32>
    tpu.vector_store %arg13[%c0_31, %c64], %24 {strides = array<i32>} : memref<528x96xf32, #tpu.memory_space<vmem>>, vector<480x32xf32>,
    %c23 = arith.constant 23 : index
    %c0_32 = arith.constant 0 : index
    %32 = vector.load %arg13[%c23, %c0_32] : memref<528x96xf32, #tpu.memory_space<vmem>>, vector<480x96xf32>
    %c0_33 = arith.constant 0 : index
    %c0_34 = arith.constant 0 : index
    %c0_35 = arith.constant 0 : index
    %33 = vector.load %arg6[%c0_33, %c0_34, %c0_35] : memref<3x96x64xf32, #tpu.memory_space<vmem>>, vector<1x96x64xf32>
    %34 = vector.shape_cast %33 : vector<1x96x64xf32> to vector<96x64xf32>
    %cst_36 = arith.constant dense<0.000000e+00> : vector<480x64xf32>
    %35 = tpu.matmul %32, %34, %cst_36 {dimension_numbers = #tpu.dot_dimension_numbers<[1], [0], [0], [1], [0, 0, 1, 1], [], []>} : vector<480x96xf32>, vector<96x64xf32>, vector<480x64xf32> -> vector<480x64xf32>
    %c24_37 = arith.constant 24 : index
    %c0_38 = arith.constant 0 : index
    %36 = vector.load %arg13[%c24_37, %c0_38] : memref<528x96xf32, #tpu.memory_space<vmem>>, vector<480x96xf32>
    %c1_39 = arith.constant 1 : index
    %c0_40 = arith.constant 0 : index
    %c0_41 = arith.constant 0 : index
    %37 = vector.load %arg6[%c1_39, %c0_40, %c0_41] : memref<3x96x64xf32, #tpu.memory_space<vmem>>, vector<1x96x64xf32>
    %38 = vector.shape_cast %37 : vector<1x96x64xf32> to vector<96x64xf32>
    %cst_42 = arith.constant dense<0.000000e+00> : vector<480x64xf32>
    %39 = tpu.matmul %36, %38, %cst_42 {dimension_numbers = #tpu.dot_dimension_numbers<[1], [0], [0], [1], [0, 0, 1, 1], [], []>} : vector<480x96xf32>, vector<96x64xf32>, vector<480x64xf32> -> vector<480x64xf32>
    %40 = arith.addf %35, %39 : vector<480x64xf32>
    %c25 = arith.constant 25 : index
    %c0_43 = arith.constant 0 : index
    %41 = vector.load %arg13[%c25, %c0_43] : memref<528x96xf32, #tpu.memory_space<vmem>>, vector<480x96xf32>
    %c2_44 = arith.constant 2 : index
    %c0_45 = arith.constant 0 : index
    %c0_46 = arith.constant 0 : index
    %42 = vector.load %arg6[%c2_44, %c0_45, %c0_46] : memref<3x96x64xf32, #tpu.memory_space<vmem>>, vector<1x96x64xf32>
    %43 = vector.shape_cast %42 : vector<1x96x64xf32> to vector<96x64xf32>
    %cst_47 = arith.constant dense<0.000000e+00> : vector<480x64xf32>
    %44 = tpu.matmul %41, %43, %cst_47 {dimension_numbers = #tpu.dot_dimension_numbers<[1], [0], [0], [1], [0, 0, 1, 1], [], []>} : vector<480x96xf32>, vector<96x64xf32>, vector<480x64xf32> -> vector<480x64xf32>
    %45 = arith.addf %40, %44 : vector<480x64xf32>
    %c0_48 = arith.constant 0 : index
    %c0_49 = arith.constant 0 : index
    %46 = vector.load %arg7[%c0_48, %c0_49] : memref<1x64xf32, #tpu.memory_space<vmem>>, vector<1x64xf32>
    %47 = vector.broadcast %46 : vector<1x64xf32> to vector<480x64xf32>
    %48 = arith.addf %45, %47 : vector<480x64xf32>
    %cst_50 = arith.constant 0.000000e+00 : f32
    %49 = vector.broadcast %cst_50 : f32 to vector<480x64xf32>
    %50 = arith.maximumf %48, %49 : vector<480x64xf32>
    %51 = vector.broadcast %0 : vector<480x1xf32> to vector<480x64xf32>
    %52 = arith.mulf %50, %51 : vector<480x64xf32>
    %c0_i32 = arith.constant 0 : i32
    %53 = arith.cmpi eq, %arg1, %c0_i32 : i32
    %54 = arith.extui %53 : i1 to i32
    %c0_i32_51 = arith.constant 0 : i32
    %55 = arith.cmpi ne, %54, %c0_i32_51 : i32
    scf.if %55 {
      %cst_58 = arith.constant 0.000000e+00 : f32
      %64 = vector.broadcast %cst_58 : f32 to vector<1x64xf32>
      %c0_59 = arith.constant 0 : index
      %c0_60 = arith.constant 0 : index
      %65 = vector.load %arg14[%c0_59, %c0_60] : memref<1x64xf32, #tpu.memory_space<vmem>>, vector<1x64xf32>
      tpu.vector_store %arg14[%c0_59, %c0_60], %64 {strides = array<i32>} : memref<1x64xf32, #tpu.memory_space<vmem>>, vector<1x64xf32>,
    } else {
    }
    %c0_52 = arith.constant 0 : index
    %c0_53 = arith.constant 0 : index
    %56 = vector.load %arg14[%c0_52, %c0_53] : memref<1x64xf32, #tpu.memory_space<vmem>>, vector<1x64xf32>
    %cst_54 = arith.constant dense<0.000000e+00> : vector<64xf32>
    %57 = vector.multi_reduction <add>, %52, %cst_54 [0] : vector<480x64xf32> to vector<64xf32>
    %58 = vector.shape_cast %57 : vector<64xf32> to vector<1x64xf32>
    %59 = arith.addf %56, %58 : vector<1x64xf32>
    %c0_55 = arith.constant 0 : index
    %c0_56 = arith.constant 0 : index
    %60 = vector.load %arg14[%c0_55, %c0_56] : memref<1x64xf32, #tpu.memory_space<vmem>>, vector<1x64xf32>
    tpu.vector_store %arg14[%c0_55, %c0_56], %59 {strides = array<i32>} : memref<1x64xf32, #tpu.memory_space<vmem>>, vector<1x64xf32>,
    %c1_i32 = arith.constant 1 : i32
    %61 = arith.cmpi eq, %arg1, %c1_i32 : i32
    %62 = arith.extui %61 : i1 to i32
    %c0_i32_57 = arith.constant 0 : i32
    %63 = arith.cmpi ne, %62, %c0_i32_57 : i32
    scf.if %63 {
      %c0_58 = arith.constant 0 : index
      %c0_59 = arith.constant 0 : index
      %64 = vector.load %arg14[%c0_58, %c0_59] : memref<1x64xf32, #tpu.memory_space<vmem>>, vector<1x64xf32>
      %cst_60 = arith.constant 0.001953125 : f32
      %65 = vector.broadcast %cst_60 : f32 to vector<1x64xf32>
      %66 = arith.mulf %64, %65 : vector<1x64xf32>
      %c0_61 = arith.constant 0 : index
      %c0_62 = arith.constant 0 : index
      %67 = vector.load %arg8[%c0_61, %c0_62] : memref<64x128xf32, #tpu.memory_space<vmem>>, vector<64x128xf32>
      %cst_63 = arith.constant dense<0.000000e+00> : vector<1x128xf32>
      %68 = tpu.matmul %66, %67, %cst_63 {dimension_numbers = #tpu.dot_dimension_numbers<[1], [0], [0], [1], [0, 0, 1, 1], [], []>} : vector<1x64xf32>, vector<64x128xf32>, vector<1x128xf32> -> vector<1x128xf32>
      %c0_64 = arith.constant 0 : index
      %c0_65 = arith.constant 0 : index
      %69 = vector.load %arg9[%c0_64, %c0_65] : memref<1x128xf32, #tpu.memory_space<vmem>>, vector<1x128xf32>
      %70 = arith.addf %68, %69 : vector<1x128xf32>
      %cst_66 = arith.constant 0.000000e+00 : f32
      %71 = vector.broadcast %cst_66 : f32 to vector<1x128xf32>
      %72 = arith.maximumf %70, %71 : vector<1x128xf32>
      %c0_67 = arith.constant 0 : index
      %c0_68 = arith.constant 0 : index
      %73 = vector.load %arg10[%c0_67, %c0_68] : memref<128x10xf32, #tpu.memory_space<vmem>>, vector<128x10xf32>
      %cst_69 = arith.constant dense<0.000000e+00> : vector<1x10xf32>
      %74 = tpu.matmul %72, %73, %cst_69 {dimension_numbers = #tpu.dot_dimension_numbers<[1], [0], [0], [1], [0, 0, 1, 1], [], []>} : vector<1x128xf32>, vector<128x10xf32>, vector<1x10xf32> -> vector<1x10xf32>
      %c0_70 = arith.constant 0 : index
      %c0_71 = arith.constant 0 : index
      %75 = vector.load %arg11[%c0_70, %c0_71] : memref<1x10xf32, #tpu.memory_space<vmem>>, vector<1x10xf32>
      %76 = arith.addf %74, %75 : vector<1x10xf32>
      %c0_72 = arith.constant 0 : index
      %c0_73 = arith.constant 0 : index
      %c0_74 = arith.constant 0 : index
      %77 = vector.load %arg12[%c0_72, %c0_73, %c0_74] : memref<1x1x10xf32, #tpu.memory_space<vmem>>, vector<1x1x10xf32>
      %78 = vector.shape_cast %77 : vector<1x1x10xf32> to vector<1x10xf32>
      %79 = vector.shape_cast %76 : vector<1x10xf32> to vector<1x1x10xf32>
      tpu.vector_store %arg12[%c0_72, %c0_73, %c0_74], %79 {strides = array<i32>} : memref<1x1x10xf32, #tpu.memory_space<vmem>>, vector<1x1x10xf32>,
    } else {
    }
    return
  }
  func.func @transform_0(%arg0: i32, %arg1: i32) -> (i32, i32, i32, i32) {
    %c0_i32 = arith.constant 0 : i32
    %c0_i32_0 = arith.constant 0 : i32
    %c0_i32_1 = arith.constant 0 : i32
    return %arg0, %arg1, %c0_i32, %c0_i32_0 : i32, i32, i32, i32
  }
  func.func @transform_1(%arg0: i32, %arg1: i32) -> (i32, i32) {
    %c0_i32 = arith.constant 0 : i32
    %c0_i32_0 = arith.constant 0 : i32
    %c0_i32_1 = arith.constant 0 : i32
    return %c0_i32, %c0_i32_0 : i32, i32
  }
  func.func @transform_2(%arg0: i32, %arg1: i32) -> (i32, i32, i32) {
    %c0_i32 = arith.constant 0 : i32
    %c0_i32_0 = arith.constant 0 : i32
    %c0_i32_1 = arith.constant 0 : i32
    %c0_i32_2 = arith.constant 0 : i32
    return %c0_i32, %c0_i32_0, %c0_i32_1 : i32, i32, i32
  }
  func.func @transform_3(%arg0: i32, %arg1: i32) -> (i32, i32) {
    %c0_i32 = arith.constant 0 : i32
    %c0_i32_0 = arith.constant 0 : i32
    %c0_i32_1 = arith.constant 0 : i32
    return %c0_i32, %c0_i32_0 : i32, i32
  }
  func.func @transform_4(%arg0: i32, %arg1: i32) -> (i32, i32, i32) {
    %c0_i32 = arith.constant 0 : i32
    %c0_i32_0 = arith.constant 0 : i32
    %c0_i32_1 = arith.constant 0 : i32
    %c0_i32_2 = arith.constant 0 : i32
    return %c0_i32, %c0_i32_0, %c0_i32_1 : i32, i32, i32
  }
  func.func @transform_5(%arg0: i32, %arg1: i32) -> (i32, i32) {
    %c0_i32 = arith.constant 0 : i32
    %c0_i32_0 = arith.constant 0 : i32
    %c0_i32_1 = arith.constant 0 : i32
    return %c0_i32, %c0_i32_0 : i32, i32
  }
  func.func @transform_6(%arg0: i32, %arg1: i32) -> (i32, i32) {
    %c0_i32 = arith.constant 0 : i32
    %c0_i32_0 = arith.constant 0 : i32
    %c0_i32_1 = arith.constant 0 : i32
    return %c0_i32, %c0_i32_0 : i32, i32
  }
  func.func @transform_7(%arg0: i32, %arg1: i32) -> (i32, i32) {
    %c0_i32 = arith.constant 0 : i32
    %c0_i32_0 = arith.constant 0 : i32
    %c0_i32_1 = arith.constant 0 : i32
    return %c0_i32, %c0_i32_0 : i32, i32
  }
  func.func @transform_8(%arg0: i32, %arg1: i32) -> (i32, i32) {
    %c0_i32 = arith.constant 0 : i32
    %c0_i32_0 = arith.constant 0 : i32
    %c0_i32_1 = arith.constant 0 : i32
    return %c0_i32, %c0_i32_0 : i32, i32
  }
  func.func @transform_9(%arg0: i32, %arg1: i32) -> (i32, i32) {
    %c0_i32 = arith.constant 0 : i32
    %c0_i32_0 = arith.constant 0 : i32
    %c0_i32_1 = arith.constant 0 : i32
    return %c0_i32, %c0_i32_0 : i32, i32
  }
  func.func @transform_10(%arg0: i32, %arg1: i32) -> (i32, i32, i32) {
    %c0_i32 = arith.constant 0 : i32
    %c0_i32_0 = arith.constant 0 : i32
    %c0_i32_1 = arith.constant 0 : i32
    return %arg0, %c0_i32, %c0_i32_0 : i32, i32, i32
  }
}

</mosaic_0001>

<bundles_post_ra>
// kernel: forward.1
= control target key start
LH: loop header
LB: loop body
LE: loop exit
PB: predicated region body
PF: predicated region fallthrough
CT: control target
= control target key end

     0   :  { %s7615_s0 = inlined_call_operand.vmem [shape: f32[2,2,528,30], index: 0, kind: input, shape index: {}]   ;;  %s7616_s1 = inlined_call_operand.vmem [shape: f32[480,1], index: 1, kind: input, shape index: {}]   ;;  %s7617_s2 = inlined_call_operand.vmem [shape: f32[3,30,32], index: 2, kind: input, shape index: {}]   ;;  %s7618_s3 = inlined_call_operand.vmem [shape: f32[1,32], index: 3, kind: input, shape index: {}]   ;;  %s7619_s4 = inlined_call_operand.vmem [shape: f32[3,96,64], index: 4, kind: input, shape index: {}]   ;;  %s7620_s5 = inlined_call_operand.vmem [shape: f32[1,64], index: 5, kind: input, shape index: {}]   ;;  %s7621_s6 = inlined_call_operand.vmem [shape: f32[64,128], index: 6, kind: input, shape index: {}]   ;;  %s7622_s7 = inlined_call_operand.vmem [shape: f32[1,128], index: 7, kind: input, shape index: {}]   ;;  %s7623_s8 = inlined_call_operand.vmem [shape: f32[128,10], index: 8, kind: input, shape index: {}]   ;;  %s7624_s9 = inlined_call_operand.vmem [shape: f32[1,10], index: 9, kind: input, shape index: {}]   ;;  %s7625_s10 = inlined_call_operand.hbm [shape: f32[2,1,10], index: 10, kind: output, shape index: {}]  }
   0x1   :  { %7648 = sst [smem:[#allocation58_spill]] %s7615_s0 }
   0x2   :  { %7649 = sst [smem:[#allocation59_spill]] %s7616_s1 }
   0x3   :  { %15 = vsyncpa [#allocation5], 0 }
   0x4   :  { %17 = vsyncpa [#allocation5 + $0x1], 0  ;;  %s5264_s13 = smov 0   ;;  %s5266_s14 = smov 0  }
   0x5   :  { %s5268_s15 = smov 0   ;;  %s5270_s16 = smov 0  }
   0x6   :  { %s5272_s17 = smov 0   ;;  %s5274_s18 = smov 0  }
   0x7   :  { %s5276_s19 = smov 0   ;;  %s5278_s20 = smov 0  }
   0x8 LB: > { %7650 = sst [smem:[#allocation7_spill]] %s5198_s19  ;;  %s4606_s21 = sadd.s32 4294967295, %s5202_s20   ;;  %s5202_s20 = sphi %s5278_s20, %s23_s20   ;;  %s5198_s19 = sphi %s5276_s19, %s7790_s19   ;;  %s5194_s18 = sphi %s5274_s18, %s7795_s18   ;;  %s5190_s17 = sphi %s5272_s17, %s7788_s17   ;;  %s5186_s16 = sphi %s5270_s16, %s7794_s16   ;;  %s5182_s15 = sphi %s5268_s15, %s7793_s15   ;;  %s5178_s14 = sphi %s5266_s14, %s7792_s14   ;;  %s5174_s13 = sphi %s5264_s13, %s7791_s13  }
   0x9   : > { %s4607_s22 = sadd.s32 4294967294, %s5202_s20   ;;  %s32_s23 = sadd.s32 1, %s5194_s18 }
   0xa   : > { %p33_p0 = scmp.ge.s32.totalorder %s32_s23, 2  ;;  %s35_s24 = sadd.s32 1, %s5198_s19 }
   0xb   : > { %p269_p1 = scmp.ne.s32.totalorder %s5182_s15, %s5178_s14  ;;  %p270_p2 = scmp.eq.s32.totalorder %s4606_s21, 3 }
   0xc   : > { %s7797_s23 = smov (%p33_p0, %s32_s23), 0  ;;  %s7799_s24 = smov (!%p33_p0, %s35_s24), %s5198_s19 }
   0xd   : > { %7651 = sst [smem:[#allocation8_spill]] %s7797_s23  ;;  %p5313_p3 = por %p270_p2, %p269_p1 }
   0xe   : > { %p275_p4 = scmp.ne.s32.totalorder %s5178_s14, %s5174_s13  ;;  %p37_p5 = scmp.ge.s32.totalorder %s7799_s24, 2 }
   0xf   : > { %p276_p6 = scmp.eq.s32.totalorder %s4607_s22, 3  ;;  %p4610_p7 = scmp.ge.s32.totalorder %s5202_s20, 1 }
  0x10   : > { %p333_p8 = scmp.lt.s32.totalorder %s5202_s20, 5  ;;  %s7801_s24 = smov (%p37_p5, %s7799_s24), 0 }
  0x11   : > { %7653 = sst [smem:[#allocation9_spill]] %s7801_s24  ;;  %p5323_p9 = por %p276_p6, %p275_p4 }
  0x12   : > { %p334_p10 = pnand %p4610_p7, %p333_p8  ;;  %s256_s27 = ssub.s32 %s5198_s19, %s7801_s24 }
  0x13   : > { %s259_s28 = sadd.s32 1, %s5182_s15  ;;  %p257_p11 = scmp.eq.s32.totalorder %s256_s27, 0 }
  0x14   : > { %337 = sbr.rel (%p334_p10) target bundleno = 1673 (0x689), region = 60 }
  0x15   : > { %s5331_s29 = scalar_select %p257_p11, %s5182_s15, %s259_s28  }
  0x19   : > { %v4615_v0 = vld [vmem:[%s7617_s2 + $0x38] sm:$0x3f]  ;;  %vm696_vm0 = vcmask 1045504   ;;  %v4614_v2 = vld [vmem:[%s7617_s2 + $0x30] sm:$0xff]  ;;  %p374_p12 = scmp.lt.s32.totalorder %s5190_s17, 1  ;;  %p376_p13 = scmp.lt.s32.totalorder %s5186_s16, 1 }
  0x1a   : > { %v506_v1 = vld [vmem:[%s7617_s2 + $0x18] sm:$0x3f]  ;;  %5012 = vmatpush.msk.msra.mxu2 %vm696_vm0, %v4615_v0  ;;  %v505_v3 = vld [vmem:[%s7617_s2 + $0x10] sm:$0xff]  ;;  %v4613_v4 = vld [vmem:[%s7617_s2 + $0x28] sm:$0xff]  ;;  %4616 = vmatpush.msk.msra.mxu0 %vm696_vm0, %v4615_v0  ;;  %vm515_vm1 = vcmask 244736   ;;  %s7655_s0 = sld [smem:[#allocation58_spill]] }
  0x1b   : > { %5016 = vmatpush.msk.msra.mxu3 %vm696_vm0, %v506_v1  ;;  %v504_v5 = vld [vmem:[%s7617_s2 + $0x8] sm:$0xff]  ;;  %4677 = vmatpush.msk.msra.mxu1 %vm696_vm0, %v506_v1  ;;  %s375_s23 = scalar_select %p374_p12, %s5190_s17, 1  ;;  %v4612_v6 = vld [vmem:[%s7617_s2 + $0x20] sm:$0xff]  ;;  %v4741_v8 = vld [vmem:[%s7617_s2 + $0x58] sm:$0x3f]  ;;  %vm2108_vm2 = vcmask 261120  }
  0x1c   : > { %5013 = vmatpush.msra.mxu2 %v4614_v2  ;;  %v503_v7 = vld [vmem:[%s7617_s2] sm:$0xff]  ;;  %s377_s30 = scalar_select %p376_p13, %s5186_s16, 1  ;;  %713 = vmatpush.msra.mxu0 %v4614_v2  ;;  %v4740_v16 = vld [vmem:[%s7617_s2 + $0x50] sm:$0xff]  ;;  %v4739_v25 = vld [vmem:[%s7617_s2 + $0x48] sm:$0xff]  ;;  %vm2095_vm3 = vcmask 785408   ;;  %vm2409_vm4 = vcmask 523520  }
  0x1d   : > { %5017 = vmatpush.msra.mxu3 %v505_v3  ;;  %922 = vmatpush.msra.mxu1 %v505_v3  ;;  %s5021_s11 = smul.u32 132, %s375_s23  ;;  %v4738_v42 = vld [vmem:[%s7617_s2 + $0x40] sm:$0xff]  ;;  %s7656_s1 = sld [smem:[#allocation59_spill]]  ;;  %vm2650_vm5 = vcmask 785920  }
  0x1e   : > { %5014 = vmatpush.msra.mxu2 %v4613_v4  ;;  %s5020_s19 = smul.u32 66, %s377_s30  ;;  %714 = vmatpush.msra.mxu0 %v4613_v4  ;;  %s5206_s28 = smov 64  }
  0x1f   : > { %5018 = vmatpush.msra.mxu3 %v504_v5  ;;  %923 = vmatpush.msra.mxu1 %v504_v5  ;;  %p5007_p0 = scmp.ne.s32.totalorder %s5186_s16, 0 }
  0x20   : > { %5015 = vmatpush.msra.mxu2 %v4612_v6  ;;  %s380_s22 = sadd.s32 %s5021_s11, %s5020_s19  ;;  %715 = vmatpush.msra.mxu0 %v4612_v6  ;;  %s7628_s19 = smov 32  }
  0x21   : > { %5019 = vmatpush.msra.mxu3 %v503_v7  ;;  %s4611_s24 = sshll.u32 %s380_s22, 3  ;;  %924 = vmatpush.msra.mxu1 %v503_v7  ;;  %s7770_s22 = sand.u32 1, %s5178_s14  }
  0x22   : > { %4742 = vmatpush.msk.msrb.mxu2 %vm696_vm0, %v4741_v8  ;;  %s5372_s23 = scalar_lea.vmem %s7655_s0, %s4611_s24  ;;  %s7682_s24 = smov 32  }
  0x23   : > { %v5375_v9 = vld [vmem:[%s5372_s23 + $0x108] sm:$0xff]  ;;  %v5378_v10 = vld [vmem:[%s5372_s23 + $0xf0] sm:$0xff]  ;;  %v5386_v12 = vld [vmem:[%s5372_s23 + $0xf8] sm:$0xff]  ;;  %s7366_s21 = scalar_lea.vmem [#allocation4], %s7770_s22 }
  0x24   : > { %4647 = vmatmul.msk.f32.vlgmr.msra.gmra.mxu2 %vm515_vm1, %v5375_v9  ;;  %4708 = vmatmul.msk.f32.vlgmr.msra.gmra.mxu3 %vm515_vm1, %v5378_v10  ;;  %v477_v11 = vld [vmem:[%s5372_s23 + $0x110] sm:$0xff]  ;;  %v478_v13 = vld [vmem:[%s5372_s23 + $0x118] sm:$0xff]  ;;  %v5393_v14 = vld [vmem:[%s5372_s23 + $0x100] sm:$0xff] }
  0x25   : > { %v479_v15 = vld [vmem:[%s5372_s23 + $0x120] sm:$0xff]  ;;  %1367 = vmatpush.msrb.mxu2 %v4740_v16  ;;  %v480_v17 = vld [vmem:[%s5372_s23 + $0x128] sm:$0xff]  ;;  %v481_v18 = vld [vmem:[%s5372_s23 + $0x130] sm:$0xff] }
  0x26   : > { %v482_v19 = vld [vmem:[%s5372_s23 + $0x138] sm:$0xff]  ;;  %v483_v20 = vld [vmem:[%s5372_s23 + $0x140] sm:$0xff]  ;;  %v484_v21 = vld [vmem:[%s5372_s23 + $0x148] sm:$0xff] }
  0x27   : > { %v485_v22 = vld [vmem:[%s5372_s23 + $0x150] sm:$0xff]  ;;  %v486_v23 = vld [vmem:[%s5372_s23 + $0x158] sm:$0xff]  ;;  %v487_v24 = vld [vmem:[%s5372_s23 + $0x160] sm:$0xff]  ;;  %1368 = vmatpush.msrb.mxu2 %v4739_v25 }
  0x28   : > { %v488_v26 = vld [vmem:[%s5372_s23 + $0x168] sm:$0xff]  ;;  %v489_v27 = vld [vmem:[%s5372_s23 + $0x170] sm:$0xff]  ;;  %v490_v28 = vld [vmem:[%s5372_s23 + $0x178] sm:$0xff] }
  0x29   : > { %v491_v29 = vld [vmem:[%s5372_s23 + $0x180] sm:$0xff]  ;;  %v492_v30 = vld [vmem:[%s5372_s23 + $0x188] sm:$0xff]  ;;  %v493_v34 = vld [vmem:[%s5372_s23 + $0x190] sm:$0xff]  ;;  %1369 = vmatpush.msrb.mxu2 %v4738_v42 }
  0x2a   : > { %v494_v38 = vld [vmem:[%s5372_s23 + $0x198] sm:$0xff]  ;;  %v495_v43 = vld [vmem:[%s5372_s23 + $0x1a0] sm:$0xff]  ;;  %v496_v47 = vld [vmem:[%s5372_s23 + $0x1a8] sm:$0xff] }
  0x2b   : > { %v497_v51 = vld [vmem:[%s5372_s23 + $0x1b0] sm:$0xff]  ;;  %v498_v55 = vld [vmem:[%s5372_s23 + $0x1b8] sm:$0xff]  ;;  %v499_v57 = vld [vmem:[%s5372_s23 + $0x1c0] sm:$0xff] }
  0x2c   : > { %4648 = vmatmul.msk.f32.gmra.mxu2 %vm515_vm1, %v477_v11  ;;  %4709 = vmatmul.msk.f32.gmra.mxu3 %vm515_vm1, %v5386_v12  ;;  %v500_v59 = vld [vmem:[%s5372_s23 + $0x1c8] sm:$0xff]  ;;  %v501_v61 = vld [vmem:[%s5372_s23 + $0x1d0] sm:$0xff]  ;;  %v502_v63 = vld [vmem:[%s5372_s23 + $0x1d8] sm:$0xff] }
  0x2d   : > { %v446_v1 = vld [vmem:[%s5372_s23 + $0x18] sm:$0xff]  ;;  %v443_v2 = vld [vmem:[%s5372_s23] sm:$0xff]  ;;  %v444_v6 = vld [vmem:[%s5372_s23 + $0x8] sm:$0xff] }
  0x2e   : > { %4617 = vmatmul.msk.f32.vlgmr.msra.gmra.mxu0 %vm515_vm1, %v446_v1  ;;  %4678 = vmatmul.msk.f32.vlgmr.msra.gmra.mxu1 %vm515_vm1, %v443_v2  ;;  %v507_v3 = vld [vmem:[%s5372_s23 + $0x1e0] sm:$0xff]  ;;  %v508_v7 = vld [vmem:[%s5372_s23 + $0x1e8] sm:$0xff]  ;;  %v509_v16 = vld [vmem:[%s5372_s23 + $0x1f0] sm:$0xff] }
  0x2f   : > { %v447_v5 = vld [vmem:[%s5372_s23 + $0x20] sm:$0xff]  ;;  %v390_v42 = vld [vmem:[%s7656_s1 + $0x38] sm:$0xff]  ;;  %v1118_v2 = vld [vmem:[%s5372_s23 + $0x90] sm:$0xff] }
  0x30   : > { %v1108_v25 = vld [vmem:[%s5372_s23 + $0x40] sm:$0xff] }
  0x34   : > { %4649 = vmatmul.msk.f32.gmra.mxu2 %vm515_vm1, %v478_v13  ;;  %4710 = vmatmul.msk.f32.gmra.mxu3 %vm515_vm1, %v5393_v14 }
  0x36   : > { %4618 = vmatmul.msk.f32.gmra.mxu0 %vm515_vm1, %v447_v5  ;;  %4679 = vmatmul.msk.f32.gmra.mxu1 %vm515_vm1, %v444_v6  ;;  %v1119_v6 = vld [vmem:[%s5372_s23 + $0x98] sm:$0xff] }
  0x3c   : > { %4650 = vmatmul.msk.f32.gmra.mxu2 %vm515_vm1, %v479_v15  ;;  %4711 = vmatmul.msk.f32.gmra.mxu3 %vm515_vm1, %v5375_v9 }
  0x44   : > { %4651 = vmatmul.msk.f32.gmra.mxu2 %vm515_vm1, %v480_v17  ;;  %4712 = vmatmul.msk.f32.gmra.mxu3 %vm515_vm1, %v477_v11  ;;  %v448_v11 = vld [vmem:[%s5372_s23 + $0x28] sm:$0xff] }
  0x45   : > { %4619 = vmatmul.msk.f32.gmra.mxu0 %vm515_vm1, %v448_v11 }
  0x4c   : > { %4652 = vmatmul.msk.f32.gmra.mxu2 %vm515_vm1, %v481_v18  ;;  %4713 = vmatmul.msk.f32.gmra.mxu3 %vm515_vm1, %v478_v13  ;;  %v445_v13 = vld [vmem:[%s5372_s23 + $0x10] sm:$0xff] }
  0x4d   : > { %4680 = vmatmul.msk.f32.gmra.mxu1 %vm515_vm1, %v445_v13  ;;  %v1120_v13 = vld [vmem:[%s5372_s23 + $0xa0] sm:$0xff] }
  0x54   : > { %4653 = vmatmul.msk.f32.gmra.mxu2 %vm515_vm1, %v482_v19  ;;  %4714 = vmatmul.msk.f32.gmra.mxu3 %vm515_vm1, %v479_v15  ;;  %v383_v15 = vld [vmem:[%s7656_s1] sm:$0xff] }
  0x55   : > { %4681 = vmatmul.msk.f32.gmra.mxu1 %vm515_vm1, %v446_v1 }
  0x5c   : > { %4654 = vmatmul.msk.f32.gmra.mxu2 %vm515_vm1, %v483_v20  ;;  %4715 = vmatmul.msk.f32.gmra.mxu3 %vm515_vm1, %v480_v17  ;;  %v5204_v17 = vmov 0  }
  0x5d   : > { %5098 = vset.pattern.permute.xlu0 %v5204_v17  ;;  %5099 = vset.pattern.permute.xlu1 %v5204_v17 }
  0x5e   : > { %1737 = vperm.xlu0 %5098, %v383_v15   ;;  %5100 = vset.pattern.permute.xlu2 %v5204_v17  ;;  %v2781_v17 = vld [vmem:[%s7619_s4 + $0x50] sm:$0xff] }
  0x5f   : > { %4682 = vmatmul.msk.f32.gmra.mxu1 %vm515_vm1, %v447_v5 }
  0x64   : > { %4655 = vmatmul.msk.f32.gmra.mxu2 %vm515_vm1, %v484_v21  ;;  %4716 = vmatmul.msk.f32.gmra.mxu3 %vm515_vm1, %v481_v18 }
  0x67   : > { %4683 = vmatmul.msk.f32.gmra.mxu1 %vm515_vm1, %v448_v11 }
  0x6c   : > { %4656 = vmatmul.msk.f32.gmra.mxu2 %vm515_vm1, %v485_v22  ;;  %4717 = vmatmul.msk.f32.gmra.mxu3 %vm515_vm1, %v482_v19  ;;  %v1106_v19 = vld [vmem:[%s5372_s23 + $0x30] sm:$0xff] }
  0x6d   : > { %4620 = vmatmul.msk.f32.gmra.mxu0 %vm515_vm1, %v1106_v19 }
  0x6f   : > { %4684 = vmatmul.msk.f32.gmra.mxu1 %vm515_vm1, %v1106_v19 }
  0x74   : > { %4657 = vmatmul.msk.f32.gmra.mxu2 %vm515_vm1, %v486_v23  ;;  %4718 = vmatmul.msk.f32.gmra.mxu3 %vm515_vm1, %v483_v20  ;;  %v384_v20 = vld [vmem:[%s7656_s1 + $0x8] sm:$0xff] }
  0x75   : > { %1742 = vperm.xlu0 %5098, %v384_v20  }
  0x7c   : > { %4658 = vmatmul.msk.f32.gmra.mxu2 %vm515_vm1, %v487_v24  ;;  %4719 = vmatmul.msk.f32.gmra.mxu3 %vm515_vm1, %v484_v21 }
  0x84   : > { %4659 = vmatmul.msk.f32.gmra.mxu2 %vm515_vm1, %v488_v26  ;;  %4720 = vmatmul.msk.f32.gmra.mxu3 %vm515_vm1, %v485_v22  ;;  %v1107_v22 = vld [vmem:[%s5372_s23 + $0x38] sm:$0xff] }
  0x85   : > { %4621 = vmatmul.msk.f32.gmra.mxu0 %vm515_vm1, %v1107_v22  ;;  %4685 = vmatmul.msk.f32.gmra.mxu1 %vm515_vm1, %v1107_v22 }
  0x8c   : > { %4660 = vmatmul.msk.f32.gmra.mxu2 %vm515_vm1, %v489_v27  ;;  %4721 = vmatmul.msk.f32.gmra.mxu3 %vm515_vm1, %v486_v23  ;;  %v385_v23 = vld [vmem:[%s7656_s1 + $0x10] sm:$0xff] }
  0x8d   : > { %1747 = vperm.xlu1 %5099, %v385_v23   ;;  %4622 = vmatmul.msk.f32.gmra.mxu0 %vm515_vm1, %v1108_v25 }
  0x8e   : > { %4686 = vmatmul.msk.f32.gmra.mxu1 %vm515_vm1, %v1108_v25 }
  0x94   : > { %4661 = vmatmul.msk.f32.gmra.mxu2 %vm515_vm1, %v490_v28  ;;  %4722 = vmatmul.msk.f32.gmra.mxu3 %vm515_vm1, %v487_v24 }
  0x9c   : > { %4662 = vmatmul.msk.f32.gmra.mxu2 %vm515_vm1, %v491_v29  ;;  %4723 = vmatmul.msk.f32.gmra.mxu3 %vm515_vm1, %v488_v26  ;;  %v386_v26 = vld [vmem:[%s7656_s1 + $0x18] sm:$0xff] }
  0x9d   : > { %1752 = vperm.xlu1 %5099, %v386_v26  }
  0xa4   : > { %4663 = vmatmul.msk.f32.gmra.mxu2 %vm515_vm1, %v492_v30  ;;  %4724 = vmatmul.msk.f32.gmra.mxu3 %vm515_vm1, %v489_v27 }
  0xa5   : > { %1772 = vperm.xlu1 %5099, %v390_v42   ;;  %v1123_v42 = vld [vmem:[%s5372_s23 + $0xb8] sm:$0xff] }
  0xa7   : > { %v807_v31 = vpop.f32.mrf.mxu2  ;;  %v1016_v32 = vpop.f32.mrf.mxu3 }
  0xa8   : > { %v5448_v33 = vadd.f32 %v1016_v32, %v807_v31  ;;  %v387_v31 = vld [vmem:[%s7656_s1 + $0x20] sm:$0xff] }
  0xa9   : > { %1757 = vperm.xlu2 %5100, %v387_v31  }
  0xab   : > { %v717_v15 = vpop.f32.mrf.mxu0 }
  0xac   : > { %4664 = vmatmul.msk.f32.gmra.mxu2 %vm515_vm1, %v493_v34  ;;  %4725 = vmatmul.msk.f32.gmra.mxu3 %vm515_vm1, %v490_v28  ;;  %v1109_v28 = vld [vmem:[%s5372_s23 + $0x48] sm:$0xff] }
  0xad   : > { %4623 = vmatmul.msk.f32.gmra.mxu0 %vm515_vm1, %v1109_v28  ;;  %4687 = vmatmul.msk.f32.gmra.mxu1 %vm515_vm1, %v1109_v28 }
  0xaf   : > { %v810_v35 = vpop.f32.mrf.mxu2  ;;  %v1019_v36 = vpop.f32.mrf.mxu3 }
  0xb0   : > { %v5453_v37 = vadd.f32 %v1019_v36, %v810_v35  ;;  %v388_v35 = vld [vmem:[%s7656_s1 + $0x28] sm:$0xff]  ;;  %v389_v36 = vld [vmem:[%s7656_s1 + $0x30] sm:$0xff] }
  0xb1   : > { %1762 = vperm.xlu2 %5100, %v388_v35   ;;  %1767 = vperm.xlu0 %5098, %v389_v36   ;;  %v5687_v36 = vld [vmem:[%s7618_s3] ss:$0 sm:$0xff] }
  0xb3   : > { %v720_v23 = vpop.f32.mrf.mxu0 }
  0xb4   : > { %4665 = vmatmul.msk.f32.gmra.mxu2 %vm515_vm1, %v494_v38  ;;  %4726 = vmatmul.msk.f32.gmra.mxu3 %vm515_vm1, %v491_v29 }
  0xb7   : > { %v813_v39 = vpop.f32.mrf.mxu2  ;;  %v1022_v40 = vpop.f32.mrf.mxu3 }
  0xb8   : > { %v5458_v41 = vadd.f32 %v1022_v40, %v813_v39  ;;  %v1112_v39 = vld [vmem:[%s5372_s23 + $0x60] sm:$0xff] }
  0xb9   : > { %v391_v40 = vld [vmem:[%s7656_s1 + $0x40] sm:$0xff] }
  0xba   : > { %1777 = vperm.xlu2 %5100, %v391_v40  }
  0xbc   : > { %4666 = vmatmul.msk.f32.gmra.mxu2 %vm515_vm1, %v495_v43  ;;  %4727 = vmatmul.msk.f32.gmra.mxu3 %vm515_vm1, %v492_v30  ;;  %v1110_v30 = vld [vmem:[%s5372_s23 + $0x50] sm:$0xff] }
  0xbd   : > { %4624 = vmatmul.msk.f32.gmra.mxu0 %vm515_vm1, %v1110_v30  ;;  %4688 = vmatmul.msk.f32.gmra.mxu1 %vm515_vm1, %v1110_v30 }
  0xbf   : > { %v816_v44 = vpop.f32.mrf.mxu2  ;;  %v1025_v45 = vpop.f32.mrf.mxu3 }
  0xc0   : > { %v5466_v46 = vadd.f32 %v1025_v45, %v816_v44  ;;  %v1113_v44 = vld [vmem:[%s5372_s23 + $0x68] sm:$0xff] }
  0xc2   : > { %v723_v31 = vpop.f32.mrf.mxu0 }
  0xc4   : > { %4667 = vmatmul.msk.f32.gmra.mxu2 %vm515_vm1, %v496_v47  ;;  %4728 = vmatmul.msk.f32.gmra.mxu3 %vm515_vm1, %v493_v34  ;;  %v1111_v34 = vld [vmem:[%s5372_s23 + $0x58] sm:$0xff] }
  0xc5   : > { %4625 = vmatmul.msk.f32.gmra.mxu0 %vm515_vm1, %v1111_v34  ;;  %4689 = vmatmul.msk.f32.gmra.mxu1 %vm515_vm1, %v1111_v34 }
  0xc7   : > { %v819_v48 = vpop.f32.mrf.mxu2  ;;  %v1028_v49 = vpop.f32.mrf.mxu3 }
  0xc8   : > { %v5471_v50 = vadd.f32 %v1028_v49, %v819_v48  ;;  %v1115_v49 = vld [vmem:[%s5372_s23 + $0x78] sm:$0xff] }
  0xcc   : > { %4668 = vmatmul.msk.f32.gmra.mxu2 %vm515_vm1, %v497_v51  ;;  %4729 = vmatmul.msk.f32.gmra.mxu3 %vm515_vm1, %v494_v38 }
  0xcd   : > { %4626 = vmatmul.msk.f32.gmra.mxu0 %vm515_vm1, %v1112_v39  ;;  %4690 = vmatmul.msk.f32.gmra.mxu1 %vm515_vm1, %v1112_v39 }
  0xcf   : > { %v822_v52 = vpop.f32.mrf.mxu2  ;;  %v1031_v53 = vpop.f32.mrf.mxu3 }
  0xd0   : > { %v5476_v54 = vadd.f32 %v1031_v53, %v822_v52  ;;  %v1116_v53 = vld [vmem:[%s5372_s23 + $0x80] sm:$0xff] }
  0xd4   : > { %4669 = vmatmul.msk.f32.gmra.mxu2 %vm515_vm1, %v498_v55  ;;  %4730 = vmatmul.msk.f32.gmra.mxu3 %vm515_vm1, %v495_v43 }
  0xd5   : > { %4627 = vmatmul.msk.f32.gmra.mxu0 %vm515_vm1, %v1113_v44  ;;  %4691 = vmatmul.msk.f32.gmra.mxu1 %vm515_vm1, %v1113_v44 }
  0xd7   : > { %v5481_v56 = vpop.f32.mrf.mxu2 }
  0xdc   : > { %4670 = vmatmul.msk.f32.gmra.mxu2 %vm515_vm1, %v499_v57  ;;  %4731 = vmatmul.msk.f32.gmra.mxu3 %vm515_vm1, %v496_v47  ;;  %v1114_v47 = vld [vmem:[%s5372_s23 + $0x70] sm:$0xff] }
  0xdd   : > { %4628 = vmatmul.msk.f32.gmra.mxu0 %vm515_vm1, %v1114_v47  ;;  %4692 = vmatmul.msk.f32.gmra.mxu1 %vm515_vm1, %v1114_v47 }
  0xdf   : > { %v5486_v58 = vpop.f32.mrf.mxu2 }
  0xe4   : > { %4671 = vmatmul.msk.f32.gmra.mxu2 %vm515_vm1, %v500_v59  ;;  %4732 = vmatmul.msk.f32.gmra.mxu3 %vm515_vm1, %v497_v51  ;;  %v392_v51 = vld [vmem:[%s7656_s1 + $0x48] sm:$0xff] }
  0xe5   : > { %4629 = vmatmul.msk.f32.gmra.mxu0 %vm515_vm1, %v1115_v49  ;;  %1782 = vperm.xlu0 %5098, %v392_v51  }
  0xe6   : > { %4693 = vmatmul.msk.f32.gmra.mxu1 %vm515_vm1, %v1115_v49 }
  0xe7   : > { %v5491_v60 = vpop.f32.mrf.mxu2 }
  0xec   : > { %4672 = vmatmul.msk.f32.gmra.mxu2 %vm515_vm1, %v501_v61  ;;  %4733 = vmatmul.msk.f32.gmra.mxu3 %vm515_vm1, %v498_v55  ;;  %v393_v55 = vld [vmem:[%s7656_s1 + $0x50] sm:$0xff] }
  0xed   : > { %4630 = vmatmul.msk.f32.gmra.mxu0 %vm515_vm1, %v1116_v53  ;;  %1787 = vperm.xlu0 %5098, %v393_v55   ;;  %v4944_v55 = vld [vmem:[%s7619_s4 + $0x108] sm:$0xff] }
  0xee   : > { %4694 = vmatmul.msk.f32.gmra.mxu1 %vm515_vm1, %v1116_v53 }
  0xef   : > { %v5496_v62 = vpop.f32.mrf.mxu2 }
  0xf4   : > { %4673 = vmatmul.msk.f32.gmra.mxu2 %vm515_vm1, %v502_v63  ;;  %4734 = vmatmul.msk.f32.gmra.mxu3 %vm515_vm1, %v499_v57 }
  0xf7   : > { %v5501_v0 = vpop.f32.mrf.mxu2 }
  0xfc   : > { %4674 = vmatmul.msk.f32.gmra.mxu2 %vm515_vm1, %v507_v3  ;;  %4735 = vmatmul.msk.f32.gmra.mxu3 %vm515_vm1, %v500_v59  ;;  %v1117_v59 = vld [vmem:[%s5372_s23 + $0x88] sm:$0xff]  ;;  %v4946_v3 = vld [vmem:[%s7619_s4 + $0x118] sm:$0xff] }
  0xfd   : > { %4631 = vmatmul.msk.f32.gmra.mxu0 %vm515_vm1, %v1117_v59  ;;  %3867 = vmatpush.msrb.mxu1 %v4946_v3 }
  0xfe   : > { %4695 = vmatmul.msk.f32.gmra.mxu1 %vm515_vm1, %v1117_v59 }
  0xff   : > { %v5510_v4 = vpop.f32.mrf.mxu2 }
 0x104   : > { %4675 = vmatmul.msk.f32.gmra.mxu2 %vm515_vm1, %v508_v7  ;;  %4736 = vmatmul.msk.f32.gmra.mxu3 %vm515_vm1, %v501_v61  ;;  %v4814_v61 = vld [vmem:[%s7619_s4 + $0xb8] sm:$0xff]  ;;  %v4813_v7 = vld [vmem:[%s7619_s4 + $0xb0] sm:$0xff] }
 0x105   : > { %3040 = vmatpush.msrb.mxu3 %v4814_v61  ;;  %4632 = vmatmul.msk.f32.gmra.mxu0 %vm515_vm1, %v1118_v2  ;;  %v726_v61 = vpop.f32.mrf.mxu0 }
 0x106   : > { %4696 = vmatmul.msk.f32.gmra.mxu1 %vm515_vm1, %v1118_v2 }
 0x107   : > { %v5519_v8 = vpop.f32.mrf.mxu2  ;;  %3041 = vmatpush.msrb.mxu3 %v4813_v7 }
 0x10c   : > { %4676 = vmatmul.msk.f32.gmra.mxu2 %vm515_vm1, %v509_v16  ;;  %4737 = vmatmul.msk.f32.gmra.mxu3 %vm515_vm1, %v502_v63  ;;  %v2782_v63 = vld [vmem:[%s7619_s4 + $0x58] sm:$0xff]  ;;  %v926_v16 = vpop.f32.mrf.mxu1 }
 0x10d   : > { %3417 = vmatpush.msrb.mxu0 %v2782_v63 }
 0x10e   : > { %4633 = vmatmul.msk.f32.gmra.mxu0 %vm515_vm1, %v1119_v6  ;;  %4697 = vmatmul.msk.f32.gmra.mxu1 %vm515_vm1, %v1119_v6 }
 0x10f   : > { %v5531_v18 = vpop.f32.mrf.mxu2  ;;  %3418 = vmatpush.msrb.mxu0 %v2781_v17  ;;  %v4811_v17 = vld [vmem:[%s7619_s4 + $0xa0] sm:$0xff] }
 0x114   : > { %4743 = vmatmul.msk.f32.vlgmr.msrb.gmra.mxu2 %vm515_vm1, %v1106_v19  ;;  %v4945_v19 = vld [vmem:[%s7619_s4 + $0x110] sm:$0xff] }
 0x115   : > { %3868 = vmatpush.msrb.mxu1 %v4945_v19 }
 0x116   : > { %4634 = vmatmul.msk.f32.gmra.mxu0 %vm515_vm1, %v1120_v13  ;;  %4698 = vmatmul.msk.f32.gmra.mxu1 %vm515_vm1, %v1120_v13 }
 0x117   : > { %v5540_v21 = vpop.f32.mrf.mxu2  ;;  %3869 = vmatpush.msrb.mxu1 %v4944_v55 }
 0x118   : > { %7657 = vst [vmem:[#allocation10_spill] sm:$0xff] %v5540_v21 }
 0x11c   : > { %4744 = vmatmul.msk.f32.gmra.mxu2 %vm515_vm1, %v1107_v22  ;;  %v1121_v22 = vld [vmem:[%s5372_s23 + $0xa8] sm:$0xff] }
 0x11e   : > { %4635 = vmatmul.msk.f32.gmra.mxu0 %vm515_vm1, %v1121_v22  ;;  %4699 = vmatmul.msk.f32.gmra.mxu1 %vm515_vm1, %v1121_v22 }
 0x11f   : > { %v5549_v24 = vpop.f32.mrf.mxu2 }
 0x120   : > { %7658 = vst [vmem:[#allocation11_spill] sm:$0xff] %v5549_v24 }
 0x124   : > { %4745 = vmatmul.msk.f32.gmra.mxu2 %vm515_vm1, %v1108_v25  ;;  %v929_v25 = vpop.f32.mrf.mxu1 }
 0x127   : > { %v5558_v27 = vpop.f32.mrf.mxu2 }
 0x128   : > { %7659 = vst [vmem:[#allocation12_spill] sm:$0xff] %v5558_v27 }
 0x12c   : > { %4746 = vmatmul.msk.f32.gmra.mxu2 %vm515_vm1, %v1109_v28  ;;  %v1122_v28 = vld [vmem:[%s5372_s23 + $0xb0] sm:$0xff]  ;;  %v932_v35 = vpop.f32.mrf.mxu1 }
 0x12d   : > { %4636 = vmatmul.msk.f32.gmra.mxu0 %vm515_vm1, %v1122_v28  ;;  %4700 = vmatmul.msk.f32.gmra.mxu1 %vm515_vm1, %v1122_v28 }
 0x12f   : > { %v5564_v29 = vpop.f32.mrf.mxu2 }
 0x130   : > { %7660 = vst [vmem:[#allocation13_spill] sm:$0xff] %v5564_v29 }
 0x134   : > { %4747 = vmatmul.msk.f32.gmra.mxu2 %vm515_vm1, %v1110_v30  ;;  %v927_v30 = vadd.f32 %v926_v16, %v717_v15  ;;  %v935_v3 = vpop.f32.mrf.mxu1  ;;  %v933_v16 = vadd.f32 %v932_v35, %v723_v31  ;;  %v5729_v31 = vpop.permute.xlu1 %1747 }
 0x135   : > { %4637 = vmatmul.msk.f32.gmra.mxu0 %vm515_vm1, %v1123_v42  ;;  %4701 = vmatmul.msk.f32.gmra.mxu1 %vm515_vm1, %v1123_v42 }
 0x137   : > { %v5573_v32 = vpop.f32.mrf.mxu2 }
 0x138   : > { %7661 = vst [vmem:[#allocation14_spill] sm:$0xff] %v5573_v32 }
 0x13c   : > { %4748 = vmatmul.msk.f32.gmra.mxu2 %vm515_vm1, %v1111_v34  ;;  %v4812_v34 = vld [vmem:[%s7619_s4 + $0xa8] sm:$0xff] }
 0x13d   : > { %3042 = vmatpush.msrb.mxu3 %v4812_v34  ;;  %v938_v34 = vpop.f32.mrf.mxu1 }
 0x13f   : > { %v5585_v38 = vpop.f32.mrf.mxu2  ;;  %3043 = vmatpush.msrb.mxu3 %v4811_v17 }
 0x140   : > { %7662 = vst [vmem:[#allocation15_spill] sm:$0xff] %v5585_v38 }
 0x144   : > { %4749 = vmatmul.msk.f32.gmra.mxu2 %vm515_vm1, %v1112_v39  ;;  %v2780_v39 = vld [vmem:[%s7619_s4 + $0x48] sm:$0xff] }
 0x145   : > { %3419 = vmatpush.msrb.mxu0 %v2780_v39 }
 0x147   : > { %v5597_v43 = vpop.f32.mrf.mxu2 }
 0x148   : > { %7663 = vst [vmem:[#allocation16_spill] sm:$0xff] %v5597_v43  ;;  %v1140_v43 = vld [vmem:[%s5372_s23 + $0x140] sm:$0xff] }
 0x14c   : > { %4750 = vmatmul.msk.f32.gmra.mxu2 %vm515_vm1, %v1113_v44 }
 0x14f   : > { %v5603_v45 = vpop.f32.mrf.mxu2 }
 0x150   : > { %7664 = vst [vmem:[#allocation17_spill] sm:$0xff] %v5603_v45 }
 0x154   : > { %4751 = vmatmul.msk.f32.gmra.mxu2 %vm515_vm1, %v1114_v47  ;;  %v5695_v47 = vpop.permute.xlu0 %1737 }
 0x157   : > { %v5609_v48 = vpop.f32.mrf.mxu2 }
 0x158   : > { %7665 = vst [vmem:[#allocation18_spill] sm:$0xff] %v5609_v48 }
 0x15c   : > { %4752 = vmatmul.msk.f32.gmra.mxu2 %vm515_vm1, %v1115_v49 }
 0x15f   : > { %v5618_v52 = vpop.f32.mrf.mxu2 }
 0x160   : > { %7666 = vst [vmem:[#allocation19_spill] sm:$0xff] %v5618_v52 }
 0x164   : > { %4753 = vmatmul.msk.f32.gmra.mxu2 %vm515_vm1, %v1116_v53  ;;  %v930_v53 = vadd.f32 %v929_v25, %v720_v23  ;;  %v5723_v25 = vld [vmem:[%s5372_s23 + $0xc8] sm:$0xff] }
 0x167   : > { %v5627_v57 = vpop.f32.mrf.mxu2 }
 0x168   : > { %7667 = vst [vmem:[#allocation20_spill] sm:$0xff] %v5627_v57  ;;  %v1139_v57 = vld [vmem:[%s5372_s23 + $0x138] sm:$0xff] }
 0x16c   : > { %4754 = vmatmul.msk.f32.gmra.mxu2 %vm515_vm1, %v1117_v59 }
 0x16f   : > { %v5639_v1 = vpop.f32.mrf.mxu2 }
 0x170   : > { %7668 = vst [vmem:[#allocation21_spill] sm:$0xff] %v5639_v1 }
 0x174   : > { %4755 = vmatmul.msk.f32.gmra.mxu2 %vm515_vm1, %v1118_v2  ;;  %v1124_v2 = vld [vmem:[%s5372_s23 + $0xc0] sm:$0xff] }
 0x175   : > { %4638 = vmatmul.msk.f32.gmra.mxu0 %vm515_vm1, %v1124_v2  ;;  %4702 = vmatmul.msk.f32.gmra.mxu1 %vm515_vm1, %v1124_v2 }
 0x177   : > { %v5648_v5 = vpop.f32.mrf.mxu2 }
 0x178   : > { %7669 = vst [vmem:[#allocation22_spill] sm:$0xff] %v5648_v5  ;;  %v4937_v5 = vld [vmem:[%s7619_s4 + $0xd0] sm:$0xff] }
 0x17c   : > { %4756 = vmatmul.msk.f32.gmra.mxu2 %vm515_vm1, %v1119_v6 }
 0x17d   : > { %4639 = vmatmul.msk.f32.gmra.mxu0 %vm515_vm1, %v5723_v25  ;;  %4703 = vmatmul.msk.f32.gmra.mxu1 %vm515_vm1, %v5723_v25 }
 0x17f   : > { %v5657_v11 = vpop.f32.mrf.mxu2 }
 0x180   : > { %7670 = vst [vmem:[#allocation23_spill] sm:$0xff] %v5657_v11 }
 0x184   : > { %4757 = vmatmul.msk.f32.gmra.mxu2 %vm515_vm1, %v1120_v13  ;;  %v5713_v13 = vpop.permute.xlu0 %1742 }
 0x187   : > { %v5669_v20 = vpop.f32.mrf.mxu2 }
 0x188   : > { %7671 = vst [vmem:[#allocation24_spill] sm:$0xff] %v5669_v20 }
 0x18c   : > { %4758 = vmatmul.msk.f32.gmra.mxu2 %vm515_vm1, %v1121_v22 }
 0x18f   : > { %v5675_v26 = vpop.f32.mrf.mxu2 }
 0x190   : > { %7672 = vst [vmem:[#allocation25_spill] sm:$0xff] %v5675_v26 }
 0x194   : > { %4759 = vmatmul.msk.f32.gmra.mxu2 %vm515_vm1, %v1122_v28 }
 0x197   : > { %v1371_v40 = vpop.f32.mrf.mxu2 }
 0x198   : > { %v1551_v44 = vadd.f32 %v1371_v40, %v927_v30  ;;  %v729_v30 = vpop.f32.mrf.mxu0  ;;  %v936_v40 = vadd.f32 %v935_v3, %v726_v61  ;;  %v5751_v3 = vpop.permute.xlu1 %1752 }
 0x19a   : > { %v1615_v49 = vadd.f32 %v5687_v36, %v1551_v44  ;;  %v2779_v44 = vld [vmem:[%s7619_s4 + $0x40] sm:$0xff] }
 0x19b   : > { %3420 = vmatpush.msrb.mxu0 %v2779_v44  ;;  %v2778_v44 = vld [vmem:[%s7619_s4 + $0x38] sm:$0xff] }
 0x19c   : > { %v1675_v51 = vmax.f32 %v1615_v49, 0.0  ;;  %4760 = vmatmul.msk.f32.gmra.mxu2 %vm515_vm1, %v1123_v42  ;;  %v4943_v49 = vld [vmem:[%s7619_s4 + $0x100] sm:$0xff]  ;;  %v5759_v42 = vld [vmem:[%s5372_s23 + $0xd8] sm:$0xff] }
 0x19d   : > { %3870 = vmatpush.msrb.mxu1 %v4943_v49  ;;  %3421 = vmatpush.msrb.mxu0 %v2778_v44  ;;  %v5814_v44 = vpop.permute.xlu0 %1767 }
 0x19e   : > { %v5703_v59 = vmul.f32 %v5695_v47, %v1675_v51 }
 0x19f   : > { %v1374_v63 = vpop.f32.mrf.mxu2 }
 0x1a0   : > { %7673 = vst [vmem:[#allocation26_spill] sm:$0xff] %v5703_v59  ;;  %v1552_v6 = vadd.f32 %v1374_v63, %v930_v53  ;;  %2229 = vrot.lane.b32.xlu1 %v5703_v59, %s7628_s19  ;;  %v5743_v53 = vld [vmem:[%s5372_s23 + $0xd0] sm:$0xff]  ;;  %v732_v63 = vpop.f32.mrf.mxu0 }
 0x1a1   : > { %2109 = vst.msk [vmem:[#allocation2 + $0x30] sm:$0xff] %vm2108_vm2, %v5703_v59  ;;  %4640 = vmatmul.msk.f32.gmra.mxu0 %vm515_vm1, %v5743_v53  ;;  %4704 = vmatmul.msk.f32.gmra.mxu1 %vm515_vm1, %v5743_v53  ;;  %v2771_v59 = vld [vmem:[%s7619_s4] sm:$0xff] }
 0x1a2   : > { %v1616_v7 = vadd.f32 %v5687_v36, %v1552_v6  ;;  %v941_v6 = vpop.f32.mrf.mxu1 }
 0x1a4   : > { %v1676_v15 = vmax.f32 %v1616_v7, 0.0  ;;  %4761 = vmatmul.msk.f32.gmra.mxu2 %vm515_vm1, %v1124_v2 }
 0x1a6   : > { %v5720_v19 = vmul.f32 %v5713_v13, %v1676_v15  ;;  %v939_v15 = vadd.f32 %v938_v34, %v729_v30  ;;  %v5766_v30 = vpop.permute.xlu2 %1757 }
 0x1a7   : > { %v1377_v23 = vpop.f32.mrf.mxu2 }
 0x1a8   : > { %7674 = vst [vmem:[#allocation27_spill] sm:$0xff] %v5720_v19  ;;  %v1553_v22 = vadd.f32 %v1377_v23, %v933_v16 }
 0x1a9   : > { %2110 = vst.msk [vmem:[#allocation2 + $0x38] sm:$0xff] %vm2108_vm2, %v5720_v19  ;;  %4641 = vmatmul.msk.f32.gmra.mxu0 %vm515_vm1, %v5759_v42  ;;  %4705 = vmatmul.msk.f32.gmra.mxu1 %vm515_vm1, %v5759_v42 }
 0x1aa   : > { %v1617_v35 = vadd.f32 %v5687_v36, %v1553_v22  ;;  %v944_v2 = vpop.f32.mrf.mxu1 }
 0x1ac   : > { %v1677_v39 = vmax.f32 %v1617_v35, 0.0  ;;  %4762 = vmatmul.msk.f32.gmra.mxu2 %vm515_vm1, %v5723_v25  ;;  %v942_v35 = vadd.f32 %v941_v6, %v732_v63 }
 0x1ae   : > { %v2037_v51 = vmul.f32 %v5729_v31, %v1677_v39  ;;  %v735_v39 = vpop.f32.mrf.mxu0 }
 0x1af   : > { %v1380_v28 = vpop.f32.mrf.mxu2 }
 0x1b0   : > { %v1554_v55 = vadd.f32 %v1380_v28, %v936_v40  ;;  %2474 = vrot.lane.b32.xlu1 %v2037_v51, %s5206_s28  ;;  %2111 = vst.msk [vmem:[#allocation2 + $0x40] sm:$0xff] %vm2108_vm2, %v2037_v51  ;;  %v4810_v40 = vld [vmem:[%s7619_s4 + $0x98] sm:$0xff] }
 0x1b1   : > { %3044 = vmatpush.msrb.mxu3 %v4810_v40  ;;  %v4942_v28 = vld [vmem:[%s7619_s4 + $0xf8] sm:$0xff] }
 0x1b2   : > { %v1618_v61 = vadd.f32 %v5687_v36, %v1554_v55  ;;  %3871 = vmatpush.msrb.mxu1 %v4942_v28  ;;  %v395_v28 = vld [vmem:[%s7656_s1 + $0x60] sm:$0xff] }
 0x1b4   : > { %v1678_v7 = vmax.f32 %v1618_v61, 0.0  ;;  %4763 = vmatmul.msk.f32.gmra.mxu2 %vm515_vm1, %v5743_v53  ;;  %v5786_v61 = vld [vmem:[%s5372_s23 + $0xe0] sm:$0xff] }
 0x1b5   : > { %4642 = vmatmul.msk.f32.gmra.mxu0 %vm515_vm1, %v5786_v61  ;;  %4706 = vmatmul.msk.f32.gmra.mxu1 %vm515_vm1, %v5786_v61 }
 0x1b6   : > { %v2038_v16 = vmul.f32 %v5751_v3, %v1678_v7  ;;  %v945_v7 = vadd.f32 %v944_v2, %v735_v39  ;;  %v5807_v39 = vld [vmem:[%s5372_s23 + $0xe8] sm:$0xff] }
 0x1b7   : > { %v1383_v17 = vpop.f32.mrf.mxu2 }
 0x1b8   : > { %v1555_v23 = vadd.f32 %v1383_v17, %v939_v15  ;;  %2476 = vrot.lane.b32.xlu2 %v2038_v16, %s5206_s28  ;;  %2233 = vrot.lane.b32.xlu1 %v2037_v51, %s7628_s19  ;;  %2112 = vst.msk [vmem:[#allocation2 + $0x48] sm:$0xff] %vm2108_vm2, %v2038_v16  ;;  %v5795_v15 = vpop.permute.xlu2 %1762  ;;  %v5800_v17 = vpop.f32.mrf.mxu3 }
 0x1ba   : > { %v1619_v22 = vadd.f32 %v5687_v36, %v1555_v23 }
 0x1bc   : > { %v1679_v34 = vmax.f32 %v1619_v22, 0.0  ;;  %4764 = vmatmul.msk.f32.gmra.mxu2 %vm515_vm1, %v5759_v42  ;;  %v738_v22 = vpop.f32.mrf.mxu0 }
 0x1bd   : > { %4643 = vmatmul.msk.f32.gmra.mxu0 %vm515_vm1, %v5807_v39  ;;  %4707 = vmatmul.msk.f32.gmra.mxu1 %vm515_vm1, %v5807_v39 }
 0x1be   : > { %v2039_v49 = vmul.f32 %v5766_v30, %v1679_v34 }
 0x1bf   : > { %v1386_v51 = vpop.f32.mrf.mxu2 }
 0x1c0   : > { %v1556_v55 = vadd.f32 %v1386_v51, %v942_v35  ;;  %2478 = vrot.lane.b32.xlu0 %v2039_v49, %s5206_s28  ;;  %2231 = vrot.lane.b32.xlu2 %v5720_v19, %s7628_s19  ;;  %2113 = vst.msk [vmem:[#allocation2 + $0x50] sm:$0xff] %vm2108_vm2, %v2039_v49  ;;  %v947_v35 = vpop.f32.mrf.mxu1  ;;  %v5825_v53 = vpop.f32.mrf.mxu3  ;;  %v1137_v19 = vld [vmem:[%s5372_s23 + $0x128] sm:$0xff] }
 0x1c1   : > { %2235 = vrot.lane.b32.xlu1 %v2038_v16, %s7628_s19  ;;  %v394_v16 = vld [vmem:[%s7656_s1 + $0x58] sm:$0xff]  ;;  %v948_v51 = vadd.f32 %v947_v35, %v738_v22  ;;  %v5838_v35 = vpop.permute.xlu1 %1772 }
 0x1c2   : > { %v1620_v63 = vadd.f32 %v5687_v36, %v1556_v55 }
 0x1c4   : > { %v1680_v6 = vmax.f32 %v1620_v63, 0.0  ;;  %4765 = vmatmul.msk.f32.gmra.mxu2 %vm515_vm1, %v5786_v61  ;;  %v4808_v61 = vld [vmem:[%s7619_s4 + $0x88] sm:$0xff] }
 0x1c5   : > { %4644 = vmatmul.msk.f32.gmra.mxu0 %vm515_vm1, %v5378_v10 }
 0x1c6   : > { %v2040_v23 = vmul.f32 %v5795_v15, %v1680_v6 }
 0x1c7   : > { %v1389_v34 = vpop.f32.mrf.mxu2 }
 0x1c8   : > { %v1557_v25 = vadd.f32 %v1389_v34, %v945_v7  ;;  %1792 = vperm.xlu0 %5098, %v394_v16   ;;  %2480 = vrot.lane.b32.xlu2 %v2040_v23, %s5206_s28  ;;  %2114 = vst.msk [vmem:[#allocation2 + $0x58] sm:$0xff] %vm2108_vm2, %v2040_v23  ;;  %v2777_v7 = vld [vmem:[%s7619_s4 + $0x30] sm:$0xff]  ;;  %v741_v16 = vpop.f32.mrf.mxu0  ;;  %v950_v22 = vpop.f32.mrf.mxu1 }
 0x1c9   : > { %2237 = vrot.lane.b32.xlu1 %v2039_v49, %s7628_s19  ;;  %v4809_v49 = vld [vmem:[%s7619_s4 + $0x90] sm:$0xff]  ;;  %3422 = vmatpush.msrb.mxu0 %v2777_v7 }
 0x1ca   : > { %v1621_v40 = vadd.f32 %v5687_v36, %v1557_v25  ;;  %3045 = vmatpush.msrb.mxu3 %v4809_v49 }
 0x1cc   : > { %v1681_v2 = vmax.f32 %v1621_v40, 0.0  ;;  %4766 = vmatmul.msk.f32.gmra.mxu2 %vm515_vm1, %v5807_v39  ;;  %v951_v40 = vadd.f32 %v950_v22, %v741_v16  ;;  %v5861_v22 = vpop.permute.xlu2 %1777  ;;  %3046 = vmatpush.msrb.mxu3 %v4808_v61 }
 0x1cd   : > { %4645 = vmatmul.msk.f32.gmra.mxu0 %vm515_vm1, %v5386_v12 }
 0x1ce   : > { %v2041_v55 = vmul.f32 %v5814_v44, %v1681_v2  ;;  %v396_v2 = vld [vmem:[%s7656_s1 + $0x68] sm:$0xff] }
 0x1cf   : > { %v1392_v63 = vpop.f32.mrf.mxu2 }
 0x1d0   : > { %v1558_v6 = vadd.f32 %v1392_v63, %v948_v51  ;;  %1797 = vperm.xlu0 %5098, %v395_v28   ;;  %2482 = vrot.lane.b32.xlu2 %v2041_v55, %s5206_s28  ;;  %2115 = vst.msk [vmem:[#allocation2 + $0x60] sm:$0xff] %vm2108_vm2, %v2041_v55  ;;  %v953_v28 = vpop.f32.mrf.mxu1 }
 0x1d1   : > { %2239 = vrot.lane.b32.xlu1 %v2040_v23, %s7628_s19  ;;  %v4941_v23 = vld [vmem:[%s7619_s4 + $0xf0] sm:$0xff] }
 0x1d2   : > { %v1622_v34 = vadd.f32 %v5687_v36, %v1558_v6  ;;  %3872 = vmatpush.msrb.mxu1 %v4941_v23  ;;  %v5857_v6 = vpop.f32.mrf.mxu3 }
 0x1d4   : > { %v1682_v25 = vmax.f32 %v1622_v34, 0.0  ;;  %4767 = vmatmul.msk.f32.gmra.mxu2 %vm515_vm1, %v5378_v10  ;;  %v744_v10 = vpop.f32.mrf.mxu0 }
 0x1d5   : > { %v954_v16 = vadd.f32 %v953_v28, %v744_v10  ;;  %4646 = vmatmul.msk.f32.gmra.mxu0 %vm515_vm1, %v5393_v14 }
 0x1d6   : > { %v2042_v51 = vmul.f32 %v5838_v35, %v1682_v25 }
 0x1d7   : > { %v1395_v49 = vpop.f32.mrf.mxu2 }
 0x1d8   : > { %v1559_v42 = vadd.f32 %v1395_v49, %v951_v40  ;;  %1802 = vperm.xlu0 %5098, %v396_v2   ;;  %2484 = vrot.lane.b32.xlu2 %v2042_v51, %s5206_s28  ;;  %2116 = vst.msk [vmem:[#allocation2 + $0x68] sm:$0xff] %vm2108_vm2, %v2042_v51  ;;  %v956_v23 = vpop.f32.mrf.mxu1  ;;  %v5878_v49 = vpop.permute.xlu0 %1782 }
 0x1d9   : > { %2241 = vrot.lane.b32.xlu1 %v2041_v55, %s7628_s19  ;;  %v397_v55 = vld [vmem:[%s7656_s1 + $0x70] sm:$0xff]  ;;  %7675 = vst [vmem:[#allocation28_spill] sm:$0xff] %v5878_v49 }
 0x1da   : > { %v1623_v63 = vadd.f32 %v5687_v36, %v1559_v42  ;;  %v5885_v28 = vpop.f32.mrf.mxu3 }
 0x1dc   : > { %v1683_v7 = vmax.f32 %v1623_v63, 0.0  ;;  %4768 = vmatmul.msk.f32.gmra.mxu2 %vm515_vm1, %v5386_v12  ;;  %v747_v12 = vpop.f32.mrf.mxu0  ;;  %v398_v63 = vld [vmem:[%s7656_s1 + $0x78] sm:$0xff] }
 0x1dd   : > { %v957_v10 = vadd.f32 %v956_v23, %v747_v12 }
 0x1de   : > { %v2043_v34 = vmul.f32 %v5861_v22, %v1683_v7 }
 0x1df   : > { %v1398_v25 = vpop.f32.mrf.mxu2 }
 0x1e0   : > { %1807 = vperm.xlu0 %5098, %v397_v55   ;;  %2486 = vrot.lane.b32.xlu2 %v2043_v34, %s5206_s28  ;;  %v1560_v40 = vadd.f32 %v1398_v25, %v954_v16  ;;  %2117 = vst.msk [vmem:[#allocation2 + $0x70] sm:$0xff] %vm2108_vm2, %v2043_v34  ;;  %v5898_v25 = vpop.permute.xlu0 %1787 }
 0x1e1   : > { %2243 = vrot.lane.b32.xlu1 %v2042_v51, %s7628_s19  ;;  %v2776_v51 = vld [vmem:[%s7619_s4 + $0x28] sm:$0xff]  ;;  %7676 = vst [vmem:[#allocation29_spill] sm:$0xff] %v5898_v25 }
 0x1e2   : > { %v1624_v2 = vadd.f32 %v5687_v36, %v1560_v40  ;;  %3423 = vmatpush.msrb.mxu0 %v2776_v51  ;;  %v399_v40 = vld [vmem:[%s7656_s1 + $0x80] sm:$0xff]  ;;  %v5906_v23 = vpop.f32.mrf.mxu3  ;;  %v4806_v51 = vld [vmem:[%s7619_s4 + $0x78] sm:$0xff] }
 0x1e4   : > { %4769 = vmatmul.msk.f32.gmra.mxu2 %vm515_vm1, %v5393_v14  ;;  %v1684_v42 = vmax.f32 %v1624_v2, 0.0  ;;  %v4940_v14 = vld [vmem:[%s7619_s4 + $0xe8] sm:$0xff] }
 0x1e5   : > { %3873 = vmatpush.msrb.mxu1 %v4940_v14  ;;  %v4804_v14 = vld [vmem:[%s7619_s4 + $0x68] sm:$0xff] }
 0x1e6   : > { %v2044_v39 = vmul.f32 %v5878_v49, %v1684_v42  ;;  %v5207_v42 = vmov 0.0  }
 0x1e7   : > { %v1401_v7 = vpop.f32.mrf.mxu2  ;;  %2099 = vst.msk [vmem:[#allocation2 + $0x18] sm:$0xff] %vm2095_vm3, %v5207_v42 }
 0x1e8   : > { %1812 = vperm.xlu0 %5098, %v398_v63   ;;  %v1561_v16 = vadd.f32 %v1401_v7, %v957_v10  ;;  %2488 = vrot.lane.b32.xlu2 %v2044_v39, %s5206_s28  ;;  %2118 = vst.msk [vmem:[#allocation2 + $0x78] sm:$0xff] %vm2108_vm2, %v2044_v39  ;;  %v4807_v10 = vld [vmem:[%s7619_s4 + $0x80] sm:$0xff]  ;;  %v400_v63 = vld [vmem:[%s7656_s1 + $0x88] sm:$0xff]  ;;  %v4805_v7 = vld [vmem:[%s7619_s4 + $0x70] sm:$0xff] }
 0x1e9   : > { %2245 = vrot.lane.b32.xlu1 %v2043_v34, %s7628_s19  ;;  %v1134_v34 = vld [vmem:[%s5372_s23 + $0x110] sm:$0xff]  ;;  %3047 = vmatpush.msrb.mxu3 %v4807_v10  ;;  %2098 = vst.msk [vmem:[#allocation2 + $0x10] sm:$0xff] %vm2095_vm3, %v5207_v42 }
 0x1ea   : > { %v1625_v55 = vadd.f32 %v5687_v36, %v1561_v16  ;;  %2100 = vst.msk [vmem:[#allocation2 + $0x20] sm:$0xff] %vm2095_vm3, %v5207_v42  ;;  %v2775_v16 = vld [vmem:[%s7619_s4 + $0x20] sm:$0xff]  ;;  %v401_v10 = vld [vmem:[%s7656_s1 + $0x90] sm:$0xff] }
 0x1eb   : > { %3048 = vmatpush.msrb.mxu3 %v4806_v51  ;;  %2101 = vst.msk [vmem:[#allocation2 + $0x28] sm:$0xff] %vm2095_vm3, %v5207_v42  ;;  %3424 = vmatpush.msrb.mxu0 %v2775_v16  ;;  %v2773_v16 = vld [vmem:[%s7619_s4 + $0x10] sm:$0xff] }
 0x1ec   : > { %4770 = vmatmul.msk.f32.gmra.mxu2 %vm515_vm1, %v5375_v9  ;;  %v1685_v61 = vmax.f32 %v1625_v55, 0.0  ;;  %v5914_v9 = vpop.f32.mrf.mxu0  ;;  %v5941_v55 = vpop.f32.mrf.mxu3  ;;  %2102 = vst.msk [vmem:[#allocation2 + $0x1e0] sm:$0xff] %vm2095_vm3, %v5207_v42 }
 0x1ed   : > { %3049 = vmatpush.msrb.mxu3 %v4805_v7  ;;  %2103 = vst.msk [vmem:[#allocation2 + $0x1e8] sm:$0xff] %vm2095_vm3, %v5207_v42  ;;  %v1136_v7 = vld [vmem:[%s5372_s23 + $0x120] sm:$0xff] }
 0x1ee   : > { %v2045_v12 = vmul.f32 %v5898_v25, %v1685_v61  ;;  %v1135_v61 = vld [vmem:[%s5372_s23 + $0x118] sm:$0xff]  ;;  %2104 = vst.msk [vmem:[#allocation2 + $0x1f0] sm:$0xff] %vm2095_vm3, %v5207_v42 }
 0x1ef   : > { %v5908_v2 = vpop.f32.mrf.mxu2  ;;  %3050 = vmatpush.msrb.mxu3 %v4804_v14  ;;  %2105 = vst.msk [vmem:[#allocation2 + $0x1f8] sm:$0xff] %vm2095_vm3, %v5207_v42  ;;  %v2774_v14 = vld [vmem:[%s7619_s4 + $0x18] sm:$0xff] }
 0x1f0   : > { %1817 = vperm.xlu0 %5098, %v399_v40   ;;  %2490 = vrot.lane.b32.xlu2 %v2045_v12, %s5206_s28  ;;  %2119 = vst.msk [vmem:[#allocation2 + $0x80] sm:$0xff] %vm2108_vm2, %v2045_v12  ;;  %v4803_v40 = vld [vmem:[%s7619_s4 + $0x60] sm:$0xff] }
 0x1f1   : > { %2247 = vrot.lane.b32.xlu1 %v2044_v39, %s7628_s19  ;;  %3051 = vmatpush.msrb.mxu3 %v4803_v40 }
 0x1f2   : > { %3425 = vmatpush.msrb.mxu0 %v2774_v14 }
 0x1f4   : > { %4771 = vmatmul.msk.f32.gmra.mxu2 %vm515_vm1, %v1134_v34  ;;  %v5953_v34 = vpop.f32.mrf.mxu0  ;;  %v5966_v42 = vpop.f32.mrf.mxu3  ;;  %3426 = vmatpush.msrb.mxu0 %v2773_v16  ;;  %v403_v16 = vld [vmem:[%s7656_s1 + $0xa0] sm:$0xff] }
 0x1f7   : > { %v5928_v39 = vpop.f32.mrf.mxu2 }
 0x1f8   : > { %1822 = vperm.xlu0 %5098, %v400_v63   ;;  %v5963_v63 = vpop.f32.mrf.mxu1 }
 0x1f9   : > { %2249 = vrot.lane.b32.xlu1 %v2045_v12, %s7628_s19  ;;  %v4939_v12 = vld [vmem:[%s7619_s4 + $0xe0] sm:$0xff] }
 0x1fa   : > { %3874 = vmatpush.msrb.mxu1 %v4939_v12 }
 0x1fc   : > { %4772 = vmatmul.msk.f32.gmra.mxu2 %vm515_vm1, %v1135_v61  ;;  %v402_v61 = vld [vmem:[%s7656_s1 + $0x98] sm:$0xff]  ;;  %v5978_v40 = vpop.f32.mrf.mxu0  ;;  %v5992_v14 = vpop.f32.mrf.mxu3 }
 0x1fd   : > { %7677 = vst [vmem:[#allocation30_spill] sm:$0xff] %v5992_v14 }
 0x1ff   : > { %v5961_v51 = vpop.f32.mrf.mxu2 }
 0x200   : > { %1827 = vperm.xlu0 %5098, %v401_v10   ;;  %v2772_v10 = vld [vmem:[%s7619_s4 + $0x8] sm:$0xff] }
 0x201   : > { %3427 = vmatpush.msrb.mxu0 %v2772_v10 }
 0x203   : > { %3428 = vmatpush.msrb.mxu0 %v2771_v59  ;;  %v1138_v59 = vld [vmem:[%s5372_s23 + $0x130] sm:$0xff] }
 0x204   : > { %4773 = vmatmul.msk.f32.gmra.mxu2 %vm515_vm1, %v1136_v7  ;;  %v5985_v7 = vpop.f32.mrf.mxu1  ;;  %v6002_v20 = vpop.f32.mrf.mxu0 }
 0x207   : > { %v5980_v12 = vpop.f32.mrf.mxu2 }
 0x208   : > { %1832 = vperm.xlu0 %5098, %v402_v61   ;;  %v4938_v61 = vld [vmem:[%s7619_s4 + $0xd8] sm:$0xff] }
 0x209   : > { %3875 = vmatpush.msrb.mxu1 %v4938_v61  ;;  %v6016_v61 = vpop.f32.mrf.mxu3 }
 0x20a   : > { %7678 = vst [vmem:[#allocation31_spill] sm:$0xff] %v6016_v61 }
 0x20b   : > { %3876 = vmatpush.msrb.mxu1 %v4937_v5 }
 0x20c   : > { %4774 = vmatmul.msk.f32.gmra.mxu2 %vm515_vm1, %v1137_v19  ;;  %v6004_v10 = vpop.f32.mrf.mxu1  ;;  %v6029_v5 = vpop.f32.mrf.mxu0 }
 0x20d   : > { %v966_v14 = vadd.f32 %v6004_v10, %v5978_v40  ;;  %v409_v40 = vld [vmem:[%s7656_s1 + $0xd0] sm:$0xff] }
 0x20f   : > { %v5997_v26 = vpop.f32.mrf.mxu2 }
 0x210   : > { %1837 = vperm.xlu0 %5098, %v403_v16   ;;  %v404_v16 = vld [vmem:[%s7656_s1 + $0xa8] sm:$0xff] }
 0x211   : > { %v6039_v45 = vpop.f32.mrf.mxu3 }
 0x212   : > { %v2477_v19 = vpop.permute.xlu2 %2476  ;;  %v2230_v11 = vpop.permute.xlu1 %2229  ;;  %7679 = vst [vmem:[#allocation32_spill] sm:$0xff] %v6039_v45 }
 0x213   : > { %2410 = vst.msk [vmem:[#allocation2 + $0x18] sm:$0xff] %vm2409_vm4, %v2230_v11  ;;  %v4936_v11 = vld [vmem:[%s7619_s4 + $0xc8] sm:$0xff] }
 0x214   : > { %2654 = vst.msk [vmem:[#allocation2 + $0x18] sm:$0xff] %vm2650_vm5, %v2477_v19  ;;  %4775 = vmatmul.msk.f32.gmra.mxu2 %vm515_vm1, %v1138_v59  ;;  %v6023_v59 = vpop.f32.mrf.mxu1  ;;  %3877 = vmatpush.msrb.mxu1 %v4936_v11  ;;  %v4935_v19 = vld [vmem:[%s7619_s4 + $0xc0] sm:$0xff] }
 0x216   : > { %3878 = vmatpush.msrb.mxu1 %v4935_v19 }
 0x217   : > { %v6018_v1 = vpop.f32.mrf.mxu2 }
 0x218   : > { %1842 = vperm.xlu0 %5098, %v404_v16   ;;  %v405_v16 = vld [vmem:[%s7656_s1 + $0xb0] sm:$0xff] }
 0x219   : > { %v6054_v25 = vpop.f32.mrf.mxu3 }
 0x21a   : > { %v2232_v52 = vpop.permute.xlu2 %2231  ;;  %7680 = vst [vmem:[#allocation33_spill] sm:$0xff] %v6054_v25 }
 0x21b   : > { %2411 = vst.msk [vmem:[#allocation2 + $0x20] sm:$0xff] %vm2409_vm4, %v2232_v52  ;;  %v2783_v48 = vld [vmem:[#allocation2 + $0x18] sm:$0xff]  ;;  %v6046_v52 = vpop.f32.mrf.mxu0 }
 0x21c   : > { %4776 = vmatmul.msk.f32.gmra.mxu2 %vm515_vm1, %v1139_v57  ;;  %4815 = vmatmul.msk.f32.vlgmr.msrb.gmra.mxu3 %vm2095_vm3, %v2783_v48  ;;  %v6042_v19 = vpop.f32.mrf.mxu1  ;;  %v406_v57 = vld [vmem:[%s7656_s1 + $0xb8] sm:$0xff] }
 0x21f   : > { %v6037_v11 = vpop.f32.mrf.mxu2 }
 0x220   : > { %1847 = vperm.xlu0 %5098, %v405_v16   ;;  %v1141_v16 = vld [vmem:[%s5372_s23 + $0x148] sm:$0xff] }
 0x222   : > { %v2475_v38 = vpop.permute.xlu1 %2474  ;;  %v2481_v48 = vpop.permute.xlu2 %2480 }
 0x223   : > { %2653 = vst.msk [vmem:[#allocation2 + $0x10] sm:$0xff] %vm2650_vm5, %v2475_v38  ;;  %v960_v38 = vadd.f32 %v5963_v63, %v5914_v9  ;;  %v6067_v45 = vpop.f32.mrf.mxu0 }
 0x224   : > { %4777 = vmatmul.msk.f32.gmra.mxu2 %vm515_vm1, %v1140_v43  ;;  %v6062_v43 = vpop.f32.mrf.mxu1 }
 0x225   : > { %v1562_v25 = vadd.f32 %v5908_v2, %v960_v38  ;;  %v6079_v2 = vpop.f32.mrf.mxu3  ;;  %v408_v38 = vld [vmem:[%s7656_s1 + $0xc8] sm:$0xff] }
 0x226   : > { %7681 = vst [vmem:[#allocation34_spill] sm:$0xff] %v6079_v2 }
 0x227   : > { %v6051_v32 = vpop.f32.mrf.mxu2  ;;  %v1626_v63 = vadd.f32 %v5687_v36, %v1562_v25 }
 0x228   : > { %1852 = vperm.xlu0 %5098, %v406_v57   ;;  %v407_v57 = vld [vmem:[%s7656_s1 + $0xc0] sm:$0xff] }
 0x22a   : > { %v2234_v29 = vpop.permute.xlu1 %2233  ;;  %v2711_v27 = vld [vmem:[#allocation2 + $0x17] sm:$0xff]  ;;  %v2483_v24 = vpop.permute.xlu2 %2482 }
 0x22b   : > { %2412 = vst.msk [vmem:[#allocation2 + $0x28] sm:$0xff] %vm2409_vm4, %v2234_v29  ;;  %4875 = vmatmul.msk.f32.vlgmr.msrb.gmra.mxu0 %vm2095_vm3, %v2711_v27  ;;  %v1142_v29 = vld [vmem:[%s5372_s23 + $0x150] sm:$0xff] }
 0x22c   : > { %2656 = vst.msk [vmem:[#allocation2 + $0x28] sm:$0xff] %vm2650_vm5, %v2481_v48  ;;  %4778 = vmatmul.msk.f32.gmra.mxu2 %vm515_vm1, %v1141_v16  ;;  %v963_v48 = vadd.f32 %v5985_v7, %v5953_v34  ;;  %v6085_v25 = vpop.f32.mrf.mxu1  ;;  %v1686_v7 = vmax.f32 %v1626_v63, 0.0  ;;  %v1564_v63 = vadd.f32 %v5961_v51, %v966_v14 }
 0x22d   : > { %v6111_v10 = vpop.f32.mrf.mxu3 }
 0x22e   : > { %7683 = vst [vmem:[#allocation35_spill] sm:$0xff] %v6111_v10 }
 0x22f   : > { %v6070_v9 = vpop.f32.mrf.mxu2 }
 0x230   : > { %1857 = vperm.xlu0 %5098, %v407_v57   ;;  %v1563_v57 = vadd.f32 %v5928_v39, %v963_v48 }
 0x232   : > { %v2479_v27 = vpop.permute.xlu0 %2478  ;;  %v1627_v49 = vadd.f32 %v5687_v36, %v1563_v57  ;;  %v1144_v57 = vld [vmem:[%s5372_s23 + $0x160] sm:$0xff] }
 0x233   : > { %2655 = vst.msk [vmem:[#allocation2 + $0x20] sm:$0xff] %vm2650_vm5, %v2479_v27  ;;  %v2236_v16 = vpop.permute.xlu1 %2235  ;;  %v6090_v27 = vpop.f32.mrf.mxu0 }
 0x234   : > { %2413 = vst.msk [vmem:[#allocation2 + $0x30] sm:$0xff] %vm2409_vm4, %v2236_v16  ;;  %4779 = vmatmul.msk.f32.gmra.mxu2 %vm515_vm1, %v1142_v29  ;;  %v2485_v16 = vpop.permute.xlu2 %2484  ;;  %v1143_v29 = vld [vmem:[%s5372_s23 + $0x158] sm:$0xff] }
 0x235   : > { %2657 = vst.msk [vmem:[#allocation2 + $0x30] sm:$0xff] %vm2650_vm5, %v2483_v24 }
 0x237   : > { %v6088_v34 = vpop.f32.mrf.mxu2 }
 0x238   : > { %1862 = vperm.xlu0 %5098, %v408_v38   ;;  %v6116_v38 = vpop.f32.mrf.mxu1 }
 0x23a   : > { %v6093_v61 = vpop.permute.xlu0 %1792  ;;  %v2784_v2 = vld [vmem:[#allocation2 + $0x20] sm:$0xff] }
 0x23b   : > { %v2712_v24 = vld [vmem:[#allocation2 + $0x1f] sm:$0xff]  ;;  %v2046_v39 = vmul.f32 %v6093_v61, %v1686_v7  ;;  %v2238_v48 = vpop.permute.xlu1 %2237  ;;  %4816 = vmatmul.msk.f32.gmra.mxu3 %vm2095_vm3, %v2784_v2 }
 0x23c   : > { %v3610_v21 = vld [vmem:[#allocation2 + $0x19] sm:$0xff]  ;;  %4876 = vmatmul.msk.f32.gmra.mxu0 %vm2095_vm3, %v2712_v24  ;;  %2414 = vst.msk [vmem:[#allocation2 + $0x38] sm:$0xff] %vm2409_vm4, %v2238_v48  ;;  %4780 = vmatmul.msk.f32.gmra.mxu2 %vm515_vm1, %v1143_v29  ;;  %v2785_v29 = vld [vmem:[#allocation2 + $0x28] sm:$0xff]  ;;  %v1628_v48 = vadd.f32 %v5687_v36, %v1564_v63  ;;  %v2487_v10 = vpop.permute.xlu2 %2486 }
 0x23d   : > { %4947 = vmatmul.msk.f32.vlgmr.msrb.gmra.mxu1 %vm2095_vm3, %v3610_v21  ;;  %2120 = vst.msk [vmem:[#allocation2 + $0x88] sm:$0xff] %vm2108_vm2, %v2046_v39  ;;  %2492 = vrot.lane.b32.xlu2 %v2046_v39, %s5206_s28  ;;  %v1687_v21 = vmax.f32 %v1627_v49, 0.0  ;;  %v2713_v24 = vld [vmem:[#allocation2 + $0x27] sm:$0xff] }
 0x23e   : > { %2251 = vrot.lane.b32.xlu1 %v2046_v39, %s7682_s24  ;;  %2658 = vst.msk [vmem:[#allocation2 + $0x38] sm:$0xff] %vm2650_vm5, %v2485_v16  ;;  %v6121_v39 = vpop.f32.mrf.mxu0  ;;  %v969_v16 = vadd.f32 %v6023_v59, %v6002_v20  ;;  %v3611_v49 = vld [vmem:[#allocation2 + $0x21] sm:$0xff]  ;;  %v410_v20 = vld [vmem:[%s7656_s1 + $0xd8] sm:$0xff]  ;;  %v1688_v63 = vmax.f32 %v1628_v48, 0.0  ;;  %v3612_v48 = vld [vmem:[#allocation2 + $0x29] sm:$0xff] }
 0x23f   : > { %v6114_v2 = vpop.f32.mrf.mxu2 }
 0x240   : > { %1867 = vperm.xlu0 %5098, %v409_v40   ;;  %v1565_v59 = vadd.f32 %v5980_v12, %v969_v16 }
 0x242   : > { %v6119_v7 = vpop.permute.xlu0 %1797 }
 0x243   : > { %7684 = vst [vmem:[#allocation36_spill] sm:$0xff] %v6119_v7  ;;  %v2047_v51 = vmul.f32 %v6119_v7, %v1687_v21  ;;  %v2240_v14 = vpop.permute.xlu1 %2239  ;;  %4817 = vmatmul.msk.f32.gmra.mxu3 %vm2095_vm3, %v2785_v29  ;;  %v2786_v21 = vld [vmem:[#allocation2 + $0x30] sm:$0xff]  ;;  %v1145_v29 = vld [vmem:[%s5372_s23 + $0x168] sm:$0xff] }
 0x244   : > { %4877 = vmatmul.msk.f32.gmra.mxu0 %vm2095_vm3, %v2713_v24  ;;  %2415 = vst.msk [vmem:[#allocation2 + $0x40] sm:$0xff] %vm2409_vm4, %v2240_v14  ;;  %4781 = vmatmul.msk.f32.gmra.mxu2 %vm515_vm1, %v1144_v57  ;;  %v6142_v57 = vpop.f32.mrf.mxu3  ;;  %v2714_v14 = vld [vmem:[#allocation2 + $0x2f] sm:$0xff]  ;;  %v2489_v7 = vpop.permute.xlu2 %2488 }
 0x245   : > { %4948 = vmatmul.msk.f32.gmra.mxu1 %vm2095_vm3, %v3611_v49  ;;  %2121 = vst.msk [vmem:[#allocation2 + $0x90] sm:$0xff] %vm2108_vm2, %v2047_v51  ;;  %2494 = vrot.lane.b32.xlu2 %v2047_v51, %s5206_s28  ;;  %v1629_v49 = vadd.f32 %v5687_v36, %v1565_v59 }
 0x246   : > { %2253 = vrot.lane.b32.xlu1 %v2047_v51, %s7682_s24  ;;  %2659 = vst.msk [vmem:[#allocation2 + $0x40] sm:$0xff] %vm2650_vm5, %v2487_v10  ;;  %v6147_v51 = vpop.f32.mrf.mxu1  ;;  %v972_v10 = vadd.f32 %v6042_v19, %v6029_v5  ;;  %v411_v5 = vld [vmem:[%s7656_s1 + $0xe0] sm:$0xff] }
 0x247   : > { %v6140_v40 = vpop.f32.mrf.mxu2  ;;  %7685 = vst [vmem:[#allocation37_spill] sm:$0xff] %v6142_v57  ;;  %v975_v57 = vadd.f32 %v6062_v43, %v6046_v52  ;;  %v412_v52 = vld [vmem:[%s7656_s1 + $0xe8] sm:$0xff] }
 0x248   : > { %1872 = vperm.xlu0 %5098, %v410_v20   ;;  %v6158_v20 = vpop.f32.mrf.mxu0  ;;  %v1566_v19 = vadd.f32 %v5997_v26, %v972_v10 }
 0x24a   : > { %v6145_v24 = vpop.permute.xlu0 %1802 }
 0x24b   : > { %7686 = vst [vmem:[#allocation38_spill] sm:$0xff] %v6145_v24  ;;  %v2048_v12 = vmul.f32 %v6145_v24, %v1688_v63  ;;  %v2242_v16 = vpop.permute.xlu1 %2241  ;;  %4818 = vmatmul.msk.f32.gmra.mxu3 %vm2095_vm3, %v2786_v21  ;;  %v1689_v63 = vmax.f32 %v1629_v49, 0.0  ;;  %v2787_v21 = vld [vmem:[#allocation2 + $0x38] sm:$0xff] }
 0x24c   : > { %4878 = vmatmul.msk.f32.gmra.mxu0 %vm2095_vm3, %v2714_v14  ;;  %2416 = vst.msk [vmem:[#allocation2 + $0x48] sm:$0xff] %vm2409_vm4, %v2242_v16  ;;  %4782 = vmatmul.msk.f32.gmra.mxu2 %vm515_vm1, %v1145_v29  ;;  %v2715_v29 = vld [vmem:[#allocation2 + $0x37] sm:$0xff]  ;;  %v2491_v26 = vpop.permute.xlu2 %2490  ;;  %v6179_v49 = vpop.f32.mrf.mxu3 }
 0x24d   : > { %4949 = vmatmul.msk.f32.gmra.mxu1 %vm2095_vm3, %v3612_v48  ;;  %2122 = vst.msk [vmem:[#allocation2 + $0x98] sm:$0xff] %vm2108_vm2, %v2048_v12  ;;  %2496 = vrot.lane.b32.xlu2 %v2048_v12, %s5206_s28  ;;  %v3613_v14 = vld [vmem:[#allocation2 + $0x31] sm:$0xff] }
 0x24e   : > { %2255 = vrot.lane.b32.xlu1 %v2048_v12, %s7682_s24  ;;  %2660 = vst.msk [vmem:[#allocation2 + $0x48] sm:$0xff] %vm2650_vm5, %v2489_v7  ;;  %v1146_v16 = vld [vmem:[%s5372_s23 + $0x170] sm:$0xff]  ;;  %v1630_v12 = vadd.f32 %v5687_v36, %v1566_v19  ;;  %v6190_v43 = vpop.f32.mrf.mxu1 }
 0x24f   : > { %v6168_v59 = vpop.f32.mrf.mxu2  ;;  %7687 = vst [vmem:[#allocation39_spill] sm:$0xff] %v6179_v49 }
 0x250   : > { %1877 = vperm.xlu0 %5098, %v411_v5   ;;  %v6193_v10 = vpop.f32.mrf.mxu0  ;;  %v1567_v5 = vadd.f32 %v6018_v1, %v975_v57  ;;  %v3614_v1 = vld [vmem:[#allocation2 + $0x39] sm:$0xff] }
 0x252   : > { %v6171_v48 = vpop.permute.xlu0 %1807  ;;  %v1631_v57 = vadd.f32 %v5687_v36, %v1567_v5 }
 0x253   : > { %v2049_v24 = vmul.f32 %v6171_v48, %v1689_v63  ;;  %v2244_v7 = vpop.permute.xlu1 %2243  ;;  %4819 = vmatmul.msk.f32.gmra.mxu3 %vm2095_vm3, %v2787_v21  ;;  %v1690_v63 = vmax.f32 %v1630_v12, 0.0  ;;  %v1147_v21 = vld [vmem:[%s5372_s23 + $0x178] sm:$0xff] }
 0x254   : > { %4879 = vmatmul.msk.f32.gmra.mxu0 %vm2095_vm3, %v2715_v29  ;;  %2417 = vst.msk [vmem:[#allocation2 + $0x50] sm:$0xff] %vm2409_vm4, %v2244_v7  ;;  %4783 = vmatmul.msk.f32.gmra.mxu2 %vm515_vm1, %v1146_v16  ;;  %v978_v16 = vadd.f32 %v6085_v25, %v6067_v45  ;;  %v413_v45 = vld [vmem:[%s7656_s1 + $0xf0] sm:$0xff]  ;;  %v6216_v25 = vpop.f32.mrf.mxu3 }
 0x255   : > { %4950 = vmatmul.msk.f32.gmra.mxu1 %vm2095_vm3, %v3613_v14  ;;  %2123 = vst.msk [vmem:[#allocation2 + $0xa0] sm:$0xff] %vm2108_vm2, %v2049_v24  ;;  %2498 = vrot.lane.b32.xlu2 %v2049_v24, %s5206_s28  ;;  %v2716_v14 = vld [vmem:[#allocation2 + $0x3f] sm:$0xff] }
 0x256   : > { %2257 = vrot.lane.b32.xlu1 %v2049_v24, %s7682_s24  ;;  %2661 = vst.msk [vmem:[#allocation2 + $0x50] sm:$0xff] %vm2650_vm5, %v2491_v26  ;;  %v2788_v24 = vld [vmem:[#allocation2 + $0x40] sm:$0xff]  ;;  %v1568_v12 = vadd.f32 %v6037_v11, %v978_v16 }
 0x257   : > { %v6196_v19 = vpop.f32.mrf.mxu2  ;;  %v3615_v11 = vld [vmem:[#allocation2 + $0x41] sm:$0xff] }
 0x258   : > { %1882 = vperm.xlu0 %5098, %v412_v52   ;;  %v6221_v52 = vpop.f32.mrf.mxu1  ;;  %v6223_v5 = vpop.f32.mrf.mxu0 }
 0x25a   : > { %v6199_v29 = vpop.permute.xlu0 %1812 }
 0x25b   : > { %v2050_v7 = vmul.f32 %v6199_v29, %v1690_v63  ;;  %v2246_v49 = vpop.permute.xlu1 %2245  ;;  %4820 = vmatmul.msk.f32.gmra.mxu3 %vm2095_vm3, %v2788_v24  ;;  %v1148_v63 = vld [vmem:[%s5372_s23 + $0x180] sm:$0xff]  ;;  %v2789_v24 = vld [vmem:[#allocation2 + $0x48] sm:$0xff] }
 0x25c   : > { %4880 = vmatmul.msk.f32.gmra.mxu0 %vm2095_vm3, %v2716_v14  ;;  %2418 = vst.msk [vmem:[#allocation2 + $0x58] sm:$0xff] %vm2409_vm4, %v2246_v49  ;;  %4784 = vmatmul.msk.f32.gmra.mxu2 %vm515_vm1, %v1147_v21  ;;  %v1691_v49 = vmax.f32 %v1631_v57, 0.0  ;;  %v2717_v14 = vld [vmem:[#allocation2 + $0x47] sm:$0xff]  ;;  %v1632_v57 = vadd.f32 %v5687_v36, %v1568_v12  ;;  %v6246_v12 = vpop.f32.mrf.mxu3 }
 0x25d   : > { %4951 = vmatmul.msk.f32.gmra.mxu1 %vm2095_vm3, %v3614_v1  ;;  %2124 = vst.msk [vmem:[#allocation2 + $0xa8] sm:$0xff] %vm2108_vm2, %v2050_v7  ;;  %2500 = vrot.lane.b32.xlu2 %v2050_v7, %s5206_s28 }
 0x25e   : > { %2259 = vrot.lane.b32.xlu1 %v2050_v7, %s7682_s24  ;;  %v981_v7 = vadd.f32 %v6116_v38, %v6090_v27  ;;  %v414_v27 = vld [vmem:[%s7656_s1 + $0xf8] sm:$0xff]  ;;  %v1692_v36 = vmax.f32 %v1632_v57, 0.0  ;;  %v6261_v57 = vld [vmem:[%s7618_s3] ss:$0 sm:$0xff] }
 0x25f   : > { %v6219_v26 = vpop.f32.mrf.mxu2 }
 0x260   : > { %1887 = vperm.xlu0 %5098, %v413_v45   ;;  %v1569_v38 = vadd.f32 %v6051_v32, %v981_v7  ;;  %v3616_v32 = vld [vmem:[#allocation2 + $0x49] sm:$0xff] }
 0x262   : > { %v6226_v21 = vpop.permute.xlu0 %1817 }
 0x263   : > { %7688 = vst [vmem:[#allocation40_spill] sm:$0xff] %v6226_v21  ;;  %v2051_v1 = vmul.f32 %v6226_v21, %v1691_v49  ;;  %4821 = vmatmul.msk.f32.gmra.mxu3 %vm2095_vm3, %v2789_v24  ;;  %v2248_v16 = vpop.permute.xlu1 %2247  ;;  %v1149_v49 = vld [vmem:[%s5372_s23 + $0x188] sm:$0xff] }
 0x264   : > { %4881 = vmatmul.msk.f32.gmra.mxu0 %vm2095_vm3, %v2717_v14  ;;  %4785 = vmatmul.msk.f32.gmra.mxu2 %vm515_vm1, %v1148_v63  ;;  %2419 = vst.msk [vmem:[#allocation2 + $0x60] sm:$0xff] %vm2409_vm4, %v2248_v16  ;;  %v992_v63 = vpop.f32.mrf.mxu1  ;;  %v2790_v14 = vld [vmem:[#allocation2 + $0x50] sm:$0xff]  ;;  %v6251_v16 = vpop.f32.mrf.mxu0 }
 0x265   : > { %4952 = vmatmul.msk.f32.gmra.mxu1 %vm2095_vm3, %v3615_v11  ;;  %2125 = vst.msk [vmem:[#allocation2 + $0xb0] sm:$0xff] %vm2108_vm2, %v2051_v1  ;;  %2502 = vrot.lane.b32.xlu2 %v2051_v1, %s5206_s28  ;;  %v2718_v11 = vld [vmem:[#allocation2 + $0x4f] sm:$0xff] }
 0x266   : > { %2261 = vrot.lane.b32.xlu1 %v2051_v1, %s7682_s24  ;;  %v984_v1 = vadd.f32 %v6147_v51, %v6121_v39  ;;  %v415_v39 = vld [vmem:[%s7656_s1 + $0x100] sm:$0xff] }
 0x267   : > { %v6244_v45 = vpop.f32.mrf.mxu2 }
 0x268   : > { %1892 = vperm.xlu0 %5098, %v414_v27   ;;  %v1633_v27 = vadd.f32 %v6261_v57, %v1569_v38  ;;  %v1570_v51 = vadd.f32 %v6070_v9, %v984_v1  ;;  %v416_v1 = vld [vmem:[%s7656_s1 + $0x108] sm:$0xff] }
 0x26a   : > { %v6249_v24 = vpop.permute.xlu0 %1822  ;;  %v1693_v38 = vmax.f32 %v1633_v27, 0.0 }
 0x26b   : > { %7689 = vst [vmem:[#allocation41_spill] sm:$0xff] %v6249_v24  ;;  %v2052_v21 = vmul.f32 %v6249_v24, %v1692_v36  ;;  %4822 = vmatmul.msk.f32.gmra.mxu3 %vm2095_vm3, %v2790_v14  ;;  %v2250_v7 = vpop.permute.xlu1 %2249  ;;  %v1150_v14 = vld [vmem:[%s5372_s23 + $0x190] sm:$0xff] }
 0x26c   : > { %4882 = vmatmul.msk.f32.gmra.mxu0 %vm2095_vm3, %v2718_v11  ;;  %4786 = vmatmul.msk.f32.gmra.mxu2 %vm515_vm1, %v1149_v49  ;;  %2420 = vst.msk [vmem:[#allocation2 + $0x68] sm:$0xff] %vm2409_vm4, %v2250_v7  ;;  %v6277_v49 = vpop.f32.mrf.mxu3  ;;  %v1634_v7 = vadd.f32 %v6261_v57, %v1570_v51  ;;  %v995_v24 = vpop.f32.mrf.mxu1 }
 0x26d   : > { %4953 = vmatmul.msk.f32.gmra.mxu1 %vm2095_vm3, %v3616_v32  ;;  %2126 = vst.msk [vmem:[#allocation2 + $0xb8] sm:$0xff] %vm2108_vm2, %v2052_v21  ;;  %2504 = vrot.lane.b32.xlu2 %v2052_v21, %s5206_s28  ;;  %v987_v32 = vadd.f32 %v6190_v43, %v6158_v20  ;;  %v789_v9 = vpop.f32.mrf.mxu0 }
 0x26e   : > { %2263 = vrot.lane.b32.xlu1 %v2052_v21, %s7682_s24  ;;  %v1694_v27 = vmax.f32 %v1634_v7, 0.0 }
 0x26f   : > { %v6274_v36 = vpop.f32.mrf.mxu2  ;;  %v1571_v20 = vadd.f32 %v6088_v34, %v987_v32  ;;  %v417_v34 = vld [vmem:[%s7656_s1 + $0x110] sm:$0xff] }
 0x270   : > { %1897 = vperm.xlu0 %5098, %v415_v39   ;;  %v1151_v39 = vld [vmem:[%s5372_s23 + $0x198] sm:$0xff] }
 0x272   : > { %v6279_v11 = vpop.permute.xlu0 %1827 }
 0x273   : > { %7690 = vst [vmem:[#allocation42_spill] sm:$0xff] %v6279_v11  ;;  %v2053_v21 = vmul.f32 %v6279_v11, %v1693_v38  ;;  %v990_v38 = vadd.f32 %v6221_v52, %v6193_v10 }
 0x274   : > { %4787 = vmatmul.msk.f32.gmra.mxu2 %vm515_vm1, %v1150_v14  ;;  %v6302_v11 = vpop.f32.mrf.mxu3  ;;  %v998_v32 = vpop.f32.mrf.mxu1 }
 0x275   : > { %2127 = vst.msk [vmem:[#allocation2 + $0xc0] sm:$0xff] %vm2108_vm2, %v2053_v21  ;;  %2506 = vrot.lane.b32.xlu2 %v2053_v21, %s5206_s28  ;;  %v792_v10 = vpop.f32.mrf.mxu0  ;;  %v1572_v52 = vadd.f32 %v6114_v2, %v990_v38  ;;  %v418_v2 = vld [vmem:[%s7656_s1 + $0x118] sm:$0xff] }
 0x276   : > { %2265 = vrot.lane.b32.xlu1 %v2053_v21, %s7682_s24  ;;  %v1635_v21 = vadd.f32 %v6261_v57, %v1571_v20  ;;  %7692 = vst [vmem:[#allocation44_spill] sm:$0xff] %v6302_v11  ;;  %v1152_v20 = vld [vmem:[%s5372_s23 + $0x1a0] sm:$0xff] }
 0x277   : > { %v6293_v43 = vpop.f32.mrf.mxu2 }
 0x278   : > { %1902 = vperm.xlu0 %5098, %v416_v1   ;;  %v1695_v7 = vmax.f32 %v1635_v21, 0.0 }
 0x27a   : > { %v6296_v51 = vpop.permute.xlu0 %1832 }
 0x27b   : > { %7691 = vst [vmem:[#allocation43_spill] sm:$0xff] %v6296_v51  ;;  %v2054_v14 = vmul.f32 %v6296_v51, %v1694_v27  ;;  %v1636_v51 = vadd.f32 %v6261_v57, %v1572_v52  ;;  %v1153_v52 = vld [vmem:[%s5372_s23 + $0x1a8] sm:$0xff] }
 0x27c   : > { %4788 = vmatmul.msk.f32.gmra.mxu2 %vm515_vm1, %v1151_v39  ;;  %v993_v39 = vadd.f32 %v992_v63, %v6223_v5  ;;  %v6327_v38 = vpop.f32.mrf.mxu3  ;;  %v1001_v21 = vpop.f32.mrf.mxu1 }
 0x27d   : > { %2128 = vst.msk [vmem:[#allocation2 + $0xc8] sm:$0xff] %vm2108_vm2, %v2054_v14  ;;  %2508 = vrot.lane.b32.xlu2 %v2054_v14, %s5206_s28  ;;  %v1696_v63 = vmax.f32 %v1636_v51, 0.0 }
 0x27e   : > { %2267 = vrot.lane.b32.xlu1 %v2054_v14, %s7682_s24  ;;  %7694 = vst [vmem:[#allocation46_spill] sm:$0xff] %v6327_v38  ;;  %v1573_v5 = vadd.f32 %v6140_v40, %v993_v39  ;;  %v419_v40 = vld [vmem:[%s7656_s1 + $0x120] sm:$0xff]  ;;  %v1154_v39 = vld [vmem:[%s5372_s23 + $0x1b0] sm:$0xff] }
 0x27f   : > { %v6312_v1 = vpop.f32.mrf.mxu2 }
 0x280   : > { %1907 = vperm.xlu0 %5098, %v417_v34   ;;  %v795_v34 = vpop.f32.mrf.mxu0  ;;  %v1637_v11 = vadd.f32 %v6261_v57, %v1573_v5 }
 0x282   : > { %v6315_v27 = vpop.permute.xlu0 %1837 }
 0x283   : > { %7693 = vst [vmem:[#allocation45_spill] sm:$0xff] %v6315_v27  ;;  %v2055_v14 = vmul.f32 %v6315_v27, %v1695_v7 }
 0x284   : > { %4789 = vmatmul.msk.f32.gmra.mxu2 %vm515_vm1, %v1152_v20  ;;  %v996_v20 = vadd.f32 %v995_v24, %v6251_v16  ;;  %v1697_v16 = vmax.f32 %v1637_v11, 0.0  ;;  %v6346_v51 = vpop.f32.mrf.mxu3 }
 0x285   : > { %2129 = vst.msk [vmem:[#allocation2 + $0xd0] sm:$0xff] %vm2108_vm2, %v2055_v14  ;;  %2510 = vrot.lane.b32.xlu2 %v2055_v14, %s5206_s28 }
 0x286   : > { %2269 = vrot.lane.b32.xlu1 %v2055_v14, %s7682_s24  ;;  %v1574_v24 = vadd.f32 %v6168_v59, %v996_v20  ;;  %7696 = vst [vmem:[#allocation48_spill] sm:$0xff] %v6346_v51  ;;  %v420_v59 = vld [vmem:[%s7656_s1 + $0x128] sm:$0xff]  ;;  %v1155_v20 = vld [vmem:[%s5372_s23 + $0x1b8] sm:$0xff] }
 0x287   : > { %v6334_v27 = vpop.f32.mrf.mxu2 }
 0x288   : > { %1912 = vperm.xlu0 %5098, %v418_v2   ;;  %v1004_v2 = vpop.f32.mrf.mxu1  ;;  %v6349_v5 = vpop.f32.mrf.mxu0 }
 0x28a   : > { %v6331_v7 = vpop.permute.xlu0 %1842 }
 0x28b   : > { %7695 = vst [vmem:[#allocation47_spill] sm:$0xff] %v6331_v7  ;;  %v2056_v14 = vmul.f32 %v6331_v7, %v1696_v63  ;;  %v1638_v7 = vadd.f32 %v6261_v57, %v1574_v24 }
 0x28c   : > { %4790 = vmatmul.msk.f32.gmra.mxu2 %vm515_vm1, %v1153_v52  ;;  %v999_v52 = vadd.f32 %v998_v32, %v789_v9 }
 0x28d   : > { %2130 = vst.msk [vmem:[#allocation2 + $0xd8] sm:$0xff] %vm2108_vm2, %v2056_v14  ;;  %2512 = vrot.lane.b32.xlu2 %v2056_v14, %s5206_s28  ;;  %v1698_v32 = vmax.f32 %v1638_v7, 0.0 }
 0x28e   : > { %2271 = vrot.lane.b32.xlu1 %v2056_v14, %s7682_s24  ;;  %v1575_v11 = vadd.f32 %v6196_v19, %v999_v52  ;;  %v421_v19 = vld [vmem:[%s7656_s1 + $0x130] sm:$0xff] }
 0x28f   : > { %v6356_v38 = vpop.f32.mrf.mxu2 }
 0x290   : > { %1917 = vperm.xlu0 %5098, %v419_v40   ;;  %v6367_v40 = vpop.f32.mrf.mxu3  ;;  %v6373_v51 = vpop.f32.mrf.mxu0 }
 0x291   : > { %7698 = vst [vmem:[#allocation50_spill] sm:$0xff] %v6367_v40 }
 0x292   : > { %v6351_v63 = vpop.permute.xlu0 %1847 }
 0x293   : > { %7697 = vst [vmem:[#allocation49_spill] sm:$0xff] %v6351_v63  ;;  %v2057_v14 = vmul.f32 %v6351_v63, %v1697_v16  ;;  %v1002_v16 = vadd.f32 %v1001_v21, %v792_v10  ;;  %v1639_v63 = vadd.f32 %v6261_v57, %v1575_v11 }
 0x294   : > { %4791 = vmatmul.msk.f32.gmra.mxu2 %vm515_vm1, %v1154_v39 }
 0x295   : > { %2131 = vst.msk [vmem:[#allocation2 + $0xe0] sm:$0xff] %vm2108_vm2, %v2057_v14  ;;  %2514 = vrot.lane.b32.xlu2 %v2057_v14, %s5206_s28  ;;  %v1576_v10 = vadd.f32 %v6219_v26, %v1002_v16  ;;  %v1005_v26 = vadd.f32 %v1004_v2, %v795_v34  ;;  %v422_v34 = vld [vmem:[%s7656_s1 + $0x138] sm:$0xff] }
 0x296   : > { %2273 = vrot.lane.b32.xlu1 %v2057_v14, %s7682_s24  ;;  %v1007_v14 = vpop.f32.mrf.mxu1 }
 0x297   : > { %v2493_v9 = vpop.permute.xlu2 %2492  ;;  %v6383_v21 = vpop.f32.mrf.mxu2 }
 0x298   : > { %2662 = vst.msk [vmem:[#allocation2 + $0x58] sm:$0xff] %vm2650_vm5, %v2493_v9  ;;  %1922 = vperm.xlu0 %5098, %v420_v59   ;;  %v1699_v9 = vmax.f32 %v1639_v63, 0.0  ;;  %v6403_v2 = vpop.f32.mrf.mxu0 }
 0x29a   : > { %v6369_v24 = vpop.permute.xlu0 %1852 }
 0x29b   : > { %7699 = vst [vmem:[#allocation51_spill] sm:$0xff] %v6369_v24  ;;  %v2058_v39 = vmul.f32 %v6369_v24, %v1698_v32  ;;  %v1156_v32 = vld [vmem:[%s5372_s23 + $0x1c0] sm:$0xff]  ;;  %v6394_v24 = vpop.f32.mrf.mxu3 }
 0x29c   : > { %4792 = vmatmul.msk.f32.gmra.mxu2 %vm515_vm1, %v1155_v20  ;;  %7701 = vst [vmem:[#allocation53_spill] sm:$0xff] %v6394_v24 }
 0x29d   : > { %2132 = vst.msk [vmem:[#allocation2 + $0xe8] sm:$0xff] %vm2108_vm2, %v2058_v39  ;;  %2516 = vrot.lane.b32.xlu2 %v2058_v39, %s5206_s28 }
 0x29e   : > { %2275 = vrot.lane.b32.xlu1 %v2058_v39, %s7682_s24  ;;  %v1640_v39 = vadd.f32 %v6261_v57, %v1576_v10  ;;  %v1010_v63 = vpop.f32.mrf.mxu1 }
 0x29f   : > { %v2495_v7 = vpop.permute.xlu2 %2494  ;;  %v2791_v52 = vld [vmem:[#allocation2 + $0x58] sm:$0xff] }
 0x2a0   : > { %v2719_v59 = vld [vmem:[#allocation2 + $0x57] sm:$0xff]  ;;  %2663 = vst.msk [vmem:[#allocation2 + $0x60] sm:$0xff] %vm2650_vm5, %v2495_v7  ;;  %1927 = vperm.xlu0 %5098, %v421_v19   ;;  %4823 = vmatmul.msk.f32.gmra.mxu3 %vm2095_vm3, %v2791_v52  ;;  %v1577_v19 = vadd.f32 %v6244_v45, %v1005_v26  ;;  %v1008_v45 = vadd.f32 %v1007_v14, %v6349_v5 }
 0x2a1   : > { %v3617_v11 = vld [vmem:[#allocation2 + $0x51] sm:$0xff]  ;;  %4883 = vmatmul.msk.f32.gmra.mxu0 %vm2095_vm3, %v2719_v59 }
 0x2a2   : > { %4954 = vmatmul.msk.f32.gmra.mxu1 %vm2095_vm3, %v3617_v11  ;;  %v6390_v20 = vpop.permute.xlu0 %1857  ;;  %v1700_v11 = vmax.f32 %v1640_v39, 0.0  ;;  %v1641_v39 = vadd.f32 %v6261_v57, %v1577_v19  ;;  %v1578_v5 = vadd.f32 %v6274_v36, %v1008_v45 }
 0x2a3   : > { %7700 = vst [vmem:[#allocation52_spill] sm:$0xff] %v6390_v20  ;;  %v2059_v16 = vmul.f32 %v6390_v20, %v1699_v9  ;;  %v6408_v9 = vpop.f32.mrf.mxu2 }
 0x2a4   : > { %4793 = vmatmul.msk.f32.gmra.mxu2 %vm515_vm1, %v1156_v32  ;;  %v1157_v32 = vld [vmem:[%s5372_s23 + $0x1c8] sm:$0xff] }
 0x2a5   : > { %2133 = vst.msk [vmem:[#allocation2 + $0xf0] sm:$0xff] %vm2108_vm2, %v2059_v16  ;;  %2518 = vrot.lane.b32.xlu2 %v2059_v16, %s5206_s28 }
 0x2a6   : > { %2277 = vrot.lane.b32.xlu1 %v2059_v16, %s7682_s24 }
 0x2a7   : > { %v2497_v10 = vpop.permute.xlu2 %2496  ;;  %v2792_v7 = vld [vmem:[#allocation2 + $0x60] sm:$0xff] }
 0x2a8   : > { %v2720_v52 = vld [vmem:[#allocation2 + $0x5f] sm:$0xff]  ;;  %2664 = vst.msk [vmem:[#allocation2 + $0x68] sm:$0xff] %vm2650_vm5, %v2497_v10  ;;  %1932 = vperm.xlu0 %5098, %v422_v34   ;;  %4824 = vmatmul.msk.f32.gmra.mxu3 %vm2095_vm3, %v2792_v7  ;;  %v6425_v10 = vpop.f32.mrf.mxu3  ;;  %v1013_v7 = vpop.f32.mrf.mxu1 }
 0x2a9   : > { %v3618_v59 = vld [vmem:[#allocation2 + $0x59] sm:$0xff]  ;;  %4884 = vmatmul.msk.f32.gmra.mxu0 %vm2095_vm3, %v2720_v52  ;;  %7703 = vst [vmem:[#allocation55_spill] sm:$0xff] %v6425_v10 }
 0x2aa   : > { %4955 = vmatmul.msk.f32.gmra.mxu1 %vm2095_vm3, %v3618_v59  ;;  %v6413_v16 = vpop.permute.xlu0 %1862  ;;  %v423_v34 = vld [vmem:[%s7656_s1 + $0x140] sm:$0xff] }
 0x2ab   : > { %7702 = vst [vmem:[#allocation54_spill] sm:$0xff] %v6413_v16  ;;  %v2060_v26 = vmul.f32 %v6413_v16, %v1700_v11  ;;  %v1701_v11 = vmax.f32 %v1641_v39, 0.0  ;;  %v6436_v45 = vpop.f32.mrf.mxu2  ;;  %v1011_v39 = vadd.f32 %v1010_v63, %v6373_v51 }
 0x2ac   : > { %4794 = vmatmul.msk.f32.gmra.mxu2 %vm515_vm1, %v1157_v32  ;;  %v3430_v32 = vpop.f32.mrf.mxu0 }
 0x2ad   : > { %2134 = vst.msk [vmem:[#allocation2 + $0xf8] sm:$0xff] %vm2108_vm2, %v2060_v26  ;;  %2520 = vrot.lane.b32.xlu2 %v2060_v26, %s5206_s28  ;;  %v1579_v51 = vadd.f32 %v6293_v43, %v1011_v39  ;;  %v1014_v39 = vadd.f32 %v1013_v7, %v6403_v2 }
 0x2ae   : > { %2279 = vrot.lane.b32.xlu1 %v2060_v26, %s7682_s24  ;;  %v1158_v26 = vld [vmem:[%s5372_s23 + $0x1d0] sm:$0xff] }
 0x2af   : > { %v2499_v14 = vpop.permute.xlu2 %2498  ;;  %v2793_v19 = vld [vmem:[#allocation2 + $0x68] sm:$0xff]  ;;  %v1580_v7 = vadd.f32 %v6312_v1, %v1014_v39 }
 0x2b0   : > { %v2721_v52 = vld [vmem:[#allocation2 + $0x67] sm:$0xff]  ;;  %v2252_v16 = vpop.permute.xlu1 %2251  ;;  %1937 = vperm.xlu0 %5098, %v423_v34   ;;  %4825 = vmatmul.msk.f32.gmra.mxu3 %vm2095_vm3, %v2793_v19  ;;  %v1642_v34 = vadd.f32 %v6261_v57, %v1578_v5 }
 0x2b1   : > { %v3619_v59 = vld [vmem:[#allocation2 + $0x61] sm:$0xff]  ;;  %2421 = vst.msk [vmem:[#allocation2 + $0x70] sm:$0xff] %vm2409_vm4, %v2252_v16  ;;  %4885 = vmatmul.msk.f32.gmra.mxu0 %vm2095_vm3, %v2721_v52 }
 0x2b2   : > { %4956 = vmatmul.msk.f32.gmra.mxu1 %vm2095_vm3, %v3619_v59  ;;  %2665 = vst.msk [vmem:[#allocation2 + $0x70] sm:$0xff] %vm2650_vm5, %v2499_v14  ;;  %v6434_v36 = vpop.permute.xlu0 %1867  ;;  %v424_v16 = vld [vmem:[%s7656_s1 + $0x148] sm:$0xff]  ;;  %v3053_v14 = vpop.f32.mrf.mxu3  ;;  %v1702_v19 = vmax.f32 %v1642_v34, 0.0 }
 0x2b3   : > { %7704 = vst [vmem:[#allocation56_spill] sm:$0xff] %v6434_v36  ;;  %v2061_v20 = vmul.f32 %v6434_v36, %v1701_v11  ;;  %v3431_v52 = vadd.f32 %v3430_v32, %v3053_v14  ;;  %v6452_v11 = vld [vmem:[%s7620_s5] ss:$0 sm:$0xff] }
 0x2b4   : > { %4795 = vmatmul.msk.f32.gmra.mxu2 %vm515_vm1, %v1158_v26  ;;  %v1159_v26 = vld [vmem:[%s5372_s23 + $0x1d8] sm:$0xff] }
 0x2b5   : > { %2135 = vst.msk [vmem:[#allocation2 + $0x100] sm:$0xff] %vm2108_vm2, %v2061_v20  ;;  %2522 = vrot.lane.b32.xlu2 %v2061_v20, %s5206_s28 }
 0x2b6   : > { %2281 = vrot.lane.b32.xlu1 %v2061_v20, %s7682_s24 }
 0x2b7   : > { %v2501_v63 = vpop.permute.xlu2 %2500 }
 0x2b8   : > { %v2254_v59 = vpop.permute.xlu1 %2253  ;;  %1942 = vperm.xlu0 %5098, %v424_v16   ;;  %v1643_v16 = vadd.f32 %v6261_v57, %v1579_v51 }
 0x2b9   : > { %v3433_v5 = vpop.f32.mrf.mxu0  ;;  %2422 = vst.msk [vmem:[#allocation2 + $0x78] sm:$0xff] %vm2409_vm4, %v2254_v59  ;;  %v2794_v36 = vld [vmem:[#allocation2 + $0x70] sm:$0xff] }
 0x2ba   : > { %v3880_v20 = vpop.f32.mrf.mxu1  ;;  %v2722_v10 = vld [vmem:[#allocation2 + $0x6f] sm:$0xff]  ;;  %2666 = vst.msk [vmem:[#allocation2 + $0x78] sm:$0xff] %vm2650_vm5, %v2501_v63  ;;  %4826 = vmatmul.msk.f32.gmra.mxu3 %vm2095_vm3, %v2794_v36  ;;  %v6459_v32 = vpop.permute.xlu0 %1872 }
 0x2bb   : > { %v3620_v24 = vld [vmem:[#allocation2 + $0x69] sm:$0xff]  ;;  %v4060_v43 = vadd.f32 %v3880_v20, %v3431_v52  ;;  %4886 = vmatmul.msk.f32.gmra.mxu0 %vm2095_vm3, %v2722_v10  ;;  %7705 = vst [vmem:[#allocation57_spill] sm:$0xff] %v6459_v32  ;;  %v2062_v34 = vmul.f32 %v6459_v32, %v1702_v19  ;;  %v6467_v63 = vpop.f32.mrf.mxu2  ;;  %v1703_v19 = vmax.f32 %v1643_v16, 0.0  ;;  %v1160_v20 = vld [vmem:[%s5372_s23 + $0x1e0] sm:$0xff] }
 0x2bc   : > { %4957 = vmatmul.msk.f32.gmra.mxu1 %vm2095_vm3, %v3620_v24  ;;  %4796 = vmatmul.msk.f32.gmra.mxu2 %vm515_vm1, %v1159_v26  ;;  %v425_v24 = vld [vmem:[%s7656_s1 + $0x150] sm:$0xff] }
 0x2bd   : > { %v4124_v14 = vadd.f32 %v6452_v11, %v4060_v43  ;;  %2136 = vst.msk [vmem:[#allocation2 + $0x108] sm:$0xff] %vm2108_vm2, %v2062_v34  ;;  %2524 = vrot.lane.b32.xlu2 %v2062_v34, %s5206_s28 }
 0x2be   : > { %2283 = vrot.lane.b32.xlu1 %v2062_v34, %s7682_s24  ;;  %v3056_v10 = vpop.f32.mrf.mxu3 }
 0x2bf   : > { %v4184_v2 = vmax.f32 %v4124_v14, 0.0  ;;  %v3434_v36 = vadd.f32 %v3433_v5, %v3056_v10  ;;  %v2503_v51 = vpop.permute.xlu2 %2502  ;;  %v1644_v5 = vadd.f32 %v6261_v57, %v1580_v7 }
 0x2c0   : > { %v2256_v59 = vpop.permute.xlu1 %2255  ;;  %1947 = vperm.xlu0 %5098, %v425_v24  }
 0x2c1   : > { %v6477_v52 = vmul.f32 %v4184_v2, %v5695_v47  ;;  %v3436_v26 = vpop.f32.mrf.mxu0  ;;  %2423 = vst.msk [vmem:[#allocation2 + $0x80] sm:$0xff] %vm2409_vm4, %v2256_v59  ;;  %v2795_v34 = vld [vmem:[#allocation2 + $0x78] sm:$0xff]  ;;  %v1704_v7 = vmax.f32 %v1644_v5, 0.0  ;;  %v1161_v59 = vld [vmem:[%s5372_s23 + $0x1e8] sm:$0xff] }
 0x2c2   : > { %v3883_v43 = vpop.f32.mrf.mxu1  ;;  %v2723_v32 = vld [vmem:[#allocation2 + $0x77] sm:$0xff]  ;;  %2667 = vst.msk [vmem:[#allocation2 + $0x80] sm:$0xff] %vm2650_vm5, %v2503_v51  ;;  %4827 = vmatmul.msk.f32.gmra.mxu3 %vm2095_vm3, %v2795_v34  ;;  %v6484_v1 = vpop.permute.xlu0 %1877 }
 0x2c3   : > { %v3621_v40 = vld [vmem:[#allocation2 + $0x71] sm:$0xff]  ;;  %v4061_v14 = vadd.f32 %v3883_v43, %v3434_v36  ;;  %4887 = vmatmul.msk.f32.gmra.mxu0 %vm2095_vm3, %v2723_v32  ;;  %v2063_v47 = vmul.f32 %v6484_v1, %v1703_v19  ;;  %v6497_v24 = vpop.f32.mrf.mxu2 }
 0x2c4   : > { %4958 = vmatmul.msk.f32.gmra.mxu1 %vm2095_vm3, %v3621_v40  ;;  %4797 = vmatmul.msk.f32.gmra.mxu2 %vm515_vm1, %v1160_v20  ;;  %v426_v32 = vld [vmem:[%s7656_s1 + $0x158] sm:$0xff]  ;;  %v1581_v20 = vadd.f32 %v6334_v27, %v5448_v33 }
 0x2c5   : > { %v4125_v39 = vadd.f32 %v6452_v11, %v4061_v14  ;;  %2137 = vst.msk [vmem:[#allocation2 + $0x110] sm:$0xff] %vm2108_vm2, %v2063_v47  ;;  %2526 = vrot.lane.b32.xlu2 %v2063_v47, %s5206_s28 }
 0x2c6   : > { %2285 = vrot.lane.b32.xlu1 %v2063_v47, %s7682_s24  ;;  %v3059_v16 = vpop.f32.mrf.mxu3  ;;  %v1645_v5 = vadd.f32 %v6261_v57, %v1581_v20 }
 0x2c7   : > { %v4185_v40 = vmax.f32 %v4125_v39, 0.0  ;;  %v3437_v2 = vadd.f32 %v3436_v26, %v3059_v16  ;;  %v2505_v10 = vpop.permute.xlu2 %2504  ;;  %v427_v39 = vld [vmem:[%s7656_s1 + $0x160] sm:$0xff] }
 0x2c8   : > { %v2258_v51 = vpop.permute.xlu1 %2257  ;;  %1952 = vperm.xlu0 %5098, %v426_v32  }
 0x2c9   : > { %v6500_v36 = vmul.f32 %v4185_v40, %v5713_v13  ;;  %v3439_v19 = vpop.f32.mrf.mxu0  ;;  %2424 = vst.msk [vmem:[#allocation2 + $0x88] sm:$0xff] %vm2409_vm4, %v2258_v51  ;;  %v2796_v34 = vld [vmem:[#allocation2 + $0x80] sm:$0xff]  ;;  %v1162_v51 = vld [vmem:[%s5372_s23 + $0x1f0] sm:$0xff] }
 0x2ca   : > { %v3886_v43 = vpop.f32.mrf.mxu1  ;;  %v2724_v14 = vld [vmem:[#allocation2 + $0x7f] sm:$0xff]  ;;  %2668 = vst.msk [vmem:[#allocation2 + $0x88] sm:$0xff] %vm2650_vm5, %v2505_v10  ;;  %4828 = vmatmul.msk.f32.gmra.mxu3 %vm2095_vm3, %v2796_v34  ;;  %v6509_v13 = vpop.permute.xlu0 %1882 }
 0x2cb   : > { %v3622_v47 = vld [vmem:[#allocation2 + $0x79] sm:$0xff]  ;;  %v4062_v26 = vadd.f32 %v3886_v43, %v3437_v2  ;;  %4888 = vmatmul.msk.f32.gmra.mxu0 %vm2095_vm3, %v2724_v14  ;;  %v2064_v33 = vmul.f32 %v6509_v13, %v1704_v7  ;;  %v6528_v20 = vpop.f32.mrf.mxu2 }
 0x2cc   : > { %4959 = vmatmul.msk.f32.gmra.mxu1 %vm2095_vm3, %v3622_v47  ;;  %4798 = vmatmul.msk.f32.gmra.mxu2 %vm515_vm1, %v1161_v59  ;;  %v1582_v59 = vadd.f32 %v6356_v38, %v5453_v37 }
 0x2cd   : > { %v4126_v27 = vadd.f32 %v6452_v11, %v4062_v26  ;;  %2138 = vst.msk [vmem:[#allocation2 + $0x118] sm:$0xff] %vm2108_vm2, %v2064_v33  ;;  %2528 = vrot.lane.b32.xlu2 %v2064_v33, %s5206_s28  ;;  %v1705_v26 = vmax.f32 %v1645_v5, 0.0  ;;  %v428_v5 = vld [vmem:[%s7656_s1 + $0x168] sm:$0xff] }
 0x2ce   : > { %2287 = vrot.lane.b32.xlu1 %v2064_v33, %s7682_s24  ;;  %v3062_v40 = vpop.f32.mrf.mxu3 }
 0x2cf   : > { %v4186_v32 = vmax.f32 %v4126_v27, 0.0  ;;  %v3440_v16 = vadd.f32 %v3439_v19, %v3062_v40  ;;  %v2507_v2 = vpop.permute.xlu2 %2506  ;;  %v1646_v27 = vadd.f32 %v6261_v57, %v1582_v59  ;;  %v1583_v59 = vadd.f32 %v6383_v21, %v5458_v41 }
 0x2d0   : > { %v2260_v7 = vpop.permute.xlu1 %2259  ;;  %1957 = vperm.xlu0 %5098, %v427_v39  }
 0x2d1   : > { %v6523_v10 = vmul.f32 %v4186_v32, %v5729_v31  ;;  %2425 = vst.msk [vmem:[#allocation2 + $0x90] sm:$0xff] %vm2409_vm4, %v2260_v7  ;;  %v2797_v34 = vld [vmem:[#allocation2 + $0x88] sm:$0xff]  ;;  %v3442_v19 = vpop.f32.mrf.mxu0 }
 0x2d2   : > { %v3889_v43 = vpop.f32.mrf.mxu1  ;;  %v2725_v14 = vld [vmem:[#allocation2 + $0x87] sm:$0xff]  ;;  %2669 = vst.msk [vmem:[#allocation2 + $0x90] sm:$0xff] %vm2650_vm5, %v2507_v2  ;;  %4829 = vmatmul.msk.f32.gmra.mxu3 %vm2095_vm3, %v2797_v34  ;;  %v6534_v33 = vpop.permute.xlu0 %1887 }
 0x2d3   : > { %v3623_v47 = vld [vmem:[#allocation2 + $0x81] sm:$0xff]  ;;  %v4063_v31 = vadd.f32 %v3889_v43, %v3440_v16  ;;  %4889 = vmatmul.msk.f32.gmra.mxu0 %vm2095_vm3, %v2725_v14  ;;  %v2065_v37 = vmul.f32 %v6534_v33, %v1705_v26  ;;  %v1706_v26 = vmax.f32 %v1646_v27, 0.0  ;;  %v429_v27 = vld [vmem:[%s7656_s1 + $0x170] sm:$0xff] }
 0x2d4   : > { %4960 = vmatmul.msk.f32.gmra.mxu1 %vm2095_vm3, %v3623_v47  ;;  %4799 = vmatmul.msk.f32.gmra.mxu2 %vm515_vm1, %v1162_v51  ;;  %v1163_v51 = vld [vmem:[%s5372_s23 + $0x1f8] sm:$0xff] }
 0x2d5   : > { %v4127_v38 = vadd.f32 %v6452_v11, %v4063_v31  ;;  %2139 = vst.msk [vmem:[#allocation2 + $0x120] sm:$0xff] %vm2108_vm2, %v2065_v37  ;;  %2530 = vrot.lane.b32.xlu2 %v2065_v37, %s5206_s28  ;;  %v6559_v31 = vpop.f32.mrf.mxu2 }
 0x2d6   : > { %2289 = vrot.lane.b32.xlu1 %v2065_v37, %s7682_s24  ;;  %v3065_v32 = vpop.f32.mrf.mxu3 }
 0x2d7   : > { %v4187_v39 = vmax.f32 %v4127_v38, 0.0  ;;  %v3443_v40 = vadd.f32 %v3442_v19, %v3065_v32  ;;  %v2509_v16 = vpop.permute.xlu2 %2508  ;;  %v1647_v38 = vadd.f32 %v6261_v57, %v1583_v59  ;;  %v1584_v59 = vadd.f32 %v6408_v9, %v5466_v46 }
 0x2d8   : > { %v2262_v7 = vpop.permute.xlu1 %2261  ;;  %1962 = vperm.xlu0 %5098, %v428_v5  }
 0x2d9   : > { %v6548_v2 = vmul.f32 %v4187_v39, %v5751_v3  ;;  %2426 = vst.msk [vmem:[#allocation2 + $0x98] sm:$0xff] %vm2409_vm4, %v2262_v7  ;;  %v2798_v34 = vld [vmem:[#allocation2 + $0x90] sm:$0xff]  ;;  %v3445_v21 = vpop.f32.mrf.mxu0 }
 0x2da   : > { %v3892_v43 = vpop.f32.mrf.mxu1  ;;  %v2726_v14 = vld [vmem:[#allocation2 + $0x8f] sm:$0xff]  ;;  %2670 = vst.msk [vmem:[#allocation2 + $0x98] sm:$0xff] %vm2650_vm5, %v2509_v16  ;;  %4830 = vmatmul.msk.f32.gmra.mxu3 %vm2095_vm3, %v2798_v34  ;;  %v6557_v3 = vpop.permute.xlu0 %1892 }
 0x2db   : > { %v3624_v47 = vld [vmem:[#allocation2 + $0x89] sm:$0xff]  ;;  %v4064_v19 = vadd.f32 %v3892_v43, %v3443_v40  ;;  %4890 = vmatmul.msk.f32.gmra.mxu0 %vm2095_vm3, %v2726_v14  ;;  %v2066_v41 = vmul.f32 %v6557_v3, %v1706_v26  ;;  %v1707_v26 = vmax.f32 %v1647_v38, 0.0 }
 0x2dc   : > { %4961 = vmatmul.msk.f32.gmra.mxu1 %vm2095_vm3, %v3624_v47  ;;  %4800 = vmatmul.msk.f32.gmra.mxu2 %vm515_vm1, %v1163_v51  ;;  %v1164_v51 = vld [vmem:[%s5372_s23 + $0x200] sm:$0xff] }
 0x2dd   : > { %v4128_v37 = vadd.f32 %v6452_v11, %v4064_v19  ;;  %2140 = vst.msk [vmem:[#allocation2 + $0x128] sm:$0xff] %vm2108_vm2, %v2066_v41  ;;  %2532 = vrot.lane.b32.xlu2 %v2066_v41, %s5206_s28 }
 0x2de   : > { %2291 = vrot.lane.b32.xlu1 %v2066_v41, %s7682_s24  ;;  %v3068_v39 = vpop.f32.mrf.mxu3  ;;  %v1648_v41 = vadd.f32 %v6261_v57, %v1584_v59  ;;  %v1585_v59 = vadd.f32 %v6436_v45, %v5471_v50 }
 0x2df   : > { %v4188_v5 = vmax.f32 %v4128_v37, 0.0  ;;  %v3446_v32 = vadd.f32 %v3445_v21, %v3068_v39  ;;  %v2511_v40 = vpop.permute.xlu2 %2510  ;;  %v6589_v21 = vpop.f32.mrf.mxu2  ;;  %v430_v37 = vld [vmem:[%s7656_s1 + $0x178] sm:$0xff] }
 0x2e0   : > { %v2264_v7 = vpop.permute.xlu1 %2263  ;;  %1967 = vperm.xlu0 %5098, %v429_v27  }
 0x2e1   : > { %v6573_v16 = vmul.f32 %v4188_v5, %v5766_v30  ;;  %2427 = vst.msk [vmem:[#allocation2 + $0xa0] sm:$0xff] %vm2409_vm4, %v2264_v7  ;;  %v2799_v34 = vld [vmem:[#allocation2 + $0x98] sm:$0xff]  ;;  %v3448_v38 = vpop.f32.mrf.mxu0 }
 0x2e2   : > { %v3895_v43 = vpop.f32.mrf.mxu1  ;;  %v2727_v14 = vld [vmem:[#allocation2 + $0x97] sm:$0xff]  ;;  %2671 = vst.msk [vmem:[#allocation2 + $0xa0] sm:$0xff] %vm2650_vm5, %v2511_v40  ;;  %4831 = vmatmul.msk.f32.gmra.mxu3 %vm2095_vm3, %v2799_v34  ;;  %v6582_v30 = vpop.permute.xlu0 %1897 }
 0x2e3   : > { %v3625_v47 = vld [vmem:[#allocation2 + $0x91] sm:$0xff]  ;;  %v4065_v19 = vadd.f32 %v3895_v43, %v3446_v32  ;;  %4891 = vmatmul.msk.f32.gmra.mxu0 %vm2095_vm3, %v2727_v14  ;;  %v2067_v46 = vmul.f32 %v6582_v30, %v1707_v26  ;;  %v1708_v26 = vmax.f32 %v1648_v41, 0.0 }
 0x2e4   : > { %4962 = vmatmul.msk.f32.gmra.mxu1 %vm2095_vm3, %v3625_v47  ;;  %4801 = vmatmul.msk.f32.gmra.mxu2 %vm515_vm1, %v1164_v51  ;;  %v1165_v51 = vld [vmem:[%s5372_s23 + $0x208] sm:$0xff] }
 0x2e5   : > { %v4129_v9 = vadd.f32 %v6452_v11, %v4065_v19  ;;  %2141 = vst.msk [vmem:[#allocation2 + $0x130] sm:$0xff] %vm2108_vm2, %v2067_v46  ;;  %2534 = vrot.lane.b32.xlu2 %v2067_v46, %s5206_s28 }
 0x2e6   : > { %2293 = vrot.lane.b32.xlu1 %v2067_v46, %s7682_s24  ;;  %v3071_v5 = vpop.f32.mrf.mxu3  ;;  %v1649_v46 = vadd.f32 %v6261_v57, %v1585_v59 }
 0x2e7   : > { %v4189_v27 = vmax.f32 %v4129_v9, 0.0  ;;  %v3449_v39 = vadd.f32 %v3448_v38, %v3071_v5  ;;  %v2513_v32 = vpop.permute.xlu2 %2512  ;;  %v431_v9 = vld [vmem:[%s7656_s1 + $0x180] sm:$0xff] }
 0x2e8   : > { %v2266_v7 = vpop.permute.xlu1 %2265  ;;  %1972 = vperm.xlu0 %5098, %v430_v37   ;;  %v6620_v37 = vpop.f32.mrf.mxu2  ;;  %v1709_v59 = vmax.f32 %v1649_v46, 0.0 }
 0x2e9   : > { %v6598_v40 = vmul.f32 %v4189_v27, %v5795_v15  ;;  %2428 = vst.msk [vmem:[#allocation2 + $0xa8] sm:$0xff] %vm2409_vm4, %v2266_v7  ;;  %v2800_v34 = vld [vmem:[#allocation2 + $0xa0] sm:$0xff] }
 0x2ea   : > { %v3898_v43 = vpop.f32.mrf.mxu1  ;;  %v2728_v14 = vld [vmem:[#allocation2 + $0x9f] sm:$0xff]  ;;  %2672 = vst.msk [vmem:[#allocation2 + $0xa8] sm:$0xff] %vm2650_vm5, %v2513_v32  ;;  %4832 = vmatmul.msk.f32.gmra.mxu3 %vm2095_vm3, %v2800_v34  ;;  %v6607_v15 = vpop.permute.xlu0 %1902  ;;  %v1035_v34 = vadd.f32 %v5800_v17, %v5481_v56 }
 0x2eb   : > { %v3626_v47 = vld [vmem:[#allocation2 + $0x99] sm:$0xff]  ;;  %v4066_v19 = vadd.f32 %v3898_v43, %v3449_v39  ;;  %4892 = vmatmul.msk.f32.gmra.mxu0 %vm2095_vm3, %v2728_v14  ;;  %v2068_v50 = vmul.f32 %v6607_v15, %v1708_v26  ;;  %v1586_v39 = vadd.f32 %v6467_v63, %v5476_v54  ;;  %v432_v63 = vld [vmem:[%s7656_s1 + $0x188] sm:$0xff] }
 0x2ec   : > { %4963 = vmatmul.msk.f32.gmra.mxu1 %vm2095_vm3, %v3626_v47  ;;  %4802 = vmatmul.msk.f32.gmra.mxu2 %vm515_vm1, %v1165_v51  ;;  %v1587_v26 = vadd.f32 %v6497_v24, %v1035_v34  ;;  %v1041_v34 = vadd.f32 %v5857_v6, %v5491_v60 }
 0x2ed   : > { %v4130_v45 = vadd.f32 %v6452_v11, %v4066_v19  ;;  %2142 = vst.msk [vmem:[#allocation2 + $0x138] sm:$0xff] %vm2108_vm2, %v2068_v50  ;;  %2536 = vrot.lane.b32.xlu2 %v2068_v50, %s5206_s28  ;;  %v1650_v54 = vadd.f32 %v6261_v57, %v1586_v39 }
 0x2ee   : > { %2295 = vrot.lane.b32.xlu1 %v2068_v50, %s7682_s24  ;;  %v1651_v24 = vadd.f32 %v6261_v57, %v1587_v26 }
 0x2ef   : > { %v4190_v41 = vmax.f32 %v4130_v45, 0.0  ;;  %v2515_v38 = vpop.permute.xlu2 %2514 }
 0x2f0   : > { %v2268_v5 = vpop.permute.xlu1 %2267  ;;  %1977 = vperm.xlu0 %5098, %v431_v9   ;;  %v6645_v19 = vpop.f32.mrf.mxu2  ;;  %v1710_v9 = vmax.f32 %v1650_v54, 0.0 }
 0x2f1   : > { %v6623_v27 = vmul.f32 %v4190_v41, %v5814_v44  ;;  %2429 = vst.msk [vmem:[#allocation2 + $0xb0] sm:$0xff] %vm2409_vm4, %v2268_v5  ;;  %v2801_v32 = vld [vmem:[#allocation2 + $0xa8] sm:$0xff]  ;;  %v433_v41 = vld [vmem:[%s7656_s1 + $0x190] sm:$0xff] }
 0x2f2   : > { %v2729_v7 = vld [vmem:[#allocation2 + $0xa7] sm:$0xff]  ;;  %2673 = vst.msk [vmem:[#allocation2 + $0xb0] sm:$0xff] %vm2650_vm5, %v2515_v38  ;;  %4833 = vmatmul.msk.f32.gmra.mxu3 %vm2095_vm3, %v2801_v32  ;;  %v6631_v43 = vpop.permute.xlu0 %1907  ;;  %v1038_v38 = vadd.f32 %v5825_v53, %v5486_v58  ;;  %v1711_v32 = vmax.f32 %v1651_v24, 0.0 }
 0x2f3   : > { %v3627_v51 = vld [vmem:[#allocation2 + $0xa1] sm:$0xff]  ;;  %4893 = vmatmul.msk.f32.gmra.mxu0 %vm2095_vm3, %v2729_v7  ;;  %v2069_v44 = vmul.f32 %v6631_v43, %v1709_v59 }
 0x2f4   : > { %4964 = vmatmul.msk.f32.gmra.mxu1 %vm2095_vm3, %v3627_v51  ;;  %v1588_v7 = vadd.f32 %v6528_v20, %v1038_v38  ;;  %v435_v24 = vld [vmem:[%s7656_s1 + $0x1a0] sm:$0xff] }
 0x2f5   : > { %2143 = vst.msk [vmem:[#allocation2 + $0x140] sm:$0xff] %vm2108_vm2, %v2069_v44  ;;  %2538 = vrot.lane.b32.xlu2 %v2069_v44, %s5206_s28 }
 0x2f6   : > { %2297 = vrot.lane.b32.xlu1 %v2069_v44, %s7682_s24  ;;  %v1652_v20 = vadd.f32 %v6261_v57, %v1588_v7 }
 0x2f7   : > { %v2517_v14 = vpop.permute.xlu2 %2516 }
 0x2f8   : > { %v2270_v47 = vpop.permute.xlu1 %2269  ;;  %1982 = vperm.xlu0 %5098, %v432_v63   ;;  %v6671_v58 = vpop.f32.mrf.mxu2  ;;  %v434_v63 = vld [vmem:[%s7656_s1 + $0x198] sm:$0xff]  ;;  %v1712_v26 = vmax.f32 %v1652_v20, 0.0  ;;  %v1047_v20 = vadd.f32 %v5906_v23, %v5501_v0 }
 0x2f9   : > { %2430 = vst.msk [vmem:[#allocation2 + $0xb8] sm:$0xff] %vm2409_vm4, %v2270_v47  ;;  %v2802_v50 = vld [vmem:[#allocation2 + $0xb0] sm:$0xff] }
 0x2fa   : > { %v2730_v45 = vld [vmem:[#allocation2 + $0xaf] sm:$0xff]  ;;  %2674 = vst.msk [vmem:[#allocation2 + $0xb8] sm:$0xff] %vm2650_vm5, %v2517_v14  ;;  %4834 = vmatmul.msk.f32.gmra.mxu3 %vm2095_vm3, %v2802_v50  ;;  %v6651_v56 = vpop.permute.xlu0 %1912  ;;  %v1589_v50 = vadd.f32 %v6559_v31, %v1041_v34 }
 0x2fb   : > { %v3628_v46 = vld [vmem:[#allocation2 + $0xa9] sm:$0xff]  ;;  %4894 = vmatmul.msk.f32.gmra.mxu0 %vm2095_vm3, %v2730_v45  ;;  %v2070_v17 = vmul.f32 %v6651_v56, %v1710_v9 }
 0x2fc   : > { %4965 = vmatmul.msk.f32.gmra.mxu1 %vm2095_vm3, %v3628_v46  ;;  %v1653_v6 = vadd.f32 %v6261_v57, %v1589_v50 }
 0x2fd   : > { %2144 = vst.msk [vmem:[#allocation2 + $0x148] sm:$0xff] %vm2108_vm2, %v2070_v17  ;;  %2540 = vrot.lane.b32.xlu2 %v2070_v17, %s5206_s28 }
 0x2fe   : > { %2299 = vrot.lane.b32.xlu1 %v2070_v17, %s7682_s24 }
 0x2ff   : > { %v2519_v5 = vpop.permute.xlu2 %2518 }
 0x300   : > { %v2272_v39 = vpop.permute.xlu1 %2271  ;;  %1987 = vperm.xlu0 %5098, %v433_v41   ;;  %v6694_v31 = vpop.f32.mrf.mxu2  ;;  %v1044_v41 = vadd.f32 %v5885_v28, %v5496_v62 }
 0x301   : > { %2431 = vst.msk [vmem:[#allocation2 + $0xc0] sm:$0xff] %vm2409_vm4, %v2272_v39  ;;  %v2803_v51 = vld [vmem:[#allocation2 + $0xb8] sm:$0xff]  ;;  %v1713_v39 = vmax.f32 %v1653_v6, 0.0  ;;  %v437_v6 = vld [vmem:[%s7656_s1 + $0x1b0] sm:$0xff] }
 0x302   : > { %v2731_v59 = vld [vmem:[#allocation2 + $0xb7] sm:$0xff]  ;;  %2675 = vst.msk [vmem:[#allocation2 + $0xc0] sm:$0xff] %vm2650_vm5, %v2519_v5  ;;  %4835 = vmatmul.msk.f32.gmra.mxu3 %vm2095_vm3, %v2803_v51  ;;  %v6669_v54 = vpop.permute.xlu0 %1917 }
 0x303   : > { %v3629_v44 = vld [vmem:[#allocation2 + $0xb1] sm:$0xff]  ;;  %4895 = vmatmul.msk.f32.gmra.mxu0 %vm2095_vm3, %v2731_v59  ;;  %v2071_v53 = vmul.f32 %v6669_v54, %v1711_v32  ;;  %v1590_v32 = vadd.f32 %v6589_v21, %v1044_v41  ;;  %v436_v21 = vld [vmem:[%s7656_s1 + $0x1a8] sm:$0xff] }
 0x304   : > { %4966 = vmatmul.msk.f32.gmra.mxu1 %vm2095_vm3, %v3629_v44 }
 0x305   : > { %2145 = vst.msk [vmem:[#allocation2 + $0x150] sm:$0xff] %vm2108_vm2, %v2071_v53  ;;  %2542 = vrot.lane.b32.xlu2 %v2071_v53, %s5206_s28  ;;  %v1654_v28 = vadd.f32 %v6261_v57, %v1590_v32 }
 0x306   : > { %2301 = vrot.lane.b32.xlu1 %v2071_v53, %s7682_s24  ;;  %v3451_v53 = vpop.f32.mrf.mxu0 }
 0x307   : > { %v2521_v14 = vpop.permute.xlu2 %2520  ;;  %v1714_v57 = vmax.f32 %v1654_v28, 0.0 }
 0x308   : > { %v2274_v47 = vpop.permute.xlu1 %2273  ;;  %1992 = vperm.xlu0 %5098, %v434_v63   ;;  %v6722_v63 = vpop.f32.mrf.mxu2 }
 0x309   : > { %2432 = vst.msk [vmem:[#allocation2 + $0xc8] sm:$0xff] %vm2409_vm4, %v2274_v47  ;;  %v2804_v45 = vld [vmem:[#allocation2 + $0xc0] sm:$0xff]  ;;  %v1591_v47 = vadd.f32 %v6620_v37, %v1047_v20 }
 0x30a   : > { %v2732_v46 = vld [vmem:[#allocation2 + $0xbf] sm:$0xff]  ;;  %2676 = vst.msk [vmem:[#allocation2 + $0xc8] sm:$0xff] %vm2650_vm5, %v2521_v14  ;;  %4836 = vmatmul.msk.f32.gmra.mxu3 %vm2095_vm3, %v2804_v45  ;;  %v6689_v17 = vpop.permute.xlu0 %1922 }
 0x30b   : > { %v3630_v9 = vld [vmem:[#allocation2 + $0xb9] sm:$0xff]  ;;  %4896 = vmatmul.msk.f32.gmra.mxu0 %vm2095_vm3, %v2732_v46  ;;  %v2072_v60 = vmul.f32 %v6689_v17, %v1712_v26  ;;  %v3074_v46 = vpop.f32.mrf.mxu3 }
 0x30c   : > { %4967 = vmatmul.msk.f32.gmra.mxu1 %vm2095_vm3, %v3630_v9  ;;  %v6736_v37 = vld [vmem:[%s7618_s3] ss:$0 sm:$0xff] }
 0x30d   : > { %2146 = vst.msk [vmem:[#allocation2 + $0x158] sm:$0xff] %vm2108_vm2, %v2072_v60  ;;  %2544 = vrot.lane.b32.xlu2 %v2072_v60, %s5206_s28  ;;  %v1655_v9 = vadd.f32 %v6736_v37, %v1591_v47  ;;  %v438_v47 = vld [vmem:[%s7656_s1 + $0x1b8] sm:$0xff] }
 0x30e   : > { %2303 = vrot.lane.b32.xlu1 %v2072_v60, %s7682_s24  ;;  %v3452_v60 = vadd.f32 %v3451_v53, %v3074_v46 }
 0x30f   : > { %v2523_v38 = vpop.permute.xlu2 %2522 }
 0x310   : > { %v2276_v5 = vpop.permute.xlu1 %2275  ;;  %1997 = vperm.xlu0 %5098, %v435_v24  }
 0x311   : > { %2433 = vst.msk [vmem:[#allocation2 + $0xd0] sm:$0xff] %vm2409_vm4, %v2276_v5  ;;  %v2805_v7 = vld [vmem:[#allocation2 + $0xc8] sm:$0xff] }
 0x312   : > { %v2733_v51 = vld [vmem:[#allocation2 + $0xc7] sm:$0xff]  ;;  %2677 = vst.msk [vmem:[#allocation2 + $0xd0] sm:$0xff] %vm2650_vm5, %v2523_v38  ;;  %4837 = vmatmul.msk.f32.gmra.mxu3 %vm2095_vm3, %v2805_v7  ;;  %v6709_v44 = vpop.permute.xlu0 %1927  ;;  %v1050_v38 = vadd.f32 %v5941_v55, %v5510_v4  ;;  %v1715_v7 = vmax.f32 %v1655_v9, 0.0 }
 0x313   : > { %v3631_v59 = vld [vmem:[#allocation2 + $0xc1] sm:$0xff]  ;;  %4897 = vmatmul.msk.f32.gmra.mxu0 %vm2095_vm3, %v2733_v51  ;;  %v2073_v62 = vmul.f32 %v6709_v44, %v1713_v39 }
 0x314   : > { %4968 = vmatmul.msk.f32.gmra.mxu1 %vm2095_vm3, %v3631_v59  ;;  %v1592_v51 = vadd.f32 %v6645_v19, %v1050_v38  ;;  %v6748_v59 = vpop.f32.mrf.mxu2 }
 0x315   : > { %2147 = vst.msk [vmem:[#allocation2 + $0x160] sm:$0xff] %vm2108_vm2, %v2073_v62  ;;  %2546 = vrot.lane.b32.xlu2 %v2073_v62, %s5206_s28 }
 0x316   : > { %2305 = vrot.lane.b32.xlu1 %v2073_v62, %s7682_s24 }
 0x317   : > { %v2525_v34 = vpop.permute.xlu2 %2524 }
 0x318   : > { %v2278_v14 = vpop.permute.xlu1 %2277  ;;  %2002 = vperm.xlu0 %5098, %v436_v21  }
 0x319   : > { %2434 = vst.msk [vmem:[#allocation2 + $0xd8] sm:$0xff] %vm2409_vm4, %v2278_v14  ;;  %v2806_v26 = vld [vmem:[#allocation2 + $0xd0] sm:$0xff]  ;;  %v1656_v14 = vadd.f32 %v6736_v37, %v1592_v51 }
 0x31a   : > { %v2734_v50 = vld [vmem:[#allocation2 + $0xcf] sm:$0xff]  ;;  %2678 = vst.msk [vmem:[#allocation2 + $0xd8] sm:$0xff] %vm2650_vm5, %v2525_v34  ;;  %4838 = vmatmul.msk.f32.gmra.mxu3 %vm2095_vm3, %v2806_v26  ;;  %v6729_v0 = vpop.permute.xlu0 %1932 }
 0x31b   : > { %v3632_v45 = vld [vmem:[#allocation2 + $0xc9] sm:$0xff]  ;;  %4898 = vmatmul.msk.f32.gmra.mxu0 %vm2095_vm3, %v2734_v50  ;;  %v2074_v23 = vmul.f32 %v6729_v0, %v1714_v57 }
 0x31c   : > { %4969 = vmatmul.msk.f32.gmra.mxu1 %vm2095_vm3, %v3632_v45  ;;  %v1053_v45 = vadd.f32 %v5966_v42, %v5519_v8  ;;  %v6779_v42 = vpop.f32.mrf.mxu2 }
 0x31d   : > { %2148 = vst.msk [vmem:[#allocation2 + $0x168] sm:$0xff] %vm2108_vm2, %v2074_v23  ;;  %2548 = vrot.lane.b32.xlu2 %v2074_v23, %s5206_s28 }
 0x31e   : > { %2307 = vrot.lane.b32.xlu1 %v2074_v23, %s7682_s24  ;;  %v3454_v24 = vpop.f32.mrf.mxu0 }
 0x31f   : > { %v3901_v41 = vpop.f32.mrf.mxu1  ;;  %v2527_v39 = vpop.permute.xlu2 %2526 }
 0x320   : > { %v4067_v5 = vadd.f32 %v3901_v41, %v3452_v60  ;;  %v2280_v32 = vpop.permute.xlu1 %2279  ;;  %2007 = vperm.xlu0 %5098, %v437_v6   ;;  %v1593_v60 = vadd.f32 %v6671_v58, %v1053_v45 }
 0x321   : > { %2435 = vst.msk [vmem:[#allocation2 + $0xe0] sm:$0xff] %vm2409_vm4, %v2280_v32  ;;  %v2807_v28 = vld [vmem:[#allocation2 + $0xd8] sm:$0xff] }
 0x322   : > { %v4131_v62 = vadd.f32 %v6452_v11, %v4067_v5  ;;  %v2735_v21 = vld [vmem:[#allocation2 + $0xd7] sm:$0xff]  ;;  %2679 = vst.msk [vmem:[#allocation2 + $0xe0] sm:$0xff] %vm2650_vm5, %v2527_v39  ;;  %4839 = vmatmul.msk.f32.gmra.mxu3 %vm2095_vm3, %v2807_v28  ;;  %v6755_v4 = vpop.permute.xlu0 %1937 }
 0x323   : > { %v3633_v53 = vld [vmem:[#allocation2 + $0xd1] sm:$0xff]  ;;  %4899 = vmatmul.msk.f32.gmra.mxu0 %vm2095_vm3, %v2735_v21  ;;  %v2075_v19 = vmul.f32 %v6755_v4, %v1715_v7  ;;  %v3077_v20 = vpop.f32.mrf.mxu3  ;;  %v1657_v7 = vadd.f32 %v6736_v37, %v1593_v60 }
 0x324   : > { %v4191_v55 = vmax.f32 %v4131_v62, 0.0  ;;  %4970 = vmatmul.msk.f32.gmra.mxu1 %vm2095_vm3, %v3633_v53  ;;  %v3455_v34 = vadd.f32 %v3454_v24, %v3077_v20  ;;  %v439_v62 = vld [vmem:[%s7656_s1 + $0x1c0] sm:$0xff]  ;;  %v7706_v53 = vld [vmem:[#allocation30_spill] sm:$0xff]  ;;  %v6806_v60 = vpop.f32.mrf.mxu2 }
 0x325   : > { %2149 = vst.msk [vmem:[#allocation2 + $0x170] sm:$0xff] %vm2108_vm2, %v2075_v19  ;;  %2550 = vrot.lane.b32.xlu2 %v2075_v19, %s5206_s28 }
 0x326   : > { %v6761_v57 = vmul.f32 %v4191_v55, %v5838_v35  ;;  %2309 = vrot.lane.b32.xlu1 %v2075_v19, %s7682_s24  ;;  %v3457_v26 = vpop.f32.mrf.mxu0  ;;  %v1716_v35 = vmax.f32 %v1656_v14, 0.0  ;;  %v1056_v55 = vadd.f32 %v7706_v53, %v5531_v18 }
 0x327   : > { %v3904_v50 = vpop.f32.mrf.mxu1  ;;  %v2529_v23 = vpop.permute.xlu2 %2528 }
 0x328   : > { %v4068_v46 = vadd.f32 %v3904_v50, %v3455_v34  ;;  %v2282_v9 = vpop.permute.xlu1 %2281  ;;  %2012 = vperm.xlu0 %5098, %v438_v47   ;;  %v1594_v14 = vadd.f32 %v6694_v31, %v1056_v55 }
 0x329   : > { %2436 = vst.msk [vmem:[#allocation2 + $0xe8] sm:$0xff] %vm2409_vm4, %v2282_v9  ;;  %v2808_v24 = vld [vmem:[#allocation2 + $0xe0] sm:$0xff] }
 0x32a   : > { %v4132_v6 = vadd.f32 %v6452_v11, %v4068_v46  ;;  %v2736_v41 = vld [vmem:[#allocation2 + $0xdf] sm:$0xff]  ;;  %2680 = vst.msk [vmem:[#allocation2 + $0xe8] sm:$0xff] %vm2650_vm5, %v2529_v23  ;;  %4840 = vmatmul.msk.f32.gmra.mxu3 %vm2095_vm3, %v2808_v24  ;;  %v6777_v8 = vpop.permute.xlu0 %1942 }
 0x32b   : > { %v3634_v38 = vld [vmem:[#allocation2 + $0xd9] sm:$0xff]  ;;  %4900 = vmatmul.msk.f32.gmra.mxu0 %vm2095_vm3, %v2736_v41  ;;  %v2076_v58 = vmul.f32 %v6777_v8, %v1716_v35  ;;  %v3080_v39 = vpop.f32.mrf.mxu3  ;;  %v1658_v35 = vadd.f32 %v6736_v37, %v1594_v14  ;;  %v440_v41 = vld [vmem:[%s7656_s1 + $0x1c8] sm:$0xff] }
 0x32c   : > { %v4192_v5 = vmax.f32 %v4132_v6, 0.0  ;;  %4971 = vmatmul.msk.f32.gmra.mxu1 %vm2095_vm3, %v3634_v38  ;;  %v3458_v32 = vadd.f32 %v3457_v26, %v3080_v39  ;;  %v7707_v6 = vld [vmem:[#allocation28_spill] sm:$0xff]  ;;  %v7709_v38 = vld [vmem:[#allocation10_spill] sm:$0xff] }
 0x32d   : > { %2150 = vst.msk [vmem:[#allocation2 + $0x178] sm:$0xff] %vm2108_vm2, %v2076_v58  ;;  %2552 = vrot.lane.b32.xlu2 %v2076_v58, %s5206_s28 }
 0x32e   : > { %v6785_v51 = vmul.f32 %v4192_v5, %v5861_v22  ;;  %2311 = vrot.lane.b32.xlu1 %v2076_v58, %s7682_s24  ;;  %v3460_v28 = vpop.f32.mrf.mxu0  ;;  %v1717_v22 = vmax.f32 %v1657_v7, 0.0  ;;  %v7710_v5 = vld [vmem:[#allocation31_spill] sm:$0xff] }
 0x32f   : > { %v3907_v21 = vpop.f32.mrf.mxu1  ;;  %v2531_v20 = vpop.permute.xlu2 %2530  ;;  %v1059_v58 = vadd.f32 %v7710_v5, %v7709_v38 }
 0x330   : > { %v4069_v19 = vadd.f32 %v3907_v21, %v3458_v32  ;;  %v2284_v34 = vpop.permute.xlu1 %2283  ;;  %2017 = vperm.xlu0 %5098, %v439_v62   ;;  %v1718_v62 = vmax.f32 %v1658_v35, 0.0  ;;  %v7713_v35 = vld [vmem:[#allocation29_spill] sm:$0xff] }
 0x331   : > { %2437 = vst.msk [vmem:[#allocation2 + $0xf0] sm:$0xff] %vm2409_vm4, %v2284_v34  ;;  %v2809_v26 = vld [vmem:[#allocation2 + $0xe8] sm:$0xff] }
 0x332   : > { %v4133_v47 = vadd.f32 %v6452_v11, %v4069_v19  ;;  %v2737_v50 = vld [vmem:[#allocation2 + $0xe7] sm:$0xff]  ;;  %2681 = vst.msk [vmem:[#allocation2 + $0xf0] sm:$0xff] %vm2650_vm5, %v2531_v20  ;;  %4841 = vmatmul.msk.f32.gmra.mxu3 %vm2095_vm3, %v2809_v26  ;;  %v6801_v18 = vpop.permute.xlu0 %1947 }
 0x333   : > { %v3635_v45 = vld [vmem:[#allocation2 + $0xe1] sm:$0xff]  ;;  %4901 = vmatmul.msk.f32.gmra.mxu0 %vm2095_vm3, %v2737_v50  ;;  %v2077_v31 = vmul.f32 %v6801_v18, %v1717_v22  ;;  %v3083_v23 = vpop.f32.mrf.mxu3  ;;  %v441_v50 = vld [vmem:[%s7656_s1 + $0x1d0] sm:$0xff] }
 0x334   : > { %v4193_v46 = vmax.f32 %v4133_v47, 0.0  ;;  %4972 = vmatmul.msk.f32.gmra.mxu1 %vm2095_vm3, %v3635_v45  ;;  %v3461_v9 = vadd.f32 %v3460_v28, %v3083_v23  ;;  %v1595_v28 = vadd.f32 %v6722_v63, %v1059_v58 }
 0x335   : > { %2151 = vst.msk [vmem:[#allocation2 + $0x180] sm:$0xff] %vm2108_vm2, %v2077_v31  ;;  %2554 = vrot.lane.b32.xlu2 %v2077_v31, %s5206_s28 }
 0x336   : > { %v6809_v24 = vmul.f32 %v4193_v46, %v7707_v6  ;;  %2313 = vrot.lane.b32.xlu1 %v2077_v31, %s7682_s24  ;;  %v1659_v14 = vadd.f32 %v6736_v37, %v1595_v28  ;;  %v7711_v46 = vld [vmem:[#allocation11_spill] sm:$0xff]  ;;  %v7712_v31 = vld [vmem:[#allocation32_spill] sm:$0xff] }
 0x337   : > { %v2533_v7 = vpop.permute.xlu2 %2532  ;;  %v1062_v23 = vadd.f32 %v7712_v31, %v7711_v46 }
 0x338   : > { %7708 = vst [vmem:[#allocation30_spill] sm:$0xff] %v6809_v24  ;;  %v3463_v39 = vpop.f32.mrf.mxu0  ;;  %2022 = vperm.xlu0 %5098, %v440_v41   ;;  %v2286_v53 = vpop.permute.xlu1 %2285  ;;  %v1719_v58 = vmax.f32 %v1659_v14, 0.0 }
 0x339   : > { %v3910_v32 = vpop.f32.mrf.mxu1  ;;  %v2810_v55 = vld [vmem:[#allocation2 + $0xf0] sm:$0xff]  ;;  %2438 = vst.msk [vmem:[#allocation2 + $0xf8] sm:$0xff] %vm2409_vm4, %v2286_v53 }
 0x33a   : > { %v4070_v21 = vadd.f32 %v3910_v32, %v3461_v9  ;;  %v2738_v19 = vld [vmem:[#allocation2 + $0xef] sm:$0xff]  ;;  %4842 = vmatmul.msk.f32.gmra.mxu3 %vm2095_vm3, %v2810_v55  ;;  %v6823_v34 = vpop.permute.xlu0 %1952  ;;  %2682 = vst.msk [vmem:[#allocation2 + $0xf8] sm:$0xff] %vm2650_vm5, %v2533_v7  ;;  %v6838_v9 = vpop.f32.mrf.mxu2  ;;  %v1596_v32 = vadd.f32 %v6748_v59, %v1062_v23 }
 0x33b   : > { %v3636_v20 = vld [vmem:[#allocation2 + $0xe9] sm:$0xff]  ;;  %4902 = vmatmul.msk.f32.gmra.mxu0 %vm2095_vm3, %v2738_v19  ;;  %v2078_v63 = vmul.f32 %v6823_v34, %v1718_v62 }
 0x33c   : > { %v4134_v22 = vadd.f32 %v6452_v11, %v4070_v21  ;;  %4973 = vmatmul.msk.f32.gmra.mxu1 %vm2095_vm3, %v3636_v20  ;;  %v1660_v59 = vadd.f32 %v6736_v37, %v1596_v32 }
 0x33d   : > { %2152 = vst.msk [vmem:[#allocation2 + $0x188] sm:$0xff] %vm2108_vm2, %v2078_v63  ;;  %v3086_v26 = vpop.f32.mrf.mxu3  ;;  %2556 = vrot.lane.b32.xlu2 %v2078_v63, %s5206_s28 }
 0x33e   : > { %v4194_v47 = vmax.f32 %v4134_v22, 0.0  ;;  %2315 = vrot.lane.b32.xlu1 %v2078_v63, %s7682_s24  ;;  %v3464_v45 = vadd.f32 %v3463_v39, %v3086_v26  ;;  %v442_v63 = vld [vmem:[%s7656_s1 + $0x1d8] sm:$0xff]  ;;  %v7716_v26 = vld [vmem:[#allocation33_spill] sm:$0xff] }
 0x33f   : > { %v2535_v5 = vpop.permute.xlu2 %2534 }
 0x340   : > { %v6841_v6 = vmul.f32 %v4194_v47, %v7713_v35  ;;  %v3466_v41 = vpop.f32.mrf.mxu0  ;;  %2027 = vperm.xlu0 %5098, %v441_v50   ;;  %v2288_v62 = vpop.permute.xlu1 %2287  ;;  %v7715_v47 = vld [vmem:[#allocation12_spill] sm:$0xff]  ;;  %v1720_v35 = vmax.f32 %v1660_v59, 0.0  ;;  %v7719_v59 = vld [vmem:[#allocation34_spill] sm:$0xff] }
 0x341   : > { %v3913_v38 = vpop.f32.mrf.mxu1  ;;  %2439 = vst.msk [vmem:[#allocation2 + $0x100] sm:$0xff] %vm2409_vm4, %v2288_v62  ;;  %v2811_v39 = vld [vmem:[#allocation2 + $0xf8] sm:$0xff]  ;;  %v1065_v50 = vadd.f32 %v7716_v26, %v7715_v47 }
 0x342   : > { %7714 = vst [vmem:[#allocation28_spill] sm:$0xff] %v6841_v6  ;;  %v4071_v7 = vadd.f32 %v3913_v38, %v3464_v45  ;;  %v2739_v28 = vld [vmem:[#allocation2 + $0xf7] sm:$0xff]  ;;  %v6845_v53 = vpop.permute.xlu0 %1957  ;;  %4843 = vmatmul.msk.f32.gmra.mxu3 %vm2095_vm3, %v2811_v39 }
 0x343   : > { %v3637_v21 = vld [vmem:[#allocation2 + $0xf1] sm:$0xff]  ;;  %2683 = vst.msk [vmem:[#allocation2 + $0x100] sm:$0xff] %vm2650_vm5, %v2535_v5  ;;  %4903 = vmatmul.msk.f32.gmra.mxu0 %vm2095_vm3, %v2739_v28  ;;  %v2079_v19 = vmul.f32 %v6845_v53, %v1719_v58  ;;  %v1597_v38 = vadd.f32 %v6779_v42, %v1065_v50  ;;  %v6866_v5 = vpop.f32.mrf.mxu2 }
 0x344   : > { %v4135_v55 = vadd.f32 %v6452_v11, %v4071_v7  ;;  %4974 = vmatmul.msk.f32.gmra.mxu1 %vm2095_vm3, %v3637_v21 }
 0x345   : > { %2153 = vst.msk [vmem:[#allocation2 + $0x190] sm:$0xff] %vm2108_vm2, %v2079_v19  ;;  %v3089_v22 = vpop.f32.mrf.mxu3  ;;  %2558 = vrot.lane.b32.xlu2 %v2079_v19, %s5206_s28  ;;  %v1661_v28 = vadd.f32 %v6736_v37, %v1597_v38 }
 0x346   : > { %v4195_v20 = vmax.f32 %v4135_v55, 0.0  ;;  %2317 = vrot.lane.b32.xlu1 %v2079_v19, %s7682_s24  ;;  %v3467_v14 = vadd.f32 %v3466_v41, %v3089_v22  ;;  %v7718_v19 = vld [vmem:[#allocation13_spill] sm:$0xff]  ;;  %v7720_v22 = vld [vmem:[#allocation36_spill] sm:$0xff] }
 0x347   : > { %v2537_v23 = vpop.permute.xlu2 %2536  ;;  %v1721_v50 = vmax.f32 %v1661_v28, 0.0 }
 0x348   : > { %v6863_v45 = vmul.f32 %v4195_v20, %v6093_v61  ;;  %v3469_v46 = vpop.f32.mrf.mxu0  ;;  %2032 = vperm.xlu0 %5098, %v442_v63   ;;  %v2290_v32 = vpop.permute.xlu1 %2289  ;;  %v1068_v20 = vadd.f32 %v7719_v59, %v7718_v19  ;;  %v7724_v59 = vld [vmem:[#allocation38_spill] sm:$0xff] }
 0x349   : > { %v3916_v31 = vpop.f32.mrf.mxu1  ;;  %2440 = vst.msk [vmem:[#allocation2 + $0x108] sm:$0xff] %vm2409_vm4, %v2290_v32 }
 0x34a   : > { %7717 = vst [vmem:[#allocation10_spill] sm:$0xff] %v6863_v45  ;;  %v4072_v58 = vadd.f32 %v3916_v31, %v3467_v14  ;;  %v2812_v41 = vld [vmem:[#allocation2 + $0x100] sm:$0xff]  ;;  %v6869_v39 = vpop.permute.xlu0 %1962  ;;  %v1598_v31 = vadd.f32 %v6806_v60, %v1068_v20 }
 0x34b   : > { %v2740_v7 = vld [vmem:[#allocation2 + $0xff] sm:$0xff]  ;;  %2684 = vst.msk [vmem:[#allocation2 + $0x108] sm:$0xff] %vm2650_vm5, %v2537_v23  ;;  %4844 = vmatmul.msk.f32.gmra.mxu3 %vm2095_vm3, %v2812_v41  ;;  %v2080_v42 = vmul.f32 %v6869_v39, %v1720_v35  ;;  %v6890_v41 = vpop.f32.mrf.mxu2 }
 0x34c   : > { %v3638_v62 = vld [vmem:[#allocation2 + $0xf9] sm:$0xff]  ;;  %v4136_v61 = vadd.f32 %v6452_v11, %v4072_v58  ;;  %4904 = vmatmul.msk.f32.gmra.mxu0 %vm2095_vm3, %v2740_v7 }
 0x34d   : > { %4975 = vmatmul.msk.f32.gmra.mxu1 %vm2095_vm3, %v3638_v62  ;;  %2154 = vst.msk [vmem:[#allocation2 + $0x198] sm:$0xff] %vm2108_vm2, %v2080_v42  ;;  %v3092_v55 = vpop.f32.mrf.mxu3  ;;  %2560 = vrot.lane.b32.xlu2 %v2080_v42, %s5206_s28  ;;  %v6895_v7 = vld [vmem:[%s7620_s5] ss:$0 sm:$0xff] }
 0x34e   : > { %v4196_v21 = vmax.f32 %v4136_v61, 0.0  ;;  %2319 = vrot.lane.b32.xlu1 %v2080_v42, %s7682_s24  ;;  %v3470_v11 = vadd.f32 %v3469_v46, %v3092_v55  ;;  %v1662_v61 = vadd.f32 %v6736_v37, %v1598_v31  ;;  %v7722_v55 = vld [vmem:[#allocation14_spill] sm:$0xff] }
 0x34f   : > { %v2539_v26 = vpop.permute.xlu2 %2538 }
 0x350   : > { %v6884_v63 = vmul.f32 %v4196_v21, %v7720_v22  ;;  %v3472_v14 = vpop.f32.mrf.mxu0  ;;  %v2292_v35 = vpop.permute.xlu1 %2291 }
 0x351   : > { %v3919_v47 = vpop.f32.mrf.mxu1  ;;  %2441 = vst.msk [vmem:[#allocation2 + $0x110] sm:$0xff] %vm2409_vm4, %v2292_v35 }
 0x352   : > { %7721 = vst [vmem:[#allocation31_spill] sm:$0xff] %v6884_v63  ;;  %v4073_v23 = vadd.f32 %v3919_v47, %v3470_v11  ;;  %v2813_v38 = vld [vmem:[#allocation2 + $0x108] sm:$0xff]  ;;  %v6888_v46 = vpop.permute.xlu0 %1967  ;;  %v7723_v11 = vld [vmem:[#allocation35_spill] sm:$0xff] }
 0x353   : > { %v2741_v58 = vld [vmem:[#allocation2 + $0x107] sm:$0xff]  ;;  %2685 = vst.msk [vmem:[#allocation2 + $0x110] sm:$0xff] %vm2650_vm5, %v2539_v26  ;;  %4845 = vmatmul.msk.f32.gmra.mxu3 %vm2095_vm3, %v2813_v38  ;;  %v2081_v60 = vmul.f32 %v6888_v46, %v1721_v50  ;;  %v1071_v19 = vadd.f32 %v7723_v11, %v7722_v55  ;;  %v1722_v50 = vmax.f32 %v1662_v61, 0.0  ;;  %v6923_v61 = vpop.f32.mrf.mxu2  ;;  %v7726_v55 = vld [vmem:[#allocation15_spill] sm:$0xff] }
 0x354   : > { %v3639_v32 = vld [vmem:[#allocation2 + $0x101] sm:$0xff]  ;;  %v4137_v62 = vadd.f32 %v6895_v7, %v4073_v23  ;;  %4905 = vmatmul.msk.f32.gmra.mxu0 %vm2095_vm3, %v2741_v58  ;;  %v7727_v11 = vld [vmem:[#allocation37_spill] sm:$0xff] }
 0x355   : > { %4976 = vmatmul.msk.f32.gmra.mxu1 %vm2095_vm3, %v3639_v32  ;;  %2155 = vst.msk [vmem:[#allocation2 + $0x1a0] sm:$0xff] %vm2108_vm2, %v2081_v60  ;;  %v3095_v28 = vpop.f32.mrf.mxu3  ;;  %2562 = vrot.lane.b32.xlu2 %v2081_v60, %s5206_s28  ;;  %v1599_v31 = vadd.f32 %v6838_v9, %v1071_v19  ;;  %v1074_v19 = vadd.f32 %v7727_v11, %v7726_v55  ;;  %v7730_v55 = vld [vmem:[#allocation39_spill] sm:$0xff] }
 0x356   : > { %v4197_v42 = vmax.f32 %v4137_v62, 0.0  ;;  %2321 = vrot.lane.b32.xlu1 %v2081_v60, %s7682_s24  ;;  %v3473_v21 = vadd.f32 %v3472_v14, %v3095_v28 }
 0x357   : > { %v2541_v26 = vpop.permute.xlu2 %2540  ;;  %v1663_v9 = vadd.f32 %v6736_v37, %v1599_v31 }
 0x358   : > { %v6910_v20 = vmul.f32 %v4197_v42, %v7724_v59  ;;  %v3475_v22 = vpop.f32.mrf.mxu0  ;;  %v2294_v35 = vpop.permute.xlu1 %2293 }
 0x359   : > { %v3922_v47 = vpop.f32.mrf.mxu1  ;;  %2442 = vst.msk [vmem:[#allocation2 + $0x118] sm:$0xff] %vm2409_vm4, %v2294_v35  ;;  %v1723_v31 = vmax.f32 %v1663_v9, 0.0 }
 0x35a   : > { %7725 = vst [vmem:[#allocation11_spill] sm:$0xff] %v6910_v20  ;;  %v4074_v23 = vadd.f32 %v3922_v47, %v3473_v21  ;;  %v2814_v38 = vld [vmem:[#allocation2 + $0x110] sm:$0xff]  ;;  %v6914_v14 = vpop.permute.xlu0 %1972 }
 0x35b   : > { %v2742_v58 = vld [vmem:[#allocation2 + $0x10f] sm:$0xff]  ;;  %2686 = vst.msk [vmem:[#allocation2 + $0x118] sm:$0xff] %vm2650_vm5, %v2541_v26  ;;  %4846 = vmatmul.msk.f32.gmra.mxu3 %vm2095_vm3, %v2814_v38  ;;  %v2082_v60 = vmul.f32 %v6914_v14, %v1722_v50 }
 0x35c   : > { %v3640_v32 = vld [vmem:[#allocation2 + $0x109] sm:$0xff]  ;;  %v4138_v62 = vadd.f32 %v6895_v7, %v4074_v23  ;;  %4906 = vmatmul.msk.f32.gmra.mxu0 %vm2095_vm3, %v2742_v58  ;;  %v1600_v23 = vadd.f32 %v6866_v5, %v1074_v19  ;;  %v1527_v19 = vpop.f32.mrf.mxu2 }
 0x35d   : > { %4977 = vmatmul.msk.f32.gmra.mxu1 %vm2095_vm3, %v3640_v32  ;;  %2156 = vst.msk [vmem:[#allocation2 + $0x1a8] sm:$0xff] %vm2108_vm2, %v2082_v60  ;;  %v3098_v28 = vpop.f32.mrf.mxu3  ;;  %2564 = vrot.lane.b32.xlu2 %v2082_v60, %s5206_s28 }
 0x35e   : > { %v4198_v42 = vmax.f32 %v4138_v62, 0.0  ;;  %2323 = vrot.lane.b32.xlu1 %v2082_v60, %s7682_s24  ;;  %v3476_v21 = vadd.f32 %v3475_v22, %v3098_v28  ;;  %v1664_v5 = vadd.f32 %v6736_v37, %v1600_v23 }
 0x35f   : > { %v2543_v50 = vpop.permute.xlu2 %2542 }
 0x360   : > { %v6931_v59 = vmul.f32 %v4198_v42, %v6171_v48  ;;  %v3478_v47 = vpop.f32.mrf.mxu0  ;;  %v2296_v38 = vpop.permute.xlu1 %2295  ;;  %v1724_v23 = vmax.f32 %v1664_v5, 0.0 }
 0x361   : > { %v3925_v26 = vpop.f32.mrf.mxu1  ;;  %2443 = vst.msk [vmem:[#allocation2 + $0x120] sm:$0xff] %vm2409_vm4, %v2296_v38 }
 0x362   : > { %7728 = vst [vmem:[#allocation32_spill] sm:$0xff] %v6931_v59  ;;  %v4075_v35 = vadd.f32 %v3925_v26, %v3476_v21  ;;  %v2815_v58 = vld [vmem:[#allocation2 + $0x118] sm:$0xff]  ;;  %v6935_v22 = vpop.permute.xlu0 %1977  ;;  %v7729_v21 = vld [vmem:[#allocation16_spill] sm:$0xff] }
 0x363   : > { %v2743_v32 = vld [vmem:[#allocation2 + $0x117] sm:$0xff]  ;;  %2687 = vst.msk [vmem:[#allocation2 + $0x120] sm:$0xff] %vm2650_vm5, %v2543_v50  ;;  %4847 = vmatmul.msk.f32.gmra.mxu3 %vm2095_vm3, %v2815_v58  ;;  %v2083_v48 = vmul.f32 %v6935_v22, %v1723_v31  ;;  %v1077_v11 = vadd.f32 %v7730_v55, %v7729_v21  ;;  %v7732_v21 = vld [vmem:[#allocation17_spill] sm:$0xff] }
 0x364   : > { %v3641_v62 = vld [vmem:[#allocation2 + $0x111] sm:$0xff]  ;;  %v4139_v60 = vadd.f32 %v6895_v7, %v4075_v35  ;;  %4907 = vmatmul.msk.f32.gmra.mxu0 %vm2095_vm3, %v2743_v32  ;;  %v1080_v55 = vadd.f32 %v6216_v25, %v7732_v21 }
 0x365   : > { %4978 = vmatmul.msk.f32.gmra.mxu1 %vm2095_vm3, %v3641_v62  ;;  %2157 = vst.msk [vmem:[#allocation2 + $0x1b0] sm:$0xff] %vm2108_vm2, %v2083_v48  ;;  %v3101_v42 = vpop.f32.mrf.mxu3  ;;  %2566 = vrot.lane.b32.xlu2 %v2083_v48, %s5206_s28  ;;  %v1601_v38 = vadd.f32 %v6890_v41, %v1077_v11  ;;  %v7733_v11 = vld [vmem:[#allocation40_spill] sm:$0xff] }
 0x366   : > { %v4199_v9 = vmax.f32 %v4139_v60, 0.0  ;;  %2325 = vrot.lane.b32.xlu1 %v2083_v48, %s7682_s24  ;;  %v3479_v28 = vadd.f32 %v3478_v47, %v3101_v42 }
 0x367   : > { %v2545_v35 = vpop.permute.xlu2 %2544  ;;  %v1665_v41 = vadd.f32 %v6736_v37, %v1601_v38  ;;  %v1602_v38 = vadd.f32 %v6923_v61, %v1080_v55  ;;  %v7735_v55 = vld [vmem:[#allocation18_spill] sm:$0xff] }
 0x368   : > { %v6950_v26 = vmul.f32 %v4199_v9, %v6199_v29  ;;  %v3481_v50 = vpop.f32.mrf.mxu0  ;;  %v2298_v32 = vpop.permute.xlu1 %2297 }
 0x369   : > { %v3928_v31 = vpop.f32.mrf.mxu1  ;;  %2444 = vst.msk [vmem:[#allocation2 + $0x128] sm:$0xff] %vm2409_vm4, %v2298_v32  ;;  %v1725_v32 = vmax.f32 %v1665_v41, 0.0  ;;  %v1666_v41 = vadd.f32 %v6736_v37, %v1602_v38 }
 0x36a   : > { %7731 = vst [vmem:[#allocation29_spill] sm:$0xff] %v6950_v26  ;;  %v4076_v58 = vadd.f32 %v3928_v31, %v3479_v28  ;;  %v2816_v62 = vld [vmem:[#allocation2 + $0x120] sm:$0xff]  ;;  %v6954_v48 = vpop.permute.xlu0 %1982 }
 0x36b   : > { %v2744_v60 = vld [vmem:[#allocation2 + $0x11f] sm:$0xff]  ;;  %2688 = vst.msk [vmem:[#allocation2 + $0x128] sm:$0xff] %vm2650_vm5, %v2545_v35  ;;  %4848 = vmatmul.msk.f32.gmra.mxu3 %vm2095_vm3, %v2816_v62  ;;  %v2084_v29 = vmul.f32 %v6954_v48, %v1724_v23  ;;  %v1530_v62 = vpop.f32.mrf.mxu2 }
 0x36c   : > { %v3642_v47 = vld [vmem:[#allocation2 + $0x119] sm:$0xff]  ;;  %v4140_v42 = vadd.f32 %v6895_v7, %v4076_v58  ;;  %4908 = vmatmul.msk.f32.gmra.mxu0 %vm2095_vm3, %v2744_v60 }
 0x36d   : > { %4979 = vmatmul.msk.f32.gmra.mxu1 %vm2095_vm3, %v3642_v47  ;;  %2158 = vst.msk [vmem:[#allocation2 + $0x1b8] sm:$0xff] %vm2108_vm2, %v2084_v29  ;;  %v3104_v9 = vpop.f32.mrf.mxu3  ;;  %2568 = vrot.lane.b32.xlu2 %v2084_v29, %s5206_s28 }
 0x36e   : > { %v4200_v5 = vmax.f32 %v4140_v42, 0.0  ;;  %2327 = vrot.lane.b32.xlu1 %v2084_v29, %s7682_s24  ;;  %v3482_v28 = vadd.f32 %v3481_v50, %v3104_v9 }
 0x36f   : > { %v2547_v58 = vpop.permute.xlu2 %2546 }
 0x370   : > { %v6969_v31 = vmul.f32 %v4200_v5, %v7733_v11  ;;  %v3484_v35 = vpop.f32.mrf.mxu0  ;;  %v2300_v47 = vpop.permute.xlu1 %2299  ;;  %v1083_v11 = vadd.f32 %v6246_v12, %v7735_v55  ;;  %v7738_v55 = vld [vmem:[#allocation19_spill] sm:$0xff] }
 0x371   : > { %v3931_v23 = vpop.f32.mrf.mxu1  ;;  %2445 = vst.msk [vmem:[#allocation2 + $0x130] sm:$0xff] %vm2409_vm4, %v2300_v47 }
 0x372   : > { %7734 = vst [vmem:[#allocation12_spill] sm:$0xff] %v6969_v31  ;;  %v4077_v60 = vadd.f32 %v3931_v23, %v3482_v28  ;;  %v2817_v42 = vld [vmem:[#allocation2 + $0x128] sm:$0xff]  ;;  %v6973_v9 = vpop.permute.xlu0 %1987  ;;  %v1603_v38 = vadd.f32 %v1527_v19, %v1083_v11  ;;  %v1086_v11 = vadd.f32 %v6277_v49, %v7738_v55 }
 0x373   : > { %v2745_v29 = vld [vmem:[#allocation2 + $0x127] sm:$0xff]  ;;  %2689 = vst.msk [vmem:[#allocation2 + $0x130] sm:$0xff] %vm2650_vm5, %v2547_v58  ;;  %4849 = vmatmul.msk.f32.gmra.mxu3 %vm2095_vm3, %v2817_v42  ;;  %v2085_v61 = vmul.f32 %v6973_v9, %v1725_v32  ;;  %v1726_v42 = vmax.f32 %v1666_v41, 0.0 }
 0x374   : > { %v3643_v50 = vld [vmem:[#allocation2 + $0x121] sm:$0xff]  ;;  %v4141_v25 = vadd.f32 %v6895_v7, %v4077_v60  ;;  %4909 = vmatmul.msk.f32.gmra.mxu0 %vm2095_vm3, %v2745_v29  ;;  %v7736_v23 = vld [vmem:[#allocation41_spill] sm:$0xff]  ;;  %v1667_v41 = vadd.f32 %v6736_v37, %v1603_v38  ;;  %v1604_v38 = vadd.f32 %v1530_v62, %v1086_v11 }
 0x375   : > { %4980 = vmatmul.msk.f32.gmra.mxu1 %vm2095_vm3, %v3643_v50  ;;  %2159 = vst.msk [vmem:[#allocation2 + $0x1c0] sm:$0xff] %vm2108_vm2, %v2085_v61  ;;  %v3107_v28 = vpop.f32.mrf.mxu3  ;;  %2570 = vrot.lane.b32.xlu2 %v2085_v61, %s5206_s28  ;;  %v7741_v55 = vld [vmem:[#allocation20_spill] sm:$0xff] }
 0x376   : > { %v4201_v5 = vmax.f32 %v4141_v25, 0.0  ;;  %2329 = vrot.lane.b32.xlu1 %v2085_v61, %s7682_s24  ;;  %v3485_v21 = vadd.f32 %v3484_v35, %v3107_v28  ;;  %v1533_v35 = vpop.f32.mrf.mxu2  ;;  %v1668_v62 = vadd.f32 %v6736_v37, %v1604_v38  ;;  %v7742_v11 = vld [vmem:[#allocation44_spill] sm:$0xff] }
 0x377   : > { %v2549_v47 = vpop.permute.xlu2 %2548 }
 0x378   : > { %v6988_v58 = vmul.f32 %v4201_v5, %v7736_v23  ;;  %v3487_v32 = vpop.f32.mrf.mxu0  ;;  %v2302_v50 = vpop.permute.xlu1 %2301  ;;  %v7739_v23 = vld [vmem:[#allocation42_spill] sm:$0xff]  ;;  %v1728_v38 = vmax.f32 %v1668_v62, 0.0 }
 0x379   : > { %v3934_v60 = vpop.f32.mrf.mxu1  ;;  %2446 = vst.msk [vmem:[#allocation2 + $0x138] sm:$0xff] %vm2409_vm4, %v2302_v50 }
 0x37a   : > { %7737 = vst [vmem:[#allocation33_spill] sm:$0xff] %v6988_v58  ;;  %v4078_v29 = vadd.f32 %v3934_v60, %v3485_v21  ;;  %v2818_v25 = vld [vmem:[#allocation2 + $0x130] sm:$0xff]  ;;  %v6991_v61 = vpop.permute.xlu0 %1992 }
 0x37b   : > { %v2746_v31 = vld [vmem:[#allocation2 + $0x12f] sm:$0xff]  ;;  %2690 = vst.msk [vmem:[#allocation2 + $0x138] sm:$0xff] %vm2650_vm5, %v2549_v47  ;;  %4850 = vmatmul.msk.f32.gmra.mxu3 %vm2095_vm3, %v2818_v25  ;;  %v2086_v19 = vmul.f32 %v6991_v61, %v1726_v42  ;;  %v1727_v42 = vmax.f32 %v1667_v41, 0.0 }
 0x37c   : > { %v3644_v26 = vld [vmem:[#allocation2 + $0x129] sm:$0xff]  ;;  %v4142_v12 = vadd.f32 %v6895_v7, %v4078_v29  ;;  %4910 = vmatmul.msk.f32.gmra.mxu0 %vm2095_vm3, %v2746_v31 }
 0x37d   : > { %4981 = vmatmul.msk.f32.gmra.mxu1 %vm2095_vm3, %v3644_v26  ;;  %2160 = vst.msk [vmem:[#allocation2 + $0x1c8] sm:$0xff] %vm2108_vm2, %v2086_v19  ;;  %v3110_v28 = vpop.f32.mrf.mxu3  ;;  %2572 = vrot.lane.b32.xlu2 %v2086_v19, %s5206_s28 }
 0x37e   : > { %v4202_v5 = vmax.f32 %v4142_v12, 0.0  ;;  %2331 = vrot.lane.b32.xlu1 %v2086_v19, %s7682_s24  ;;  %v3488_v21 = vadd.f32 %v3487_v32, %v3110_v28  ;;  %v1536_v41 = vpop.f32.mrf.mxu2 }
 0x37f   : > { %v2551_v26 = vpop.permute.xlu2 %2550 }
 0x380   : > { %v7006_v31 = vmul.f32 %v4202_v5, %v7739_v23  ;;  %v3490_v60 = vpop.f32.mrf.mxu0  ;;  %v2304_v50 = vpop.permute.xlu1 %2303  ;;  %v1089_v23 = vadd.f32 %v7742_v11, %v7741_v55  ;;  %v7745_v55 = vld [vmem:[#allocation21_spill] sm:$0xff]  ;;  %v7746_v11 = vld [vmem:[#allocation46_spill] sm:$0xff] }
 0x381   : > { %v3937_v47 = vpop.f32.mrf.mxu1  ;;  %2447 = vst.msk [vmem:[#allocation2 + $0x140] sm:$0xff] %vm2409_vm4, %v2304_v50 }
 0x382   : > { %7740 = vst [vmem:[#allocation13_spill] sm:$0xff] %v7006_v31  ;;  %v4079_v29 = vadd.f32 %v3937_v47, %v3488_v21  ;;  %v2819_v25 = vld [vmem:[#allocation2 + $0x138] sm:$0xff]  ;;  %v7009_v19 = vpop.permute.xlu0 %1997  ;;  %v1605_v50 = vadd.f32 %v1533_v35, %v1089_v23  ;;  %v1092_v23 = vadd.f32 %v7746_v11, %v7745_v55 }
 0x383   : > { %v2747_v12 = vld [vmem:[#allocation2 + $0x137] sm:$0xff]  ;;  %2691 = vst.msk [vmem:[#allocation2 + $0x140] sm:$0xff] %vm2650_vm5, %v2551_v26  ;;  %4851 = vmatmul.msk.f32.gmra.mxu3 %vm2095_vm3, %v2819_v25  ;;  %v2087_v49 = vmul.f32 %v7009_v19, %v1727_v42 }
 0x384   : > { %v3645_v58 = vld [vmem:[#allocation2 + $0x131] sm:$0xff]  ;;  %v4143_v32 = vadd.f32 %v6895_v7, %v4079_v29  ;;  %4911 = vmatmul.msk.f32.gmra.mxu0 %vm2095_vm3, %v2747_v12  ;;  %v7743_v47 = vld [vmem:[#allocation43_spill] sm:$0xff]  ;;  %v1669_v35 = vadd.f32 %v6736_v37, %v1605_v50 }
 0x385   : > { %4982 = vmatmul.msk.f32.gmra.mxu1 %vm2095_vm3, %v3645_v58  ;;  %2161 = vst.msk [vmem:[#allocation2 + $0x1d0] sm:$0xff] %vm2108_vm2, %v2087_v49  ;;  %v3113_v28 = vpop.f32.mrf.mxu3  ;;  %2333 = vrot.lane.b32.xlu0 %v2087_v49, %s7682_s24  ;;  %v7749_v11 = vld [vmem:[#allocation22_spill] sm:$0xff] }
 0x386   : > { %v4203_v5 = vmax.f32 %v4143_v32, 0.0  ;;  %2574 = vrot.lane.b32.xlu2 %v2087_v49, %s5206_s28  ;;  %v3491_v21 = vadd.f32 %v3490_v60, %v3113_v28 }
 0x387   : > { %v2553_v29 = vpop.permute.xlu2 %2552 }
 0x388   : > { %v7024_v26 = vmul.f32 %v4203_v5, %v7743_v47  ;;  %v3493_v42 = vpop.f32.mrf.mxu0  ;;  %v2306_v12 = vpop.permute.xlu1 %2305 }
 0x389   : > { %v3940_v58 = vpop.f32.mrf.mxu1  ;;  %2448 = vst.msk [vmem:[#allocation2 + $0x148] sm:$0xff] %vm2409_vm4, %v2306_v12  ;;  %v1539_v47 = vpop.f32.mrf.mxu2  ;;  %v1606_v12 = vadd.f32 %v1536_v41, %v1092_v23  ;;  %v7750_v23 = vld [vmem:[#allocation48_spill] sm:$0xff] }
 0x38a   : > { %7744 = vst [vmem:[#allocation34_spill] sm:$0xff] %v7024_v26  ;;  %v4080_v25 = vadd.f32 %v3940_v58, %v3491_v21  ;;  %v2820_v32 = vld [vmem:[#allocation2 + $0x140] sm:$0xff]  ;;  %v7027_v49 = vpop.permute.xlu0 %2002  ;;  %v7747_v58 = vld [vmem:[#allocation45_spill] sm:$0xff] }
 0x38b   : > { %v2748_v31 = vld [vmem:[#allocation2 + $0x13f] sm:$0xff]  ;;  %2692 = vst.msk [vmem:[#allocation2 + $0x148] sm:$0xff] %vm2650_vm5, %v2553_v29  ;;  %4852 = vmatmul.msk.f32.gmra.mxu3 %vm2095_vm3, %v2820_v32  ;;  %v2088_v62 = vmul.f32 %v7027_v49, %v1728_v38  ;;  %v1670_v41 = vadd.f32 %v6736_v37, %v1606_v12 }
 0x38c   : > { %v3646_v59 = vld [vmem:[#allocation2 + $0x139] sm:$0xff]  ;;  %v4144_v60 = vadd.f32 %v6895_v7, %v4080_v25  ;;  %4912 = vmatmul.msk.f32.gmra.mxu0 %vm2095_vm3, %v2748_v31 }
 0x38d   : > { %4983 = vmatmul.msk.f32.gmra.mxu1 %vm2095_vm3, %v3646_v59  ;;  %2162 = vst.msk [vmem:[#allocation2 + $0x1d8] sm:$0xff] %vm2108_vm2, %v2088_v62  ;;  %v3116_v28 = vpop.f32.mrf.mxu3  ;;  %v1729_v59 = vmax.f32 %v1669_v35, 0.0 }
 0x38e   : > { %v4204_v5 = vmax.f32 %v4144_v60, 0.0  ;;  %2576 = vrot.lane.b32.xlu2 %v2088_v62, %s5206_s28  ;;  %v3494_v21 = vadd.f32 %v3493_v42, %v3116_v28 }
 0x38f   : > { %v2555_v25 = vpop.permute.xlu2 %2554 }
 0x390   : > { %v7041_v29 = vmul.f32 %v4204_v5, %v7747_v58  ;;  %v3496_v31 = vpop.f32.mrf.mxu0  ;;  %v2308_v32 = vpop.permute.xlu1 %2307  ;;  %v1095_v58 = vadd.f32 %v7750_v23, %v7749_v11  ;;  %v7753_v23 = vld [vmem:[#allocation23_spill] sm:$0xff] }
 0x391   : > { %v3943_v38 = vpop.f32.mrf.mxu1  ;;  %2449 = vst.msk [vmem:[#allocation2 + $0x150] sm:$0xff] %vm2409_vm4, %v2308_v32  ;;  %v1730_v32 = vmax.f32 %v1670_v41, 0.0 }
 0x392   : > { %7748 = vst [vmem:[#allocation36_spill] sm:$0xff] %v7041_v29  ;;  %v4081_v50 = vadd.f32 %v3943_v38, %v3494_v21  ;;  %v2821_v60 = vld [vmem:[#allocation2 + $0x148] sm:$0xff]  ;;  %v7044_v42 = vpop.permute.xlu0 %2007  ;;  %v7751_v38 = vld [vmem:[#allocation47_spill] sm:$0xff] }
 0x393   : > { %v2749_v26 = vld [vmem:[#allocation2 + $0x147] sm:$0xff]  ;;  %2693 = vst.msk [vmem:[#allocation2 + $0x150] sm:$0xff] %vm2650_vm5, %v2555_v25  ;;  %4853 = vmatmul.msk.f32.gmra.mxu3 %vm2095_vm3, %v2821_v60  ;;  %v2089_v35 = vmul.f32 %v7044_v42, %v1729_v59 }
 0x394   : > { %v3647_v20 = vld [vmem:[#allocation2 + $0x141] sm:$0xff]  ;;  %v4145_v28 = vadd.f32 %v6895_v7, %v4081_v50  ;;  %4913 = vmatmul.msk.f32.gmra.mxu0 %vm2095_vm3, %v2749_v26 }
 0x395   : > { %4984 = vmatmul.msk.f32.gmra.mxu1 %vm2095_vm3, %v3647_v20  ;;  %2163 = vst.msk [vmem:[#allocation2 + $0x1e0] sm:$0xff] %vm2108_vm2, %v2089_v35  ;;  %v3119_v21 = vpop.f32.mrf.mxu3  ;;  %v1607_v20 = vadd.f32 %v1539_v47, %v1095_v58  ;;  %v7754_v58 = vld [vmem:[#allocation50_spill] sm:$0xff] }
 0x396   : > { %v4205_v5 = vmax.f32 %v4145_v28, 0.0  ;;  %2578 = vrot.lane.b32.xlu2 %v2089_v35, %s5206_s28  ;;  %v3497_v55 = vadd.f32 %v3496_v31, %v3119_v21  ;;  %v1542_v28 = vpop.f32.mrf.mxu2 }
 0x397   : > { %v2557_v59 = vpop.permute.xlu2 %2556  ;;  %v1671_v41 = vadd.f32 %v6736_v37, %v1607_v20 }
 0x398   : > { %v7058_v25 = vmul.f32 %v4205_v5, %v7751_v38  ;;  %v3499_v26 = vpop.f32.mrf.mxu0  ;;  %v2310_v12 = vpop.permute.xlu1 %2309  ;;  %v7755_v38 = vld [vmem:[#allocation49_spill] sm:$0xff] }
 0x399   : > { %v3946_v50 = vpop.f32.mrf.mxu1  ;;  %2450 = vst.msk [vmem:[#allocation2 + $0x158] sm:$0xff] %vm2409_vm4, %v2310_v12 }
 0x39a   : > { %7752 = vst [vmem:[#allocation14_spill] sm:$0xff] %v7058_v25  ;;  %v4082_v60 = vadd.f32 %v3946_v50, %v3497_v55  ;;  %v2822_v29 = vld [vmem:[#allocation2 + $0x150] sm:$0xff]  ;;  %v7061_v31 = vpop.permute.xlu0 %2012 }
 0x39b   : > { %v2750_v63 = vld [vmem:[#allocation2 + $0x14f] sm:$0xff]  ;;  %2694 = vst.msk [vmem:[#allocation2 + $0x158] sm:$0xff] %vm2650_vm5, %v2557_v59  ;;  %4854 = vmatmul.msk.f32.gmra.mxu3 %vm2095_vm3, %v2822_v29  ;;  %v2090_v47 = vmul.f32 %v7061_v31, %v1730_v32  ;;  %v1098_v29 = vadd.f32 %v7754_v58, %v7753_v23  ;;  %v1731_v32 = vmax.f32 %v1671_v41, 0.0  ;;  %v7757_v58 = vld [vmem:[#allocation24_spill] sm:$0xff] }
 0x39c   : > { %v3648_v45 = vld [vmem:[#allocation2 + $0x149] sm:$0xff]  ;;  %v4146_v21 = vadd.f32 %v6895_v7, %v4082_v60  ;;  %4914 = vmatmul.msk.f32.gmra.mxu0 %vm2095_vm3, %v2750_v63 }
 0x39d   : > { %4985 = vmatmul.msk.f32.gmra.mxu1 %vm2095_vm3, %v3648_v45  ;;  %2164 = vst.msk [vmem:[#allocation2 + $0x1e8] sm:$0xff] %vm2108_vm2, %v2090_v47  ;;  %v3122_v55 = vpop.f32.mrf.mxu3  ;;  %2580 = vrot.lane.b32.xlu1 %v2090_v47, %s5206_s28  ;;  %v1608_v20 = vadd.f32 %v1542_v28, %v1098_v29  ;;  %v7758_v29 = vld [vmem:[#allocation53_spill] sm:$0xff] }
 0x39e   : > { %v4206_v5 = vmax.f32 %v4146_v21, 0.0  ;;  %2335 = vrot.lane.b32.xlu2 %v2088_v62, %s7682_s24  ;;  %v3500_v11 = vadd.f32 %v3499_v26, %v3122_v55  ;;  %v1545_v28 = vpop.f32.mrf.mxu2 }
 0x39f   : > { %v2559_v45 = vpop.permute.xlu2 %2558 }
 0x3a0   : > { %v7076_v63 = vmul.f32 %v4206_v5, %v7755_v38  ;;  %v3502_v50 = vpop.f32.mrf.mxu0  ;;  %v2312_v12 = vpop.permute.xlu1 %2311  ;;  %v1672_v5 = vadd.f32 %v6736_v37, %v1608_v20  ;;  %v1101_v38 = vadd.f32 %v7758_v29, %v7757_v58  ;;  %v7761_v29 = vld [vmem:[#allocation25_spill] sm:$0xff] }
 0x3a1   : > { %v3949_v59 = vpop.f32.mrf.mxu1  ;;  %2451 = vst.msk [vmem:[#allocation2 + $0x160] sm:$0xff] %vm2409_vm4, %v2312_v12 }
 0x3a2   : > { %7756 = vst [vmem:[#allocation35_spill] sm:$0xff] %v7076_v63  ;;  %v4083_v60 = vadd.f32 %v3949_v59, %v3500_v11  ;;  %v2823_v21 = vld [vmem:[#allocation2 + $0x158] sm:$0xff]  ;;  %v7079_v6 = vpop.permute.xlu0 %2017  ;;  %v1732_v12 = vmax.f32 %v1672_v5, 0.0  ;;  %v1609_v20 = vadd.f32 %v1545_v28, %v1101_v38 }
 0x3a3   : > { %v2751_v62 = vld [vmem:[#allocation2 + $0x157] sm:$0xff]  ;;  %2695 = vst.msk [vmem:[#allocation2 + $0x160] sm:$0xff] %vm2650_vm5, %v2559_v45  ;;  %4855 = vmatmul.msk.f32.gmra.mxu3 %vm2095_vm3, %v2823_v21  ;;  %v2091_v41 = vmul.f32 %v7079_v6, %v1731_v32 }
 0x3a4   : > { %v3649_v25 = vld [vmem:[#allocation2 + $0x151] sm:$0xff]  ;;  %v4147_v26 = vadd.f32 %v6895_v7, %v4083_v60  ;;  %4915 = vmatmul.msk.f32.gmra.mxu0 %vm2095_vm3, %v2751_v62  ;;  %v7759_v59 = vld [vmem:[#allocation51_spill] sm:$0xff]  ;;  %v1673_v28 = vadd.f32 %v6736_v37, %v1609_v20 }
 0x3a5   : > { %4986 = vmatmul.msk.f32.gmra.mxu1 %vm2095_vm3, %v3649_v25  ;;  %2165 = vst.msk [vmem:[#allocation2 + $0x1f0] sm:$0xff] %vm2108_vm2, %v2091_v41  ;;  %v3125_v11 = vpop.f32.mrf.mxu3  ;;  %2582 = vrot.lane.b32.xlu0 %v2091_v41, %s5206_s28  ;;  %v7762_v38 = vld [vmem:[#allocation55_spill] sm:$0xff] }
 0x3a6   : > { %v4207_v55 = vmax.f32 %v4147_v26, 0.0  ;;  %2337 = vrot.lane.b32.xlu1 %v2089_v35, %s7682_s24  ;;  %v3503_v23 = vadd.f32 %v3502_v50, %v3125_v11  ;;  %v1733_v37 = vmax.f32 %v1673_v28, 0.0 }
 0x3a7   : > { %v2561_v25 = vpop.permute.xlu2 %2560 }
 0x3a8   : > { %v7094_v45 = vmul.f32 %v4207_v55, %v7759_v59  ;;  %v3505_v32 = vpop.f32.mrf.mxu0  ;;  %v2314_v62 = vpop.permute.xlu1 %2313  ;;  %v1104_v59 = vadd.f32 %v7762_v38, %v7761_v29  ;;  %v7764_v38 = vld [vmem:[#allocation54_spill] sm:$0xff] }
 0x3a9   : > { %v3952_v60 = vpop.f32.mrf.mxu1  ;;  %2452 = vst.msk [vmem:[#allocation2 + $0x168] sm:$0xff] %vm2409_vm4, %v2314_v62 }
 0x3aa   : > { %7760 = vst [vmem:[#allocation38_spill] sm:$0xff] %v7094_v45  ;;  %v4084_v21 = vadd.f32 %v3952_v60, %v3503_v23  ;;  %v2824_v26 = vld [vmem:[#allocation2 + $0x160] sm:$0xff]  ;;  %v7097_v35 = vpop.permute.xlu0 %2022  ;;  %v1548_v23 = vpop.f32.mrf.mxu2 }
 0x3ab   : > { %v2752_v63 = vld [vmem:[#allocation2 + $0x15f] sm:$0xff]  ;;  %2696 = vst.msk [vmem:[#allocation2 + $0x168] sm:$0xff] %vm2650_vm5, %v2561_v25  ;;  %4856 = vmatmul.msk.f32.gmra.mxu3 %vm2095_vm3, %v2824_v26  ;;  %v2092_v5 = vmul.f32 %v7097_v35, %v1732_v12  ;;  %v1610_v20 = vadd.f32 %v1548_v23, %v1104_v59 }
 0x3ac   : > { %v3650_v24 = vld [vmem:[#allocation2 + $0x159] sm:$0xff]  ;;  %v4148_v50 = vadd.f32 %v6895_v7, %v4084_v21  ;;  %4916 = vmatmul.msk.f32.gmra.mxu0 %vm2095_vm3, %v2752_v63  ;;  %v7763_v63 = vld [vmem:[#allocation52_spill] sm:$0xff] }
 0x3ad   : > { %4987 = vmatmul.msk.f32.gmra.mxu1 %vm2095_vm3, %v3650_v24  ;;  %2166 = vst.msk [vmem:[#allocation2 + $0x1f8] sm:$0xff] %vm2108_vm2, %v2092_v5  ;;  %v3128_v11 = vpop.f32.mrf.mxu3  ;;  %2339 = vrot.lane.b32.xlu0 %v2090_v47, %s7682_s24 }
 0x3ae   : > { %v4208_v55 = vmax.f32 %v4148_v50, 0.0  ;;  %2584 = vrot.lane.b32.xlu2 %v2092_v5, %s5206_s28  ;;  %v3506_v58 = vadd.f32 %v3505_v32, %v3128_v11 }
 0x3af   : > { %v2563_v12 = vpop.permute.xlu2 %2562 }
 0x3b0   : > { %v7112_v60 = vmul.f32 %v4208_v55, %v7763_v63  ;;  %v3508_v25 = vpop.f32.mrf.mxu0  ;;  %v2316_v62 = vpop.permute.xlu1 %2315  ;;  %v5106_v55 = vld [vmem:[%s7618_s3] ss:$0 sm:$0xff] }
 0x3b1   : > { %v3955_v24 = vpop.f32.mrf.mxu1  ;;  %2453 = vst.msk [vmem:[#allocation2 + $0x170] sm:$0xff] %vm2409_vm4, %v2316_v62  ;;  %v1674_v11 = vadd.f32 %v5106_v55, %v1610_v20 }
 0x3b2   : > { %v4085_v21 = vadd.f32 %v3955_v24, %v3506_v58  ;;  %v2825_v47 = vld [vmem:[#allocation2 + $0x168] sm:$0xff]  ;;  %v7115_v45 = vpop.permute.xlu0 %2027  ;;  %2697 = vst.msk [vmem:[#allocation2 + $0x170] sm:$0xff] %vm2650_vm5, %v2563_v12 }
 0x3b3   : > { %v2753_v26 = vld [vmem:[#allocation2 + $0x167] sm:$0xff]  ;;  %4857 = vmatmul.msk.f32.gmra.mxu3 %vm2095_vm3, %v2825_v47  ;;  %v2093_v28 = vmul.f32 %v7115_v45, %v1733_v37  ;;  %v1734_v37 = vmax.f32 %v1674_v11, 0.0 }
 0x3b4   : > { %v3651_v50 = vld [vmem:[#allocation2 + $0x161] sm:$0xff]  ;;  %v4149_v32 = vadd.f32 %v6895_v7, %v4085_v21  ;;  %4917 = vmatmul.msk.f32.gmra.mxu0 %vm2095_vm3, %v2753_v26 }
 0x3b5   : > { %4988 = vmatmul.msk.f32.gmra.mxu1 %vm2095_vm3, %v3651_v50  ;;  %v3131_v58 = vpop.f32.mrf.mxu3  ;;  %2586 = vrot.lane.b32.xlu1 %v2093_v28, %s5206_s28 }
 0x3b6   : > { %v4209_v23 = vmax.f32 %v4149_v32, 0.0  ;;  %2341 = vrot.lane.b32.xlu2 %v2091_v41, %s7682_s24  ;;  %v3509_v29 = vadd.f32 %v3508_v25, %v3131_v58 }
 0x3b7   : > { %v2565_v12 = vpop.permute.xlu2 %2564 }
 0x3b8   : > { %v7129_v59 = vmul.f32 %v4209_v23, %v7764_v38  ;;  %v3511_v63 = vpop.f32.mrf.mxu0  ;;  %v2318_v62 = vpop.permute.xlu1 %2317  ;;  %v7765_v23 = vld [vmem:[#allocation56_spill] sm:$0xff] }
 0x3b9   : > { %v3958_v24 = vpop.f32.mrf.mxu1  ;;  %2454 = vst.msk [vmem:[#allocation2 + $0x178] sm:$0xff] %vm2409_vm4, %v2318_v62  ;;  %v2826_v47 = vld [vmem:[#allocation2 + $0x170] sm:$0xff] }
 0x3ba   : > { %v4086_v21 = vadd.f32 %v3958_v24, %v3509_v29  ;;  %v2754_v20 = vld [vmem:[#allocation2 + $0x16f] sm:$0xff]  ;;  %v7132_v50 = vpop.permute.xlu0 %2032  ;;  %2698 = vst.msk [vmem:[#allocation2 + $0x178] sm:$0xff] %vm2650_vm5, %v2565_v12 }
 0x3bb   : > { %v3652_v26 = vld [vmem:[#allocation2 + $0x169] sm:$0xff]  ;;  %4858 = vmatmul.msk.f32.gmra.mxu3 %vm2095_vm3, %v2826_v47  ;;  %v2094_v25 = vmul.f32 %v7132_v50, %v1734_v37 }
 0x3bc   : > { %v4150_v41 = vadd.f32 %v6895_v7, %v4086_v21  ;;  %4918 = vmatmul.msk.f32.gmra.mxu0 %vm2095_vm3, %v2754_v20 }
 0x3bd   : > { %4989 = vmatmul.msk.f32.gmra.mxu1 %vm2095_vm3, %v3652_v26  ;;  %v3134_v55 = vpop.f32.mrf.mxu3  ;;  %2588 = vrot.lane.b32.xlu0 %v2094_v25, %s5206_s28  ;;  %v7767_v26 = vld [vmem:[#allocation26_spill] sm:$0xff] }
 0x3be   : > { %v4210_v32 = vmax.f32 %v4150_v41, 0.0  ;;  %2345 = vrot.lane.b32.xlu2 %v2093_v28, %s7682_s24  ;;  %v3512_v11 = vadd.f32 %v3511_v63, %v3134_v55  ;;  %2343 = vrot.lane.b32.xlu1 %v2092_v5, %s7682_s24  ;;  %v7766_v28 = vld [vmem:[#allocation27_spill] sm:$0xff] }
 0x3bf   : > { %v2567_v38 = vpop.permute.xlu2 %2566 }
 0x3c0   : > { %v7144_v58 = vmul.f32 %v4210_v32, %v7765_v23  ;;  %v3514_v29 = vpop.f32.mrf.mxu0  ;;  %v2320_v12 = vpop.permute.xlu1 %2319  ;;  %v7768_v32 = vld [vmem:[#allocation57_spill] sm:$0xff] }
 0x3c1   : > { %v3961_v24 = vpop.f32.mrf.mxu1  ;;  %2455 = vst.msk [vmem:[#allocation2 + $0x180] sm:$0xff] %vm2409_vm4, %v2320_v12  ;;  %v2827_v37 = vld [vmem:[#allocation2 + $0x178] sm:$0xff] }
 0x3c2   : > { %v4087_v21 = vadd.f32 %v3961_v24, %v3512_v11  ;;  %v2755_v62 = vld [vmem:[#allocation2 + $0x177] sm:$0xff]  ;;  %2699 = vst.msk [vmem:[#allocation2 + $0x180] sm:$0xff] %vm2650_vm5, %v2567_v38 }
 0x3c3   : > { %v3653_v47 = vld [vmem:[#allocation2 + $0x171] sm:$0xff]  ;;  %4859 = vmatmul.msk.f32.gmra.mxu3 %vm2095_vm3, %v2827_v37 }
 0x3c4   : > { %4919 = vmatmul.msk.f32.gmra.mxu0 %vm2095_vm3, %v2755_v62  ;;  %v4151_v5 = vadd.f32 %v6895_v7, %v4087_v21 }
 0x3c5   : > { %4990 = vmatmul.msk.f32.gmra.mxu1 %vm2095_vm3, %v3653_v47  ;;  %2347 = vrot.lane.b32.xlu0 %v2094_v25, %s7682_s24  ;;  %v3137_v20 = vpop.f32.mrf.mxu3 }
 0x3c6   : > { %2472 = vrot.lane.b32.xlu2 %v7766_v28, %s5206_s28  ;;  %v4211_v63 = vmax.f32 %v4151_v5, 0.0  ;;  %2470 = vrot.lane.b32.xlu1 %v7767_v26, %s5206_s28  ;;  %v3515_v41 = vadd.f32 %v3514_v29, %v3137_v20 }
 0x3c7   : > { %v2569_v23 = vpop.permute.xlu2 %2568 }
 0x3c8   : > { %v7158_v55 = vmul.f32 %v4211_v63, %v7768_v32  ;;  %v2322_v24 = vpop.permute.xlu1 %2321 }
 0x3c9   : > { %v3517_v11 = vpop.f32.mrf.mxu0  ;;  %2456 = vst.msk [vmem:[#allocation2 + $0x188] sm:$0xff] %vm2409_vm4, %v2322_v24  ;;  %v2828_v25 = vld [vmem:[#allocation2 + $0x180] sm:$0xff] }
 0x3ca   : > { %v3964_v38 = vpop.f32.mrf.mxu1  ;;  %v2756_v21 = vld [vmem:[#allocation2 + $0x17f] sm:$0xff]  ;;  %2700 = vst.msk [vmem:[#allocation2 + $0x188] sm:$0xff] %vm2650_vm5, %v2569_v23 }
 0x3cb   : > { %v4088_v12 = vadd.f32 %v3964_v38, %v3515_v41  ;;  %v3654_v37 = vld [vmem:[#allocation2 + $0x179] sm:$0xff]  ;;  %4860 = vmatmul.msk.f32.gmra.mxu3 %vm2095_vm3, %v2828_v25 }
 0x3cc   : > { %4920 = vmatmul.msk.f32.gmra.mxu0 %vm2095_vm3, %v2756_v21 }
 0x3cd   : > { %v4152_v29 = vadd.f32 %v6895_v7, %v4088_v12  ;;  %4991 = vmatmul.msk.f32.gmra.mxu1 %vm2095_vm3, %v3654_v37 }
 0x3ce   : > { %v3140_v47 = vpop.f32.mrf.mxu3 }
 0x3cf   : > { %v4212_v62 = vmax.f32 %v4152_v29, 0.0  ;;  %v3518_v5 = vadd.f32 %v3517_v11, %v3140_v47  ;;  %v2571_v20 = vpop.permute.xlu2 %2570 }
 0x3d0   : > { %v2324_v41 = vpop.permute.xlu1 %2323 }
 0x3d1   : > { %v7167_v28 = vmul.f32 %v4212_v62, %v6484_v1  ;;  %v3520_v63 = vpop.f32.mrf.mxu0  ;;  %2457 = vst.msk [vmem:[#allocation2 + $0x190] sm:$0xff] %vm2409_vm4, %v2324_v41  ;;  %v2829_v23 = vld [vmem:[#allocation2 + $0x188] sm:$0xff] }
 0x3d2   : > { %v3967_v26 = vpop.f32.mrf.mxu1  ;;  %v2757_v38 = vld [vmem:[#allocation2 + $0x187] sm:$0xff]  ;;  %2701 = vst.msk [vmem:[#allocation2 + $0x190] sm:$0xff] %vm2650_vm5, %v2571_v20 }
 0x3d3   : > { %v4089_v32 = vadd.f32 %v3967_v26, %v3518_v5  ;;  %v3655_v24 = vld [vmem:[#allocation2 + $0x181] sm:$0xff]  ;;  %4861 = vmatmul.msk.f32.gmra.mxu3 %vm2095_vm3, %v2829_v23 }
 0x3d4   : > { %4921 = vmatmul.msk.f32.gmra.mxu0 %vm2095_vm3, %v2757_v38 }
 0x3d5   : > { %v4153_v11 = vadd.f32 %v6895_v7, %v4089_v32  ;;  %4992 = vmatmul.msk.f32.gmra.mxu1 %vm2095_vm3, %v3655_v24 }
 0x3d6   : > { %v3143_v12 = vpop.f32.mrf.mxu3 }
 0x3d7   : > { %v4213_v1 = vmax.f32 %v4153_v11, 0.0  ;;  %v3521_v25 = vadd.f32 %v3520_v63, %v3143_v12  ;;  %v2573_v29 = vpop.permute.xlu2 %2572 }
 0x3d8   : > { %v2326_v47 = vpop.permute.xlu1 %2325 }
 0x3d9   : > { %v7176_v21 = vmul.f32 %v4213_v1, %v6509_v13  ;;  %v3523_v37 = vpop.f32.mrf.mxu0  ;;  %2458 = vst.msk [vmem:[#allocation2 + $0x198] sm:$0xff] %vm2409_vm4, %v2326_v47  ;;  %v2830_v20 = vld [vmem:[#allocation2 + $0x190] sm:$0xff] }
 0x3da   : > { %v3970_v62 = vpop.f32.mrf.mxu1  ;;  %v2758_v26 = vld [vmem:[#allocation2 + $0x18f] sm:$0xff]  ;;  %2702 = vst.msk [vmem:[#allocation2 + $0x198] sm:$0xff] %vm2650_vm5, %v2573_v29 }
 0x3db   : > { %v4090_v5 = vadd.f32 %v3970_v62, %v3521_v25  ;;  %v3656_v41 = vld [vmem:[#allocation2 + $0x189] sm:$0xff]  ;;  %4862 = vmatmul.msk.f32.gmra.mxu3 %vm2095_vm3, %v2830_v20 }
 0x3dc   : > { %4922 = vmatmul.msk.f32.gmra.mxu0 %vm2095_vm3, %v2758_v26 }
 0x3dd   : > { %v4154_v63 = vadd.f32 %v6895_v7, %v4090_v5  ;;  %4993 = vmatmul.msk.f32.gmra.mxu1 %vm2095_vm3, %v3656_v41 }
 0x3de   : > { %v3146_v32 = vpop.f32.mrf.mxu3 }
 0x3df   : > { %v4214_v13 = vmax.f32 %v4154_v63, 0.0  ;;  %v3524_v23 = vadd.f32 %v3523_v37, %v3146_v32 }
 0x3e0   : > { %v2575_v11 = vpop.permute.xlu2 %2574  ;;  %v2328_v12 = vpop.permute.xlu1 %2327 }
 0x3e1   : > { %v7185_v38 = vmul.f32 %v4214_v13, %v6534_v33  ;;  %v3526_v24 = vpop.f32.mrf.mxu0  ;;  %2459 = vst.msk [vmem:[#allocation2 + $0x1a0] sm:$0xff] %vm2409_vm4, %v2328_v12  ;;  %v2831_v29 = vld [vmem:[#allocation2 + $0x198] sm:$0xff] }
 0x3e2   : > { %v3973_v1 = vpop.f32.mrf.mxu1  ;;  %v2759_v62 = vld [vmem:[#allocation2 + $0x197] sm:$0xff]  ;;  %2703 = vst.msk [vmem:[#allocation2 + $0x1a0] sm:$0xff] %vm2650_vm5, %v2575_v11 }
 0x3e3   : > { %v4091_v25 = vadd.f32 %v3973_v1, %v3524_v23  ;;  %v3657_v47 = vld [vmem:[#allocation2 + $0x191] sm:$0xff]  ;;  %4863 = vmatmul.msk.f32.gmra.mxu3 %vm2095_vm3, %v2831_v29 }
 0x3e4   : > { %4923 = vmatmul.msk.f32.gmra.mxu0 %vm2095_vm3, %v2759_v62 }
 0x3e5   : > { %v4155_v37 = vadd.f32 %v6895_v7, %v4091_v25  ;;  %4994 = vmatmul.msk.f32.gmra.mxu1 %vm2095_vm3, %v3657_v47 }
 0x3e6   : > { %v3149_v5 = vpop.f32.mrf.mxu3 }
 0x3e7   : > { %v4215_v33 = vmax.f32 %v4155_v37, 0.0  ;;  %v3527_v20 = vadd.f32 %v3526_v24, %v3149_v5 }
 0x3e8   : > { %v2577_v63 = vpop.permute.xlu2 %2576  ;;  %v2330_v32 = vpop.permute.xlu1 %2329 }
 0x3e9   : > { %v7194_v26 = vmul.f32 %v4215_v33, %v6557_v3  ;;  %v3529_v41 = vpop.f32.mrf.mxu0  ;;  %2460 = vst.msk [vmem:[#allocation2 + $0x1a8] sm:$0xff] %vm2409_vm4, %v2330_v32  ;;  %v2832_v11 = vld [vmem:[#allocation2 + $0x1a0] sm:$0xff] }
 0x3ea   : > { %v3976_v13 = vpop.f32.mrf.mxu1  ;;  %v2760_v1 = vld [vmem:[#allocation2 + $0x19f] sm:$0xff]  ;;  %2704 = vst.msk [vmem:[#allocation2 + $0x1a8] sm:$0xff] %vm2650_vm5, %v2577_v63 }
 0x3eb   : > { %v4092_v23 = vadd.f32 %v3976_v13, %v3527_v20  ;;  %v3658_v12 = vld [vmem:[#allocation2 + $0x199] sm:$0xff]  ;;  %4864 = vmatmul.msk.f32.gmra.mxu3 %vm2095_vm3, %v2832_v11 }
 0x3ec   : > { %4924 = vmatmul.msk.f32.gmra.mxu0 %vm2095_vm3, %v2760_v1 }
 0x3ed   : > { %v4156_v24 = vadd.f32 %v6895_v7, %v4092_v23  ;;  %4995 = vmatmul.msk.f32.gmra.mxu1 %vm2095_vm3, %v3658_v12 }
 0x3ee   : > { %v3152_v25 = vpop.f32.mrf.mxu3 }
 0x3ef   : > { %v4216_v3 = vmax.f32 %v4156_v24, 0.0  ;;  %v3530_v29 = vadd.f32 %v3529_v41, %v3152_v25 }
 0x3f0   : > { %v2579_v37 = vpop.permute.xlu2 %2578  ;;  %v2332_v5 = vpop.permute.xlu1 %2331 }
 0x3f1   : > { %v7203_v62 = vmul.f32 %v4216_v3, %v6582_v30  ;;  %v3532_v47 = vpop.f32.mrf.mxu0  ;;  %2461 = vst.msk [vmem:[#allocation2 + $0x1b0] sm:$0xff] %vm2409_vm4, %v2332_v5  ;;  %v2833_v63 = vld [vmem:[#allocation2 + $0x1a8] sm:$0xff] }
 0x3f2   : > { %v3979_v33 = vpop.f32.mrf.mxu1  ;;  %v2761_v13 = vld [vmem:[#allocation2 + $0x1a7] sm:$0xff]  ;;  %2705 = vst.msk [vmem:[#allocation2 + $0x1b0] sm:$0xff] %vm2650_vm5, %v2579_v37 }
 0x3f3   : > { %v4093_v20 = vadd.f32 %v3979_v33, %v3530_v29  ;;  %v3659_v32 = vld [vmem:[#allocation2 + $0x1a1] sm:$0xff]  ;;  %4865 = vmatmul.msk.f32.gmra.mxu3 %vm2095_vm3, %v2833_v63 }
 0x3f4   : > { %4925 = vmatmul.msk.f32.gmra.mxu0 %vm2095_vm3, %v2761_v13 }
 0x3f5   : > { %v4157_v41 = vadd.f32 %v6895_v7, %v4093_v20  ;;  %4996 = vmatmul.msk.f32.gmra.mxu1 %vm2095_vm3, %v3659_v32 }
 0x3f6   : > { %v3155_v23 = vpop.f32.mrf.mxu3 }
 0x3f7   : > { %v4217_v30 = vmax.f32 %v4157_v41, 0.0  ;;  %v3533_v11 = vadd.f32 %v3532_v47, %v3155_v23  ;;  %v2334_v1 = vpop.permute.xlu0 %2333  ;;  %v7226_v23 = vld [vmem:[%s7620_s5] ss:$0 sm:$0xff] }
 0x3f8   : > { %2462 = vst.msk [vmem:[#allocation2 + $0x1b8] sm:$0xff] %vm2409_vm4, %v2334_v1  ;;  %v2336_v3 = vpop.permute.xlu2 %2335 }
 0x3f9   : > { %v7212_v12 = vmul.f32 %v4217_v30, %v6607_v15  ;;  %v3535_v24 = vpop.f32.mrf.mxu0  ;;  %2463 = vst.msk [vmem:[#allocation2 + $0x1c0] sm:$0xff] %vm2409_vm4, %v2336_v3  ;;  %v2834_v37 = vld [vmem:[#allocation2 + $0x1b0] sm:$0xff] }
 0x3fa   : > { %v3982_v25 = vpop.f32.mrf.mxu1  ;;  %v2762_v33 = vld [vmem:[#allocation2 + $0x1af] sm:$0xff] }
 0x3fb   : > { %v4094_v29 = vadd.f32 %v3982_v25, %v3533_v11  ;;  %v3660_v5 = vld [vmem:[#allocation2 + $0x1a9] sm:$0xff]  ;;  %4866 = vmatmul.msk.f32.gmra.mxu3 %vm2095_vm3, %v2834_v37 }
 0x3fc   : > { %4926 = vmatmul.msk.f32.gmra.mxu0 %vm2095_vm3, %v2762_v33 }
 0x3fd   : > { %v4158_v47 = vadd.f32 %v6895_v7, %v4094_v29  ;;  %4997 = vmatmul.msk.f32.gmra.mxu1 %vm2095_vm3, %v3660_v5 }
 0x3fe   : > { %v3158_v20 = vpop.f32.mrf.mxu3 }
 0x3ff   : > { %v4218_v15 = vmax.f32 %v4158_v47, 0.0  ;;  %v3536_v63 = vadd.f32 %v3535_v24, %v3158_v20 }
 0x401   : > { %v7221_v13 = vmul.f32 %v4218_v15, %v6631_v43  ;;  %v3538_v32 = vpop.f32.mrf.mxu0 }
 0x402   : > { %v3985_v41 = vpop.f32.mrf.mxu1 }
 0x403   : > { %v4095_v30 = vadd.f32 %v3985_v41, %v3536_v63 }
 0x405   : > { %v4159_v11 = vadd.f32 %v7226_v23, %v4095_v30 }
 0x406   : > { %v3161_v7 = vpop.f32.mrf.mxu3 }
 0x407   : > { %v4219_v1 = vmax.f32 %v4159_v11, 0.0  ;;  %v3539_v3 = vadd.f32 %v3538_v32, %v3161_v7 }
 0x408   : > { %v2585_v25 = vpop.permute.xlu2 %2584 }
 0x409   : > { %v7230_v29 = vmul.f32 %v4219_v1, %v6651_v56  ;;  %v3541_v24 = vpop.f32.mrf.mxu0 }
 0x40a   : > { %v3988_v43 = vpop.f32.mrf.mxu1 }
 0x40b   : > { %v4096_v37 = vadd.f32 %v3988_v43, %v3539_v3 }
 0x40d   : > { %v4160_v33 = vadd.f32 %v7226_v23, %v4096_v37 }
 0x40e   : > { %v3164_v47 = vpop.f32.mrf.mxu3 }
 0x40f   : > { %v4220_v5 = vmax.f32 %v4160_v33, 0.0  ;;  %v3542_v15 = vadd.f32 %v3541_v24, %v3164_v47  ;;  %v2581_v63 = vpop.permute.xlu1 %2580 }
 0x410   : > { %v2342_v20 = vpop.permute.xlu2 %2341  ;;  %2706 = vst.msk [vmem:[#allocation2 + $0x1b8] sm:$0xff] %vm2650_vm5, %v2581_v63 }
 0x411   : > { %v7234_v41 = vmul.f32 %v4220_v5, %v6669_v54  ;;  %v3544_v30 = vpop.f32.mrf.mxu0  ;;  %2466 = vst.msk [vmem:[#allocation2 + $0x1d8] sm:$0xff] %vm2409_vm4, %v2342_v20 }
 0x412   : > { %v3991_v32 = vpop.f32.mrf.mxu1 }
 0x413   : > { %7769 = vst [vmem:[#allocation15_spill] sm:$0xff] %v7234_v41  ;;  %v4097_v56 = vadd.f32 %v3991_v32, %v3542_v15 }
 0x415   : > { %v4161_v11 = vadd.f32 %v7226_v23, %v4097_v56 }
 0x416   : > { %v3167_v7 = vpop.f32.mrf.mxu3 }
 0x417   : > { %v4221_v1 = vmax.f32 %v4161_v11, 0.0  ;;  %v3545_v3 = vadd.f32 %v3544_v30, %v3167_v7  ;;  %v2583_v43 = vpop.permute.xlu0 %2582  ;;  %v2835_v5 = vld [vmem:[#allocation2 + $0x1b8] sm:$0xff] }
 0x418   : > { %v2346_v37 = vpop.permute.xlu2 %2345  ;;  %2707 = vst.msk [vmem:[#allocation2 + $0x1c0] sm:$0xff] %vm2650_vm5, %v2583_v43  ;;  %v2338_v54 = vpop.permute.xlu1 %2337  ;;  %v2763_v47 = vld [vmem:[#allocation2 + $0x1b7] sm:$0xff]  ;;  %4867 = vmatmul.msk.f32.gmra.mxu3 %vm2095_vm3, %v2835_v5 }
 0x419   : > { %v7240_v24 = vmul.f32 %v4221_v1, %v6689_v17  ;;  %v3547_v33 = vpop.f32.mrf.mxu0  ;;  %v3661_v20 = vld [vmem:[#allocation2 + $0x1b1] sm:$0xff]  ;;  %2468 = vst.msk [vmem:[#allocation2 + $0x1e8] sm:$0xff] %vm2409_vm4, %v2346_v37  ;;  %4927 = vmatmul.msk.f32.gmra.mxu0 %vm2095_vm3, %v2763_v47 }
 0x41a   : > { %v3994_v41 = vpop.f32.mrf.mxu1  ;;  %2464 = vst.msk [vmem:[#allocation2 + $0x1c8] sm:$0xff] %vm2409_vm4, %v2338_v54  ;;  %4998 = vmatmul.msk.f32.gmra.mxu1 %vm2095_vm3, %v3661_v20 }
 0x41b   : > { %v4098_v15 = vadd.f32 %v3994_v41, %v3545_v3  ;;  %2708 = vst.msk [vmem:[#allocation2 + $0x1c8] sm:$0xff] %vm2650_vm5, %v2585_v25 }
 0x41d   : > { %v4162_v17 = vadd.f32 %v7226_v23, %v4098_v15 }
 0x41e   : > { %v3170_v30 = vpop.f32.mrf.mxu3 }
 0x41f   : > { %v4222_v63 = vmax.f32 %v4162_v17, 0.0  ;;  %v3548_v32 = vadd.f32 %v3547_v33, %v3170_v30  ;;  %v2340_v56 = vpop.permute.xlu0 %2339  ;;  %v2836_v1 = vld [vmem:[#allocation2 + $0x1c0] sm:$0xff] }
 0x420   : > { %v2473_v11 = vpop.permute.xlu2 %2472  ;;  %v2764_v7 = vld [vmem:[#allocation2 + $0x1bf] sm:$0xff]  ;;  %2465 = vst.msk [vmem:[#allocation2 + $0x1d0] sm:$0xff] %vm2409_vm4, %v2340_v56  ;;  %4868 = vmatmul.msk.f32.gmra.mxu3 %vm2095_vm3, %v2836_v1 }
 0x421   : > { %v3662_v43 = vld [vmem:[#allocation2 + $0x1b9] sm:$0xff]  ;;  %v7251_v37 = vmul.f32 %v4222_v63, %v6709_v44  ;;  %v3550_v41 = vpop.f32.mrf.mxu0  ;;  %4928 = vmatmul.msk.f32.gmra.mxu0 %vm2095_vm3, %v2764_v7 }
 0x422   : > { %v3997_v3 = vpop.f32.mrf.mxu1  ;;  %4999 = vmatmul.msk.f32.gmra.mxu1 %vm2095_vm3, %v3662_v43  ;;  %v2837_v17 = vld [vmem:[#allocation2 + $0x1c8] sm:$0xff] }
 0x423   : > { %v4099_v25 = vadd.f32 %v3997_v3, %v3548_v32  ;;  %v2765_v63 = vld [vmem:[#allocation2 + $0x1c7] sm:$0xff] }
 0x424   : > { %v3663_v32 = vld [vmem:[#allocation2 + $0x1c1] sm:$0xff] }
 0x425   : > { %v4163_v33 = vadd.f32 %v7226_v23, %v4099_v25 }
 0x426   : > { %v3173_v5 = vpop.f32.mrf.mxu3 }
 0x427   : > { %v4223_v54 = vmax.f32 %v4163_v33, 0.0  ;;  %v3551_v47 = vadd.f32 %v3550_v41, %v3173_v5  ;;  %v2587_v20 = vpop.permute.xlu1 %2586 }
 0x428   : > { %2709 = vst.msk [vmem:[#allocation2 + $0x1d0] sm:$0xff] %vm2650_vm5, %v2587_v20  ;;  %4869 = vmatmul.msk.f32.gmra.mxu3 %vm2095_vm3, %v2837_v17 }
 0x429   : > { %v7259_v44 = vmul.f32 %v4223_v54, %v6729_v0  ;;  %v3553_v15 = vpop.f32.mrf.mxu0  ;;  %4929 = vmatmul.msk.f32.gmra.mxu0 %vm2095_vm3, %v2765_v63 }
 0x42a   : > { %v4000_v30 = vpop.f32.mrf.mxu1  ;;  %5000 = vmatmul.msk.f32.gmra.mxu1 %vm2095_vm3, %v3663_v32 }
 0x42b   : > { %v4100_v56 = vadd.f32 %v4000_v30, %v3551_v47 }
 0x42d   : > { %v4164_v11 = vadd.f32 %v7226_v23, %v4100_v56 }
 0x42e   : > { %v3176_v7 = vpop.f32.mrf.mxu3 }
 0x42f   : > { %v4224_v1 = vmax.f32 %v4164_v11, 0.0  ;;  %v3554_v0 = vadd.f32 %v3553_v15, %v3176_v7  ;;  %v2589_v43 = vpop.permute.xlu0 %2588  ;;  %v2838_v41 = vld [vmem:[#allocation2 + $0x1d0] sm:$0xff] }
 0x430   : > { %v2766_v3 = vld [vmem:[#allocation2 + $0x1cf] sm:$0xff]  ;;  %2710 = vst.msk [vmem:[#allocation2 + $0x1d8] sm:$0xff] %vm2650_vm5, %v2589_v43  ;;  %v2344_v5 = vpop.permute.xlu1 %2343  ;;  %4870 = vmatmul.msk.f32.gmra.mxu3 %vm2095_vm3, %v2838_v41 }
 0x431   : > { %v3664_v25 = vld [vmem:[#allocation2 + $0x1c9] sm:$0xff]  ;;  %v7267_v33 = vmul.f32 %v4224_v1, %v6755_v4  ;;  %v3556_v54 = vpop.f32.mrf.mxu0  ;;  %2467 = vst.msk [vmem:[#allocation2 + $0x1e0] sm:$0xff] %vm2409_vm4, %v2344_v5  ;;  %4930 = vmatmul.msk.f32.gmra.mxu0 %vm2095_vm3, %v2766_v3 }
 0x432   : > { %v4003_v20 = vpop.f32.mrf.mxu1  ;;  %5001 = vmatmul.msk.f32.gmra.mxu1 %vm2095_vm3, %v3664_v25 }
 0x433   : > { %v4101_v47 = vadd.f32 %v4003_v20, %v3554_v0 }
 0x435   : > { %v4165_v15 = vadd.f32 %v7226_v23, %v4101_v47 }
 0x436   : > { %v3179_v63 = vpop.f32.mrf.mxu3 }
 0x437   : > { %v4225_v17 = vmax.f32 %v4165_v15, 0.0  ;;  %v3557_v4 = vadd.f32 %v3556_v54, %v3179_v63  ;;  %v2348_v30 = vpop.permute.xlu0 %2347  ;;  %v2839_v32 = vld [vmem:[#allocation2 + $0x1d8] sm:$0xff] }
 0x438   : > { %v2767_v56 = vld [vmem:[#allocation2 + $0x1d7] sm:$0xff]  ;;  %2469 = vst.msk [vmem:[#allocation2 + $0x1f0] sm:$0xff] %vm2409_vm4, %v2348_v30  ;;  %v2471_v43 = vpop.permute.xlu1 %2470  ;;  %4871 = vmatmul.msk.f32.gmra.mxu3 %vm2095_vm3, %v2839_v32  ;;  %v2840_v47 = vld [vmem:[#allocation2 + $0x1e0] sm:$0xff] }
 0x439   : > { %v3665_v11 = vld [vmem:[#allocation2 + $0x1d1] sm:$0xff]  ;;  %v7276_v1 = vmul.f32 %v4225_v17, %v6777_v8  ;;  %v3559_v7 = vpop.f32.mrf.mxu0  ;;  %4931 = vmatmul.msk.f32.gmra.mxu0 %vm2095_vm3, %v2767_v56  ;;  %v2768_v15 = vld [vmem:[#allocation2 + $0x1df] sm:$0xff]  ;;  %v2841_v43 = vld [vmem:[#allocation2 + $0x1e8] sm:$0xff] }
 0x43a   : > { %v4006_v41 = vpop.f32.mrf.mxu1  ;;  %5002 = vmatmul.msk.f32.gmra.mxu1 %vm2095_vm3, %v3665_v11  ;;  %v3666_v63 = vld [vmem:[#allocation2 + $0x1d9] sm:$0xff] }
 0x43b   : > { %v4102_v0 = vadd.f32 %v4006_v41, %v3557_v4  ;;  %v2769_v41 = vld [vmem:[#allocation2 + $0x1e7] sm:$0xff] }
 0x43d   : > { %v4166_v3 = vadd.f32 %v7226_v23, %v4102_v0 }
 0x43e   : > { %v3182_v54 = vpop.f32.mrf.mxu3 }
 0x43f   : > { %v4226_v25 = vmax.f32 %v4166_v3, 0.0  ;;  %v3560_v5 = vadd.f32 %v3559_v7, %v3182_v54  ;;  %v3667_v3 = vld [vmem:[#allocation2 + $0x1e1] sm:$0xff] }
 0x440   : > { %4872 = vmatmul.msk.f32.gmra.mxu3 %vm2095_vm3, %v2840_v47 }
 0x441   : > { %v7284_v8 = vmul.f32 %v4226_v25, %v6801_v18  ;;  %v3562_v20 = vpop.f32.mrf.mxu0  ;;  %4932 = vmatmul.msk.f32.gmra.mxu0 %vm2095_vm3, %v2768_v15 }
 0x442   : > { %v4009_v17 = vpop.f32.mrf.mxu1  ;;  %5003 = vmatmul.msk.f32.gmra.mxu1 %vm2095_vm3, %v3666_v63  ;;  %v2770_v63 = vld [vmem:[#allocation2 + $0x1ef] sm:$0xff] }
 0x443   : > { %v4103_v4 = vadd.f32 %v4009_v17, %v3560_v5  ;;  %v2842_v17 = vld [vmem:[#allocation2 + $0x1f0] sm:$0xff] }
 0x445   : > { %v4167_v30 = vadd.f32 %v7226_v23, %v4103_v4 }
 0x446   : > { %v3185_v56 = vpop.f32.mrf.mxu3 }
 0x447   : > { %v4227_v32 = vmax.f32 %v4167_v30, 0.0  ;;  %v3563_v11 = vadd.f32 %v3562_v20, %v3185_v56  ;;  %v3668_v30 = vld [vmem:[#allocation2 + $0x1e9] sm:$0xff] }
 0x448   : > { %4873 = vmatmul.msk.f32.gmra.mxu3 %vm2095_vm3, %v2841_v43 }
 0x449   : > { %v7291_v18 = vmul.f32 %v4227_v32, %v6823_v34  ;;  %v3565_v7 = vpop.f32.mrf.mxu0  ;;  %4933 = vmatmul.msk.f32.gmra.mxu0 %vm2095_vm3, %v2769_v41 }
 0x44a   : > { %v4012_v0 = vpop.f32.mrf.mxu1  ;;  %5004 = vmatmul.msk.f32.gmra.mxu1 %vm2095_vm3, %v3667_v3  ;;  %v3669_v3 = vld [vmem:[#allocation2 + $0x1f1] sm:$0xff] }
 0x44b   : > { %v4104_v25 = vadd.f32 %v4012_v0, %v3563_v11 }
 0x44d   : > { %v4168_v54 = vadd.f32 %v7226_v23, %v4104_v25 }
 0x44e   : > { %v3188_v47 = vpop.f32.mrf.mxu3 }
 0x44f   : > { %v4228_v5 = vmax.f32 %v4168_v54, 0.0  ;;  %v3566_v20 = vadd.f32 %v3565_v7, %v3188_v47 }
 0x450   : > { %4874 = vmatmul.msk.f32.gmra.mxu3 %vm2095_vm3, %v2842_v17 }
 0x451   : > { %v7298_v34 = vmul.f32 %v4228_v5, %v6845_v53  ;;  %v3568_v15 = vpop.f32.mrf.mxu0  ;;  %4934 = vmatmul.msk.f32.gmra.mxu0 %vm2095_vm3, %v2770_v63 }
 0x452   : > { %v4015_v4 = vpop.f32.mrf.mxu1  ;;  %5005 = vmatmul.msk.f32.gmra.mxu1 %vm2095_vm3, %v3668_v30 }
 0x453   : > { %v4105_v32 = vadd.f32 %v4015_v4, %v3566_v20 }
 0x455   : > { %v4169_v56 = vadd.f32 %v7226_v23, %v4105_v32 }
 0x456   : > { %v3191_v43 = vpop.f32.mrf.mxu3 }
 0x457   : > { %v4229_v11 = vmax.f32 %v4169_v56, 0.0  ;;  %v3569_v7 = vadd.f32 %v3568_v15, %v3191_v43 }
 0x459   : > { %v7305_v53 = vmul.f32 %v4229_v11, %v6869_v39  ;;  %v3571_v41 = vpop.f32.mrf.mxu0 }
 0x45a   : > { %v4018_v0 = vpop.f32.mrf.mxu1  ;;  %5006 = vmatmul.msk.f32.gmra.mxu1 %vm2095_vm3, %v3669_v3 }
 0x45b   : > { %v4106_v25 = vadd.f32 %v4018_v0, %v3569_v7 }
 0x45d   : > { %v4170_v54 = vadd.f32 %v7226_v23, %v4106_v25 }
 0x45e   : > { %v3194_v47 = vpop.f32.mrf.mxu3 }
 0x45f   : > { %v4230_v5 = vmax.f32 %v4170_v54, 0.0  ;;  %v3572_v20 = vadd.f32 %v3571_v41, %v3194_v47 }
 0x461   : > { %v7310_v17 = vmul.f32 %v4230_v5, %v6888_v46  ;;  %v3574_v63 = vpop.f32.mrf.mxu0 }
 0x462   : > { %v4021_v4 = vpop.f32.mrf.mxu1 }
 0x463   : > { %v4107_v15 = vadd.f32 %v4021_v4, %v3572_v20 }
 0x465   : > { %v4171_v39 = vadd.f32 %v7226_v23, %v4107_v15 }
 0x466   : > { %v3197_v32 = vpop.f32.mrf.mxu3 }
 0x467   : > { %v4231_v30 = vmax.f32 %v4171_v39, 0.0  ;;  %v3575_v56 = vadd.f32 %v3574_v63, %v3197_v32 }
 0x469   : > { %v7314_v11 = vmul.f32 %v4231_v30, %v6914_v14  ;;  %v3577_v7 = vpop.f32.mrf.mxu0 }
 0x46a   : > { %v4024_v43 = vpop.f32.mrf.mxu1 }
 0x46b   : > { %v4108_v0 = vadd.f32 %v4024_v43, %v3575_v56 }
 0x46d   : > { %v4172_v3 = vadd.f32 %v7226_v23, %v4108_v0 }
 0x46e   : > { %v3200_v25 = vpop.f32.mrf.mxu3 }
 0x46f   : > { %v4232_v41 = vmax.f32 %v4172_v3, 0.0  ;;  %v3578_v46 = vadd.f32 %v3577_v7, %v3200_v25 }
 0x471   : > { %v7318_v54 = vmul.f32 %v4232_v41, %v6935_v22  ;;  %v3580_v20 = vpop.f32.mrf.mxu0 }
 0x472   : > { %v4027_v5 = vpop.f32.mrf.mxu1 }
 0x473   : > { %v4109_v47 = vadd.f32 %v4027_v5, %v3578_v46 }
 0x475   : > { %v4173_v4 = vadd.f32 %v7226_v23, %v4109_v47 }
 0x476   : > { %v3203_v15 = vpop.f32.mrf.mxu3 }
 0x477   : > { %v4233_v63 = vmax.f32 %v4173_v4, 0.0  ;;  %v3581_v14 = vadd.f32 %v3580_v20, %v3203_v15 }
 0x479   : > { %v7322_v39 = vmul.f32 %v4233_v63, %v6954_v48  ;;  %v3583_v43 = vpop.f32.mrf.mxu0 }
 0x47a   : > { %v4030_v30 = vpop.f32.mrf.mxu1 }
 0x47b   : > { %v4110_v32 = vadd.f32 %v4030_v30, %v3581_v14 }
 0x47d   : > { %v4174_v56 = vadd.f32 %v7226_v23, %v4110_v32 }
 0x47e   : > { %v3206_v0 = vpop.f32.mrf.mxu3 }
 0x47f   : > { %v4234_v7 = vmax.f32 %v4174_v56, 0.0  ;;  %v3584_v22 = vadd.f32 %v3583_v43, %v3206_v0 }
 0x481   : > { %v7326_v3 = vmul.f32 %v4234_v7, %v6973_v9 }
 0x496   : > { %v3586_v41 = vpop.f32.mrf.mxu0 }
 0x497   : > { %v4033_v25 = vpop.f32.mrf.mxu1 }
 0x498   : > { %v4111_v46 = vadd.f32 %v4033_v25, %v3584_v22 }
 0x49a   : > { %v4175_v5 = vadd.f32 %v7226_v23, %v4111_v46 }
 0x49b   : > { %v3209_v20 = vpop.f32.mrf.mxu3 }
 0x49c   : > { %v4235_v47 = vmax.f32 %v4175_v5, 0.0  ;;  %v3587_v48 = vadd.f32 %v3586_v41, %v3209_v20 }
 0x49e   : > { %v7330_v4 = vmul.f32 %v4235_v47, %v6991_v61  ;;  %v3589_v63 = vpop.f32.mrf.mxu0 }
 0x49f   : > { %v4036_v15 = vpop.f32.mrf.mxu1 }
 0x4a0   : > { %v4112_v14 = vadd.f32 %v4036_v15, %v3587_v48 }
 0x4a2   : > { %v4176_v30 = vadd.f32 %v7226_v23, %v4112_v14 }
 0x4a3   : > { %v3212_v56 = vpop.f32.mrf.mxu3 }
 0x4a4   : > { %v4236_v32 = vmax.f32 %v4176_v30, 0.0  ;;  %v3590_v9 = vadd.f32 %v3589_v63, %v3212_v56 }
 0x4a6   : > { %v7334_v43 = vmul.f32 %v4236_v32, %v7009_v19  ;;  %v3592_v7 = vpop.f32.mrf.mxu0 }
 0x4a7   : > { %v4039_v0 = vpop.f32.mrf.mxu1 }
 0x4a8   : > { %v4113_v22 = vadd.f32 %v4039_v0, %v3590_v9 }
 0x4aa   : > { %v4177_v25 = vadd.f32 %v7226_v23, %v4113_v22 }
 0x4ab   : > { %v3215_v46 = vpop.f32.mrf.mxu3 }
 0x4ac   : > { %v4237_v41 = vmax.f32 %v4177_v25, 0.0  ;;  %v3593_v61 = vadd.f32 %v3592_v7, %v3215_v46 }
 0x4ae   : > { %v7338_v5 = vmul.f32 %v4237_v41, %v7027_v49  ;;  %v3595_v47 = vpop.f32.mrf.mxu0 }
 0x4af   : > { %v4042_v20 = vpop.f32.mrf.mxu1 }
 0x4b0   : > { %v4114_v48 = vadd.f32 %v4042_v20, %v3593_v61 }
 0x4b2   : > { %v4178_v15 = vadd.f32 %v7226_v23, %v4114_v48 }
 0x4b3   : > { %v3218_v14 = vpop.f32.mrf.mxu3 }
 0x4b4   : > { %v4238_v63 = vmax.f32 %v4178_v15, 0.0  ;;  %v3596_v19 = vadd.f32 %v3595_v47, %v3218_v14 }
 0x4b6   : > { %v7342_v30 = vmul.f32 %v4238_v63, %v7044_v42  ;;  %v3598_v32 = vpop.f32.mrf.mxu0 }
 0x4b7   : > { %v4045_v56 = vpop.f32.mrf.mxu1 }
 0x4b8   : > { %v4115_v9 = vadd.f32 %v4045_v56, %v3596_v19 }
 0x4ba   : > { %v4179_v0 = vadd.f32 %v7226_v23, %v4115_v9 }
 0x4bb   : > { %v3221_v22 = vpop.f32.mrf.mxu3 }
 0x4bc   : > { %v4239_v7 = vmax.f32 %v4179_v0, 0.0  ;;  %v3599_v49 = vadd.f32 %v3598_v32, %v3221_v22 }
 0x4be   : > { %v7346_v25 = vmul.f32 %v4239_v7, %v7061_v31  ;;  %v3601_v46 = vpop.f32.mrf.mxu0 }
 0x4bf   : > { %v4048_v41 = vpop.f32.mrf.mxu1 }
 0x4c0   : > { %v4116_v61 = vadd.f32 %v4048_v41, %v3599_v49 }
 0x4c2   : > { %v4180_v20 = vadd.f32 %v7226_v23, %v4116_v61 }
 0x4c3   : > { %v3224_v48 = vpop.f32.mrf.mxu3 }
 0x4c4   : > { %v4240_v47 = vmax.f32 %v4180_v20, 0.0  ;;  %v3602_v42 = vadd.f32 %v3601_v46, %v3224_v48 }
 0x4c6   : > { %v7350_v15 = vmul.f32 %v4240_v47, %v7079_v6  ;;  %v3604_v19 = vpop.f32.mrf.mxu0 }
 0x4c7   : > { %v4051_v63 = vpop.f32.mrf.mxu1 }
 0x4c8   : > { %v4117_v14 = vadd.f32 %v4051_v63, %v3602_v42 }
 0x4ca   : > { %v4181_v56 = vadd.f32 %v7226_v23, %v4117_v14 }
 0x4cb   : > { %v3227_v9 = vpop.f32.mrf.mxu3 }
 0x4cc   : > { %v4241_v32 = vmax.f32 %v4181_v56, 0.0  ;;  %v3605_v31 = vadd.f32 %v3604_v19, %v3227_v9 }
 0x4ce   : > { %v7354_v0 = vmul.f32 %v4241_v32, %v7097_v35  ;;  %v3607_v41 = vpop.f32.mrf.mxu0 }
 0x4cf   : > { %v4054_v7 = vpop.f32.mrf.mxu1 }
 0x4d0   : > { %v4118_v22 = vadd.f32 %v4054_v7, %v3605_v31 }
 0x4d2   : > { %v4182_v49 = vadd.f32 %v7226_v23, %v4118_v22 }
 0x4d3   : > { %v3230_v6 = vpop.f32.mrf.mxu3 }
 0x4d4   : > { %v4242_v46 = vmax.f32 %v4182_v49, 0.0  ;;  %v3608_v61 = vadd.f32 %v3607_v41, %v3230_v6 }
 0x4d6   : > { %v7358_v20 = vmul.f32 %v4242_v46, %v7115_v45 }
 0x4d7   : > { %v4057_v47 = vpop.f32.mrf.mxu1 }
 0x4d8   : > { %v4119_v48 = vadd.f32 %v4057_v47, %v3608_v61 }
 0x4da   : > { %v4183_v42 = vadd.f32 %v7226_v23, %v4119_v48  ;;  %4307 = sbr.rel (%p5007_p0) target bundleno = 1249 (0x4e1), region = 64 }
 0x4dc   : > { %v4243_v63 = vmax.f32 %v4183_v42, 0.0 }
 0x4de   : > { %v7362_v14 = vmul.f32 %v4243_v63, %v7132_v50 }
 0x4df   : > { %vm4308_vm6 = vcmask 516096   ;;  %v5208_v35 = vmov 0.0  }
 0x4e0   : > { %4309 = vst.msk [vmem:[#allocation3] sm:$0x1] %vm4308_vm6, %v5208_v35 }
 0x4e1 PF: > { %vm4311_vm7 = vcmask 523264   ;;  %v7771_v46 = vld [vmem:[#allocation30_spill] sm:$0xff]  ;;  %v7772_v61 = vld [vmem:[#allocation28_spill] sm:$0xff]  ;;  %v7774_v63 = vld [vmem:[#allocation31_spill] sm:$0xff]  ;;  %vm4438_vm8 = vcmask 516096   ;;  %p5008_p1 = scmp.ne.s32.totalorder %s5186_s16, 1 }
 0x4e2   : > { %v4312_v45 = vsel %vm4311_vm7, %v6477_v52, 0.0  ;;  %v4313_v23 = vsel %vm4311_vm7, %v6500_v36, 0.0  ;;  %v4315_v50 = vsel %vm4311_vm7, %v6523_v10, 0.0  ;;  %v4317_v56 = vsel %vm4311_vm7, %v6548_v2, 0.0  ;;  %v7773_v48 = vld [vmem:[#allocation10_spill] sm:$0xff] }
 0x4e3   : > { %v4314_v19 = vadd.f32 %v4313_v23, %v4312_v45  ;;  %v4319_v9 = vsel %vm4311_vm7, %v6573_v16, 0.0  ;;  %v4321_v7 = vsel %vm4311_vm7, %v6598_v40, 0.0  ;;  %v4323_v52 = vsel %vm4311_vm7, %v6623_v27, 0.0  ;;  %v7775_v45 = vld [vmem:[#allocation11_spill] sm:$0xff] }
 0x4e4   : > { %v4325_v10 = vsel %vm4311_vm7, %v6761_v57, 0.0  ;;  %v4327_v2 = vsel %vm4311_vm7, %v6785_v51, 0.0  ;;  %v4329_v16 = vsel %vm4311_vm7, %v7771_v46, 0.0  ;;  %v4331_v40 = vsel %vm4311_vm7, %v7772_v61, 0.0 }
 0x4e5   : > { %v4316_v32 = vadd.f32 %v4315_v50, %v4314_v19  ;;  %v4333_v27 = vsel %vm4311_vm7, %v7773_v48, 0.0  ;;  %v4335_v57 = vsel %vm4311_vm7, %v7774_v63, 0.0  ;;  %v4337_v51 = vsel %vm4311_vm7, %v7775_v45, 0.0  ;;  %v7776_v50 = vld [vmem:[#allocation32_spill] sm:$0xff] }
 0x4e6   : > { %v4339_v19 = vsel %vm4311_vm7, %v7776_v50, 0.0 }
 0x4e7   : > { %v4318_v31 = vadd.f32 %v4317_v56, %v4316_v32  ;;  %v7777_v32 = vld [vmem:[#allocation29_spill] sm:$0xff] }
 0x4e9   : > { %v4320_v22 = vadd.f32 %v4319_v9, %v4318_v31  ;;  %v4341_v9 = vsel %vm4311_vm7, %v7777_v32, 0.0  ;;  %v4361_v32 = vsel %vm4311_vm7, %v7129_v59, 0.0  ;;  %v4371_v59 = vsel %vm4311_vm7, %v7185_v38, 0.0 }
 0x4ea   : > { %v4381_v38 = vsel %vm4311_vm7, %v7230_v29, 0.0  ;;  %v4391_v29 = vsel %vm4311_vm7, %v7267_v33, 0.0  ;;  %v4401_v33 = vsel %vm4311_vm7, %v7305_v53, 0.0  ;;  %v4411_v53 = vsel %vm4311_vm7, %v7326_v3, 0.0 }
 0x4eb   : > { %v4322_v36 = vadd.f32 %v4321_v7, %v4320_v22  ;;  %v7778_v7 = vld [vmem:[#allocation12_spill] sm:$0xff]  ;;  %v4421_v3 = vsel %vm4311_vm7, %v7346_v25, 0.0 }
 0x4ec   : > { %v4343_v22 = vsel %vm4311_vm7, %v7778_v7, 0.0 }
 0x4ed   : > { %v4324_v49 = vadd.f32 %v4323_v52, %v4322_v36  ;;  %v7779_v36 = vld [vmem:[#allocation33_spill] sm:$0xff] }
 0x4ef   : > { %v4326_v41 = vadd.f32 %v4325_v10, %v4324_v49  ;;  %v4345_v10 = vsel %vm4311_vm7, %v7779_v36, 0.0  ;;  %v4367_v36 = vsel %vm4311_vm7, %v7167_v28, 0.0  ;;  %v4377_v28 = vsel %vm4311_vm7, %v7212_v12, 0.0 }
 0x4f0   : > { %v4387_v12 = vsel %vm4311_vm7, %v7251_v37, 0.0  ;;  %v4397_v37 = vsel %vm4311_vm7, %v7291_v18, 0.0  ;;  %v4407_v18 = vsel %vm4311_vm7, %v7318_v54, 0.0  ;;  %v4417_v54 = vsel %vm4311_vm7, %v7338_v5, 0.0 }
 0x4f1   : > { %v4328_v6 = vadd.f32 %v4327_v2, %v4326_v41  ;;  %v7780_v2 = vld [vmem:[#allocation13_spill] sm:$0xff]  ;;  %v4427_v5 = vsel %vm4311_vm7, %v7358_v20, 0.0 }
 0x4f2   : > { %v4347_v41 = vsel %vm4311_vm7, %v7780_v2, 0.0 }
 0x4f3   : > { %v4330_v47 = vadd.f32 %v4329_v16, %v4328_v6  ;;  %v7781_v16 = vld [vmem:[#allocation34_spill] sm:$0xff] }
 0x4f4   : > { %v4349_v6 = vsel %vm4311_vm7, %v7781_v16, 0.0 }
 0x4f5   : > { %v4332_v42 = vadd.f32 %v4331_v40, %v4330_v47  ;;  %v7782_v40 = vld [vmem:[#allocation36_spill] sm:$0xff] }
 0x4f6   : > { %v4351_v47 = vsel %vm4311_vm7, %v7782_v40, 0.0  ;;  %v7786_v40 = vld [vmem:[#allocation15_spill] sm:$0xff] }
 0x4f7   : > { %v4334_v35 = vadd.f32 %v4333_v27, %v4332_v42  ;;  %v7783_v27 = vld [vmem:[#allocation14_spill] sm:$0xff] }
 0x4f8   : > { %v4353_v42 = vsel %vm4311_vm7, %v7783_v27, 0.0 }
 0x4f9   : > { %v4336_v23 = vadd.f32 %v4335_v57, %v4334_v35  ;;  %v7784_v57 = vld [vmem:[#allocation35_spill] sm:$0xff] }
 0x4fa   : > { %v4355_v35 = vsel %vm4311_vm7, %v7784_v57, 0.0  ;;  %v4393_v57 = vsel %vm4311_vm7, %v7276_v1, 0.0  ;;  %v4403_v1 = vsel %vm4311_vm7, %v7310_v17, 0.0  ;;  %v4413_v17 = vsel %vm4311_vm7, %v7330_v4, 0.0 }
 0x4fb   : > { %v4338_v56 = vadd.f32 %v4337_v51, %v4336_v23  ;;  %v7785_v51 = vld [vmem:[#allocation38_spill] sm:$0xff]  ;;  %v4423_v4 = vsel %vm4311_vm7, %v7350_v15, 0.0  ;;  %v4310_v15 = vld [vmem:[#allocation3] sm:$0x1] }
 0x4fc   : > { %v4357_v23 = vsel %vm4311_vm7, %v7785_v51, 0.0 }
 0x4fd   : > { %v4340_v31 = vadd.f32 %v4339_v19, %v4338_v56  ;;  %v4359_v19 = vsel %vm4311_vm7, %v7112_v60, 0.0  ;;  %v4369_v60 = vsel %vm4311_vm7, %v7176_v21, 0.0  ;;  %v4379_v21 = vsel %vm4311_vm7, %v7221_v13, 0.0 }
 0x4fe   : > { %v4389_v13 = vsel %vm4311_vm7, %v7259_v44, 0.0  ;;  %v4399_v44 = vsel %vm4311_vm7, %v7298_v34, 0.0  ;;  %v4409_v34 = vsel %vm4311_vm7, %v7322_v39, 0.0  ;;  %v4419_v39 = vsel %vm4311_vm7, %v7342_v30, 0.0 }
 0x4ff   : > { %v4342_v52 = vadd.f32 %v4341_v9, %v4340_v31  ;;  %v4363_v31 = vsel %vm4311_vm7, %v7144_v58, 0.0  ;;  %v4373_v58 = vsel %vm4311_vm7, %v7194_v26, 0.0  ;;  %v4383_v26 = vsel %vm4311_vm7, %v7786_v40, 0.0 }
 0x500   : > { %v4429_v30 = vsel %vm4311_vm7, %v7362_v14, 0.0 }
 0x501   : > { %v4344_v49 = vadd.f32 %v4343_v22, %v4342_v52  ;;  %v4365_v22 = vsel %vm4311_vm7, %v7158_v55, 0.0  ;;  %v4375_v55 = vsel %vm4311_vm7, %v7203_v62, 0.0  ;;  %v4385_v62 = vsel %vm4311_vm7, %v7240_v24, 0.0 }
 0x502   : > { %v4395_v24 = vsel %vm4311_vm7, %v7284_v8, 0.0  ;;  %v4405_v8 = vsel %vm4311_vm7, %v7314_v11, 0.0  ;;  %v4415_v11 = vsel %vm4311_vm7, %v7334_v43, 0.0  ;;  %v4425_v43 = vsel %vm4311_vm7, %v7354_v0, 0.0 }
 0x503   : > { %v4346_v46 = vadd.f32 %v4345_v10, %v4344_v49 }
 0x505   : > { %v4348_v61 = vadd.f32 %v4347_v41, %v4346_v46 }
 0x507   : > { %v4350_v48 = vadd.f32 %v4349_v6, %v4348_v61 }
 0x509   : > { %v4352_v63 = vadd.f32 %v4351_v47, %v4350_v48 }
 0x50b   : > { %v4354_v45 = vadd.f32 %v4353_v42, %v4352_v63 }
 0x50d   : > { %v4356_v50 = vadd.f32 %v4355_v35, %v4354_v45 }
 0x50f   : > { %v4358_v56 = vadd.f32 %v4357_v23, %v4356_v50 }
 0x511   : > { %v4360_v9 = vadd.f32 %v4359_v19, %v4358_v56 }
 0x513   : > { %v4362_v7 = vadd.f32 %v4361_v32, %v4360_v9 }
 0x515   : > { %v4364_v52 = vadd.f32 %v4363_v31, %v4362_v7 }
 0x517   : > { %v4366_v10 = vadd.f32 %v4365_v22, %v4364_v52 }
 0x519   : > { %v4368_v49 = vadd.f32 %v4367_v36, %v4366_v10 }
 0x51b   : > { %v4370_v2 = vadd.f32 %v4369_v60, %v4368_v49 }
 0x51d   : > { %v4372_v41 = vadd.f32 %v4371_v59, %v4370_v2 }
 0x51f   : > { %v4374_v46 = vadd.f32 %v4373_v58, %v4372_v41 }
 0x521   : > { %v4376_v16 = vadd.f32 %v4375_v55, %v4374_v46 }
 0x523   : > { %v4378_v6 = vadd.f32 %v4377_v28, %v4376_v16 }
 0x525   : > { %v4380_v61 = vadd.f32 %v4379_v21, %v4378_v6 }
 0x527   : > { %v4382_v47 = vadd.f32 %v4381_v38, %v4380_v61 }
 0x529   : > { %v4384_v48 = vadd.f32 %v4383_v26, %v4382_v47 }
 0x52b   : > { %v4386_v27 = vadd.f32 %v4385_v62, %v4384_v48 }
 0x52d   : > { %v4388_v42 = vadd.f32 %v4387_v12, %v4386_v27 }
 0x52f   : > { %v4390_v63 = vadd.f32 %v4389_v13, %v4388_v42 }
 0x531   : > { %v4392_v35 = vadd.f32 %v4391_v29, %v4390_v63 }
 0x533   : > { %v4394_v45 = vadd.f32 %v4393_v57, %v4392_v35 }
 0x535   : > { %v4396_v51 = vadd.f32 %v4395_v24, %v4394_v45 }
 0x537   : > { %v4398_v23 = vadd.f32 %v4397_v37, %v4396_v51 }
 0x539   : > { %v4400_v50 = vadd.f32 %v4399_v44, %v4398_v23 }
 0x53b   : > { %v4402_v19 = vadd.f32 %v4401_v33, %v4400_v50 }
 0x53d   : > { %v4404_v56 = vadd.f32 %v4403_v1, %v4402_v19 }
 0x53f   : > { %v4406_v32 = vadd.f32 %v4405_v8, %v4404_v56 }
 0x541   : > { %v4408_v9 = vadd.f32 %v4407_v18, %v4406_v32 }
 0x543   : > { %v4410_v31 = vadd.f32 %v4409_v34, %v4408_v9 }
 0x545   : > { %v4412_v7 = vadd.f32 %v4411_v53, %v4410_v31 }
 0x547   : > { %v4414_v22 = vadd.f32 %v4413_v17, %v4412_v7 }
 0x549   : > { %v4416_v52 = vadd.f32 %v4415_v11, %v4414_v22 }
 0x54b   : > { %v4418_v36 = vadd.f32 %v4417_v54, %v4416_v52 }
 0x54d   : > { %v4420_v10 = vadd.f32 %v4419_v39, %v4418_v36 }
 0x54f   : > { %v4422_v60 = vadd.f32 %v4421_v3, %v4420_v10 }
 0x551   : > { %v4424_v49 = vadd.f32 %v4423_v4, %v4422_v60 }
 0x553   : > { %v4426_v59 = vadd.f32 %v4425_v43, %v4424_v49 }
 0x555   : > { %v4428_v2 = vadd.f32 %v4427_v5, %v4426_v59 }
 0x557   : > { %v4430_v58 = vadd.f32 %v4429_v30, %v4428_v2 }
 0x559   : > { %v4431_v41 = vrot.slane %v4430_v58, 4 }
 0x55b   : > { %v4432_v25 = vadd.f32 %v4431_v41, %v4430_v58 }
 0x55d   : > { %v4433_v55 = vrot.slane %v4432_v25, 2 }
 0x55f   : > { %v4434_v46 = vadd.f32 %v4433_v55, %v4432_v25 }
 0x561   : > { %v4435_v28 = vrot.slane %v4434_v46, 1 }
 0x563   : > { %v4436_v16 = vadd.f32 %v4435_v28, %v4434_v46  ;;  %4443 = sbr.rel (%p5008_p1) target bundleno = 1659 (0x67b), region = 68 }
 0x565   : > { %v4437_v21 = vadd.f32 %v4436_v16, %v4310_v15 }
 0x567   : > { %4439 = vst.msk [vmem:[#allocation3] sm:$0x1] %vm4438_vm8, %v4437_v21 }
 0x568   : > { %v4453_v0 = vld [vmem:[%s7621_s6 + $0x38] sm:$0xff]  ;;  %v4452_v20 = vld [vmem:[%s7621_s6 + $0x30] sm:$0xff]  ;;  %v4451_v14 = vld [vmem:[%s7621_s6 + $0x28] sm:$0xff]  ;;  %vm4516_vm9 = vcmask 73728  }
 0x569   : > { %4466 = vmatpush.msra.mxu0 %v4453_v0  ;;  %v4494_v6 = vld [vmem:[%s7623_s8 + $0x78] sm:$0xff]  ;;  %v4493_v38 = vld [vmem:[%s7623_s8 + $0x70] sm:$0xff]  ;;  %v4450_v61 = vld [vmem:[%s7621_s6 + $0x20] sm:$0xff] }
 0x56a   : > { %4496 = vmatpush.msra.mxu1 %v4494_v6  ;;  %v4492_v40 = vld [vmem:[%s7623_s8 + $0x68] sm:$0xff]  ;;  %v4449_v26 = vld [vmem:[%s7621_s6 + $0x18] sm:$0xff]  ;;  %v4491_v47 = vld [vmem:[%s7623_s8 + $0x60] sm:$0xff] }
 0x56b   : > { %4467 = vmatpush.msra.mxu0 %v4452_v20  ;;  %v4448_v62 = vld [vmem:[%s7621_s6 + $0x10] sm:$0xff]  ;;  %v4490_v12 = vld [vmem:[%s7623_s8 + $0x58] sm:$0xff]  ;;  %v4447_v27 = vld [vmem:[%s7621_s6 + $0x8] sm:$0xff] }
 0x56c   : > { %4497 = vmatpush.msra.mxu1 %v4493_v38  ;;  %v4489_v13 = vld [vmem:[%s7623_s8 + $0x50] sm:$0xff]  ;;  %v4446_v42 = vld [vmem:[%s7621_s6] sm:$0xff]  ;;  %v4488_v63 = vld [vmem:[%s7623_s8 + $0x48] sm:$0xff] }
 0x56d   : > { %4468 = vmatpush.msra.mxu0 %v4451_v14  ;;  %v4487_v57 = vld [vmem:[%s7623_s8 + $0x40] sm:$0xff]  ;;  %v4486_v35 = vld [vmem:[%s7623_s8 + $0x38] sm:$0xff]  ;;  %v4485_v24 = vld [vmem:[%s7623_s8 + $0x30] sm:$0xff] }
 0x56e   : > { %4498 = vmatpush.msra.mxu1 %v4492_v40  ;;  %v4444_v48 = vld [vmem:[#allocation3] sm:$0x1]  ;;  %v4484_v45 = vld [vmem:[%s7623_s8 + $0x28] sm:$0xff]  ;;  %v4483_v37 = vld [vmem:[%s7623_s8 + $0x20] sm:$0xff] }
 0x56f   : > { %4469 = vmatpush.msra.mxu0 %v4450_v61  ;;  %v4445_v29 = vmul.f32 0.001953125, %v4444_v48  ;;  %v4482_v51 = vld [vmem:[%s7623_s8 + $0x18] sm:$0xff]  ;;  %v4481_v44 = vld [vmem:[%s7623_s8 + $0x10] sm:$0xff]  ;;  %v4480_v23 = vld [vmem:[%s7623_s8 + $0x8] sm:$0xff] }
 0x570   : > { %4499 = vmatpush.msra.mxu1 %v4491_v47  ;;  %v4479_v33 = vld [vmem:[%s7623_s8] sm:$0xff] }
 0x571   : > { %4470 = vmatpush.msra.mxu0 %v4449_v26  ;;  %v4454_v50 = vld [vmem:[%s7622_s7] sm:$0x1] }
 0x572   : > { %4500 = vmatpush.msra.mxu1 %v4490_v12  ;;  %v4495_v56 = vld [vmem:[%s7624_s9] sm:$0x1] }
 0x573   : > { %4471 = vmatpush.msra.mxu0 %v4448_v62 }
 0x574   : > { %4501 = vmatpush.msra.mxu1 %v4489_v13 }
 0x575   : > { %4472 = vmatpush.msra.mxu0 %v4447_v27 }
 0x576   : > { %4502 = vmatpush.msra.mxu1 %v4488_v63 }
 0x577   : > { %4473 = vmatpush.msra.mxu0 %v4446_v42 }
 0x578   : > { %5009 = vmatmul.msk.f32.vlgmr.msra.gmra.mxu0 %vm4311_vm7, %v4445_v29  ;;  %4503 = vmatpush.msra.mxu1 %v4487_v57 }
 0x57a   : > { %4504 = vmatpush.msra.mxu1 %v4486_v35 }
 0x57c   : > { %4505 = vmatpush.msra.mxu1 %v4485_v24 }
 0x57e   : > { %4506 = vmatpush.msra.mxu1 %v4484_v45 }
 0x580   : > { %4507 = vmatpush.msra.mxu1 %v4483_v37 }
 0x582   : > { %4508 = vmatpush.msra.mxu1 %v4482_v51 }
 0x584   : > { %4509 = vmatpush.msra.mxu1 %v4481_v44 }
 0x586   : > { %4510 = vmatpush.msra.mxu1 %v4480_v23 }
 0x588   : > { %4511 = vmatpush.msra.mxu1 %v4479_v33 }
 0x5f5   : > { %v4475_v1 = vpop.f32.mrf.mxu0 }
 0x5f6   : > { %v4476_v19 = vadd.f32 %v4475_v1, %v4454_v50 }
 0x5f8   : > { %v4478_v8 = vmax.f32 %v4476_v19, 0.0 }
 0x5fa   : > { %4512 = vmatmul.f32.vlgmr.msra.gmra.mxu1 %v4478_v8 }
 0x677   : > { %v4513_v18 = vpop.f32.mrf.mxu1 }
 0x678   : > { %v4514_v32 = vadd.f32 %v4513_v18, %v4495_v56 }
 0x67a   : > { %4517 = vst.msk [vmem:[%s7366_s21] sm:$0x1] %vm4516_vm9, %v4514_v32 }
 0x67b PF: > { %s4527_s11 = scalar_lea.hbm %s7625_s10, %s5190_s17  ;;  %s4529_s12 = sshll.u32 %s7366_s21, 4  ;;  %s4530_s12 = int_to_ptr.vmem [resolvable:$true] %s4529_s12 }
 0x67c   : > { %s4531_s28 = sshll.u32 %s4527_s11, 4  ;;  %s7787_s24 = sand.u32 1, %s5178_s14   ;;  %s4532_s28 = int_to_ptr.hbm [resolvable:$true] %s4531_s28 }
 0x67d   : > { %s4519_s16 = scalar_lea.sflag [#allocation5], %s7787_s24  ;;  %s5122_s22 = sshra.s32 %s4532_s28, 4  ;;  %s5123_s22 = int_to_ptr.hbm [resolvable:$true] %s5122_s22 }
 0x67e   : > { %s5124_s23 = scalar_lea.hbm %s5123_s22, 1  ;;  %s5128_s27 = scalar_lea.hbm %s7625_s10, 2 }
 0x67f   : > { %p5125_p2 = scmp.ne.s32.totalorder %s5123_s22, %s5124_s23  ;;  %p5129_p6 = scmp.lt.s32.totalorder %s5123_s22, %s7625_s10 }
 0x680   : > { %p5130_p7 = scmp.lt.s32.totalorder %s5128_s27, %s5124_s23 }
 0x681   : > { %p5126_p4 = pnand %p5125_p2, %p5313_p3 }
 0x682   : > { %p5131_p8 = por %p5130_p7, %p5129_p6 }
 0x683   : > { %p5127_p5 = pneg %p5126_p4 }
 0x685   : > { %p5132_p10 = pnand %p5131_p8, %p5127_p5 }
 0x687   : > { %5135 = shalt.err (!%p5132_p10)
}
 0x688   : > { %5022 = dma.vmem_to_hbm [thread:$0]  (%p5313_p3), %s4530_s12, 16, %s4532_s28, %s4519_s16  }
 0x689 PF: > { %p5028_p11 = scmp.ge.s32.totalorder %s5202_s20, 2  ;;  %s4543_s17 = sand.u32 1, %s5174_s13  }
 0x68a   : > { %s4544_s0 = scalar_lea.sflag [#allocation5], %s4543_s17 }
 0x68b   : > { %p5025_p12 = pnand %p5028_p11, %p5323_p9 }
 0x68d   : > { %p5026_p13 = pneg %p5025_p12 }
 0x68f   : > { %5169 = dma.done.wait (%p5026_p13), %s4544_s0, 16  }
 0x690   : > { %5171 = vsyncadd (%p5026_p13), %s4544_s0, 4294967280  ;;  %s23_s20 = sadd.s32 1, %s5202_s20   ;;  %s7788_s17 = sld [smem:[#allocation7_spill]] }
 0x691   : > { %p20_p0 = scmp.ge.s32.totalorder %s23_s20, 6   ;;  %s7789_s1 = sld [smem:[#allocation8_spill]] }
 0x692   : > { %s7790_s19 = sld [smem:[#allocation9_spill]]  ;;  %s7791_s13 = smov %s5178_s14 }
 0x693   : > { %s7792_s14 = smov %s5182_s15  ;;  %s7793_s15 = smov %s5331_s29 }
 0x694   : > { %s7794_s16 = smov %s5194_s18  ;;  %22 = sbr.rel (!%p20_p0) target bundleno = 8 (0x8), region = 107 }
 0x697   : > { %s7795_s18 = smov %s7789_s1 }
 0x699   :  { %4549 = vsyncpa [#allocation5], 1 }
 0x69a   :  { %4551 = vsyncpa [#allocation5 + $0x1], 1 }

</bundles_post_ra>
